<compile_context>
chip_gen: v5e
topology: v5e:2x2
jax: 0.10.0
libtpu: 0.0.40
codegen_flags: <defaults>
</compile_context>

<pallas_src>
import jax
import jax.numpy as jnp
from jax.experimental import pallas as pl
from jax.experimental.pallas import tpu as pltpu

INPUT_SIZE = 28 * 28          # 784 (fixed by Unflatten(-1, (1, 28, 28)))
NUM_CLASSES = 10
LATENT_SIZE = 15
HIDDEN_DIM = 256

IN_PAD = 896                  # 7 * 128 >= 784 : lane-dense decoder output / dw4 cols
LATENT_PAD = 128              # padded latent width (lane-dense)
HEAD_PAD = 2 * LATENT_PAD     # fused [mu_pad | logvar_pad] head matmul width
LV_OFF = 32                   # lane offset of the packed logvar copy in the heads store
MAX_TM = 512                  # batch tile cap (multiple of 16)


def _round_up(a, b):
    return (a + b - 1) // b * b


# --------------------------------------------------------------------------- kernel
def _cvae_kernel(
    x_ref, epsc_ref,
    w1x_ref, w1c_ref, b1_ref, w2_ref, b2_ref, w3_ref, b3_ref,
    wh_ref, bh_ref,
    dw1_ref, db1_ref, dw2_ref, db2_ref, dw3_ref, db3_ref, dw4_ref, db4_ref,
    xhat_ref, heads_ref,
):
    f32 = jnp.float32
    bf16 = jnp.bfloat16

    def dense(a, w_ref, b_ref, relu):
        y = jnp.dot(a.astype(bf16), w_ref[...], preferred_element_type=f32) + b_ref[...]
        return jnp.maximum(y, 0.0) if relu else y

    epsc = epsc_ref[...]                      # (tm, 128) f32: eps @ [0:15], c @ [15:25]

    # encoder layer 1 split: x-part + c-part (c rides in epsc; W1c's eps rows are 0)
    h = jnp.dot(x_ref[...].astype(bf16), w1x_ref[...], preferred_element_type=f32)
    h = h + jnp.dot(epsc.astype(bf16), w1c_ref[...], preferred_element_type=f32)
    h = jnp.maximum(h + b1_ref[...], 0.0)
    h = dense(h, w2_ref, b2_ref, True)
    h = dense(h, w3_ref, b3_ref, True)

    # fused heads (tm, 256): mu @ [0:15], logvar copy @ [32:47], logvar @ [128:143]
    heads = dense(h, wh_ref, bh_ref, False)
    heads_ref[...] = heads[:, :LATENT_PAD]    # packed lane-dense (tm, 128) f32 store

    mu_pad = heads[:, :LATENT_PAD]            # mu @ [0:15]; logvar copy @ [32:47]; 0 else
    logvar_pad = heads[:, LATENT_PAD:]        # logvar @ [0:15]; 0 else -> exp(0)=1

    # reparametrize; padded head lanes are zero so exp(0)=1 there and c passes
    # through at lanes [15:25].  Lanes [32:47] pick up the logvar copy, but those
    # rows of dw1 are zero, so the decoder is unaffected.
    z_pad = mu_pad + jnp.exp(0.5 * logvar_pad) * epsc

    # decoder: first layer consumes the [z | c | ...] tile against zero-padded dw1
    d = dense(z_pad, dw1_ref, db1_ref, True)
    d = dense(d, dw2_ref, db2_ref, True)
    d = dense(d, dw3_ref, db3_ref, True)
    logits = dense(d, dw4_ref, db4_ref, False)
    xhat_ref[...] = jax.nn.sigmoid(logits).astype(xhat_ref.dtype)   # bf16 store


# --------------------------------------------------------------------------- params
def _linear_params(key, fan_in, fan_out):
    """nn.Linear-style init; weight as (fan_in, fan_out), bias as (1, fan_out)."""
    kw, kb = jax.random.split(key)
    bound = 1.0 / jnp.sqrt(jnp.float32(fan_in))
    w = jax.random.uniform(kw, (fan_in, fan_out), jnp.float32, -bound, bound)
    b = jax.random.uniform(kb, (1, fan_out), jnp.float32, -bound, bound)
    return w, b


def init_cvae_params(key):
    keys = jax.random.split(key, 9)
    enc_in = INPUT_SIZE + NUM_CLASSES
    dec_in = LATENT_SIZE + NUM_CLASSES
    raw = {}
    raw["enc1_w"], raw["enc1_b"] = _linear_params(keys[0], enc_in, HIDDEN_DIM)
    raw["enc2_w"], raw["enc2_b"] = _linear_params(keys[1], HIDDEN_DIM, HIDDEN_DIM)
    raw["enc3_w"], raw["enc3_b"] = _linear_params(keys[2], HIDDEN_DIM, HIDDEN_DIM)
    raw["mu_w"], raw["mu_b"] = _linear_params(keys[3], HIDDEN_DIM, LATENT_SIZE)
    raw["lv_w"], raw["lv_b"] = _linear_params(keys[4], HIDDEN_DIM, LATENT_SIZE)
    raw["dec1_w"], raw["dec1_b"] = _linear_params(keys[5], dec_in, HIDDEN_DIM)
    raw["dec2_w"], raw["dec2_b"] = _linear_params(keys[6], HIDDEN_DIM, HIDDEN_DIM)
    raw["dec3_w"], raw["dec3_b"] = _linear_params(keys[7], HIDDEN_DIM, HIDDEN_DIM)
    raw["dec4_w"], raw["dec4_b"] = _linear_params(keys[8], HIDDEN_DIM, INPUT_SIZE)
    return raw


def pack_params(raw):
    """Pack torch-layout params into the padded, bf16, kernel layout."""
    f32, bf16 = jnp.float32, jnp.bfloat16

    def pad2(a, shape):
        out = jnp.zeros(shape, a.dtype)
        return out.at[: a.shape[0], : a.shape[1]].set(a)

    # encoder layer 1, split: x-part (784,256); c-part placed at rows [15:25] of a
    # 128-row weight so it contracts directly against the [eps | c | 0] tile.
    w1x = raw["enc1_w"][:INPUT_SIZE].astype(bf16)
    w1c = jnp.zeros((LATENT_PAD, HIDDEN_DIM), f32)
    w1c = w1c.at[LATENT_SIZE:LATENT_SIZE + NUM_CLASSES].set(raw["enc1_w"][INPUT_SIZE:])

    # fused heads (256, 256): mu @ cols [0:15]; logvar copy @ cols [32:47] (for the
    # packed 128-wide store); logvar @ cols [128:143] (reparam-aligned).
    wh = jnp.zeros((HIDDEN_DIM, HEAD_PAD), f32)
    wh = wh.at[:, :LATENT_SIZE].set(raw["mu_w"])
    wh = wh.at[:, LV_OFF:LV_OFF + LATENT_SIZE].set(raw["lv_w"])
    wh = wh.at[:, LATENT_PAD:LATENT_PAD + LATENT_SIZE].set(raw["lv_w"])
    bh = jnp.zeros((1, HEAD_PAD), f32)
    bh = bh.at[:, :LATENT_SIZE].set(raw["mu_b"])
    bh = bh.at[:, LV_OFF:LV_OFF + LATENT_SIZE].set(raw["lv_b"])
    bh = bh.at[:, LATENT_PAD:LATENT_PAD + LATENT_SIZE].set(raw["lv_b"])

    # decoder layer 1: rows [0:15]=z-part, [15:25]=c-part, rows [25:128]=0
    dw1 = pad2(raw["dec1_w"], (LATENT_PAD, HIDDEN_DIM)).astype(bf16)
    # decoder layer 4: pad output columns 784 -> 896 (lane-dense store)
    dw4 = pad2(raw["dec4_w"], (HIDDEN_DIM, IN_PAD)).astype(bf16)
    db4 = pad2(raw["dec4_b"], (1, IN_PAD)).astype(f32)

    return {
        "w1x": w1x, "w1c": w1c.astype(bf16), "b1": raw["enc1_b"].astype(f32),
        "w2": raw["enc2_w"].astype(bf16), "b2": raw["enc2_b"].astype(f32),
        "w3": raw["enc3_w"].astype(bf16), "b3": raw["enc3_b"].astype(f32),
        "wh": wh.astype(bf16), "bh": bh,
        "dw1": dw1, "db1": raw["dec1_b"].astype(f32),
        "dw2": raw["dec2_w"].astype(bf16), "db2": raw["dec2_b"].astype(f32),
        "dw3": raw["dec3_w"].astype(bf16), "db3": raw["dec3_b"].astype(f32),
        "dw4": dw4, "db4": db4,
    }


# --------------------------------------------------------------------------- wrapper
@jax.jit
def cvae_forward(packed, x, c, eps):
    """x: (N,1,28,28) f32, c: (N,10) f32, eps: (N,15) f32.
    Returns (x_hat (N,1,28,28) f32, mu (N,15) f32, logvar (N,15) f32)."""
    n = x.shape[0]
    x_flat = x.reshape(n, -1).astype(jnp.float32)
    c = c.astype(jnp.float32)
    eps = eps.astype(jnp.float32)

    # tile: multiple of 16 (bf16 (16,128) packing of the x_hat store); capped at
    # ~ceil(n/2) so larger batches give >= 2 grid steps (v7x dual-TC split).
    tm = max(16, min(MAX_TM, _round_up((n + 1) // 2, 16)))
    n_pad = _round_up(n, tm)
    grid = (n_pad // tm,)

    # x passes through without lane padding (full-extent 784 block): no wrapper-side
    # [x|c] materialization / extra HBM round trip.  Only pad batch rows if needed.
    x_in = x_flat if n_pad == n else jnp.pad(x_flat, ((0, n_pad - n), (0, 0)))

    # small (n_pad, 128) f32 tile carrying both the reparam noise and the one-hot:
    # eps at lanes [0:15], c at lanes [15:25], zeros elsewhere.
    epsc = jnp.zeros((n_pad, LATENT_PAD), jnp.float32)
    epsc = epsc.at[:n, :LATENT_SIZE].set(eps)
    epsc = epsc.at[:n, LATENT_SIZE:LATENT_SIZE + NUM_CLASSES].set(c)

    param_order = ("w1x", "w1c", "b1", "w2", "b2", "w3", "b3", "wh", "bh",
                   "dw1", "db1", "dw2", "db2", "dw3", "db3", "dw4", "db4")
    params = tuple(packed[k] for k in param_order)

    row_spec = lambda cols: pl.BlockSpec((tm, cols), lambda i: (i, 0))
    in_specs = [row_spec(INPUT_SIZE), row_spec(LATENT_PAD)]
    # weights / biases: constant block index -> fetched once, VMEM-resident
    in_specs += [pl.BlockSpec(p.shape, lambda i: (0, 0)) for p in params]
    out_specs = (row_spec(IN_PAD), row_spec(LATENT_PAD))
    out_shape = (
        jax.ShapeDtypeStruct((n_pad, IN_PAD), jnp.bfloat16),     # x_hat (bf16 store)
        jax.ShapeDtypeStruct((n_pad, LATENT_PAD), jnp.float32),  # packed [mu|logvar]
    )

    flops_per_row = 2 * (INPUT_SIZE * HIDDEN_DIM + LATENT_PAD * HIDDEN_DIM
                         + 2 * HIDDEN_DIM * HIDDEN_DIM + HIDDEN_DIM * HEAD_PAD
                         + LATENT_PAD * HIDDEN_DIM + 2 * HIDDEN_DIM * HIDDEN_DIM
                         + HIDDEN_DIM * IN_PAD)
    weight_bytes = sum(int(p.size) * p.dtype.itemsize for p in params)
    io_bytes = n_pad * (INPUT_SIZE * 4 + LATENT_PAD * 4     # inputs
                        + IN_PAD * 2 + LATENT_PAD * 4)      # outputs
    cost = pl.CostEstimate(flops=flops_per_row * n_pad,
                           transcendentals=n_pad * (LATENT_PAD + IN_PAD),
                           bytes_accessed=weight_bytes + io_bytes)

    xhat_pad, heads = pl.pallas_call(
        _cvae_kernel,
        out_shape=out_shape,
        grid=grid,
        in_specs=in_specs,
        out_specs=out_specs,
        compiler_params=pltpu.CompilerParams(dimension_semantics=("parallel",)),
        cost_estimate=cost,
    )(x_in, epsc, *params)

    x_hat = xhat_pad[:n, :INPUT_SIZE].astype(jnp.float32).reshape(n, 1, 28, 28)
    mu = heads[:n, :LATENT_SIZE]
    logvar = heads[:n, LV_OFF:LV_OFF + LATENT_SIZE]
    return x_hat, mu, logvar


# --------------------------------------------------------------------------- reference
def _ref_forward(raw, x, c, eps):
    """Pure-JAX reference matching the kernel's bf16-weight / f32-accumulate math."""
    f32, bf16 = jnp.float32, jnp.bfloat16

    def lin(a, w, b, relu):
        y = jnp.dot(a.astype(bf16), w.astype(bf16), preferred_element_type=f32) + b
        return jnp.maximum(y, 0.0) if relu else y

    n = x.shape[0]
    X = jnp.concatenate([x.reshape(n, -1), c], axis=1)
    h = lin(X, raw["enc1_w"], raw["enc1_b"], True)
    h = lin(h, raw["enc2_w"], raw["enc2_b"], True)
    h = lin(h, raw["enc3_w"], raw["enc3_b"], True)
    mu = lin(h, raw["mu_w"], raw["mu_b"], False)
    logvar = lin(h, raw["lv_w"], raw["lv_b"], False)
    z = mu + jnp.exp(0.5 * logvar) * eps
    Z = jnp.concatenate([z, c], axis=1)
    d = lin(Z, raw["dec1_w"], raw["dec1_b"], True)
    d = lin(d, raw["dec2_w"], raw["dec2_b"], True)
    d = lin(d, raw["dec3_w"], raw["dec3_b"], True)
    logits = lin(d, raw["dec4_w"], raw["dec4_b"], False)
    return jax.nn.sigmoid(logits).reshape(n, 1, 28, 28), mu, logvar


# --------------------------------------------------------------------------- demo
if __name__ == "__main__":
    key = jax.random.PRNGKey(0)
    k_param, k_x, k_label, k_eps = jax.random.split(key, 4)

    N = 2
    raw = init_cvae_params(k_param)
    packed = pack_params(raw)

    x = jax.random.uniform(k_x, (N, 1, 28, 28), jnp.float32)          # NCHW like PyTorch
    labels = jax.random.randint(k_label, (N,), 0, NUM_CLASSES)
    c = jax.nn.one_hot(labels, NUM_CLASSES, dtype=jnp.float32)        # (N, 10)
    # TODO(synk): reparametrize's torch.randn is taken as an explicit eps input for determinism.
    eps = jax.random.normal(k_eps, (N, LATENT_SIZE), jnp.float32)

    x_hat, mu, logvar = cvae_forward(packed, x, c, eps)
    jax.block_until_ready((x_hat, mu, logvar))

    assert x_hat.shape == (N, 1, 28, 28) and x_hat.dtype == jnp.float32
    assert mu.shape == (N, LATENT_SIZE) and logvar.shape == (N, LATENT_SIZE)
    assert bool(jnp.all((x_hat >= 0.0) & (x_hat <= 1.0)))

    x_hat_r, mu_r, logvar_r = _ref_forward(raw, x, c, eps)
    assert bool(jnp.allclose(x_hat, x_hat_r, rtol=2e-2, atol=2e-2))
    assert bool(jnp.allclose(mu, mu_r, rtol=2e-2, atol=2e-2))
    assert bool(jnp.allclose(logvar, logvar_r, rtol=2e-2, atol=2e-2))

    print("KERNEL_OK")
</pallas_src>

<mosaic_0001>
module attributes {stable_mosaic.version = 11 : i64} {
  func.func @_cvae_kernel(%arg0: i32, %arg1: memref<16x784xf32, #tpu.memory_space<vmem>>, %arg2: memref<16x128xf32, #tpu.memory_space<vmem>>, %arg3: memref<784x256xbf16, #tpu.memory_space<vmem>>, %arg4: memref<128x256xbf16, #tpu.memory_space<vmem>>, %arg5: memref<1x256xf32, #tpu.memory_space<vmem>>, %arg6: memref<256x256xbf16, #tpu.memory_space<vmem>>, %arg7: memref<1x256xf32, #tpu.memory_space<vmem>>, %arg8: memref<256x256xbf16, #tpu.memory_space<vmem>>, %arg9: memref<1x256xf32, #tpu.memory_space<vmem>>, %arg10: memref<256x256xbf16, #tpu.memory_space<vmem>>, %arg11: memref<1x256xf32, #tpu.memory_space<vmem>>, %arg12: memref<128x256xbf16, #tpu.memory_space<vmem>>, %arg13: memref<1x256xf32, #tpu.memory_space<vmem>>, %arg14: memref<256x256xbf16, #tpu.memory_space<vmem>>, %arg15: memref<1x256xf32, #tpu.memory_space<vmem>>, %arg16: memref<256x256xbf16, #tpu.memory_space<vmem>>, %arg17: memref<1x256xf32, #tpu.memory_space<vmem>>, %arg18: memref<256x896xbf16, #tpu.memory_space<vmem>>, %arg19: memref<1x896xf32, #tpu.memory_space<vmem>>, %arg20: memref<16x896xbf16, #tpu.memory_space<vmem>>, %arg21: memref<16x128xf32, #tpu.memory_space<vmem>>) attributes {dimension_semantics = [#tpu.dimension_semantics<parallel>], iteration_bounds = array<i64: 1>, scalar_prefetch = 0 : i64, scratch_operands = 0 : i64, tpu.core_type = #tpu.core_type<tc>, window_params = [{transform_indices = @transform_0, window_bounds = array<i64: 16, 784>}, {transform_indices = @transform_1, window_bounds = array<i64: 16, 128>}, {pipeline_mode = #tpu.pipeline_mode<synchronous>, transform_indices = @transform_2, window_bounds = array<i64: 784, 256>}, {pipeline_mode = #tpu.pipeline_mode<synchronous>, transform_indices = @transform_3, window_bounds = array<i64: 128, 256>}, {pipeline_mode = #tpu.pipeline_mode<synchronous>, transform_indices = @transform_4, window_bounds = array<i64: 1, 256>}, {pipeline_mode = #tpu.pipeline_mode<synchronous>, transform_indices = @transform_5, window_bounds = array<i64: 256, 256>}, {pipeline_mode = #tpu.pipeline_mode<synchronous>, transform_indices = @transform_6, window_bounds = array<i64: 1, 256>}, {pipeline_mode = #tpu.pipeline_mode<synchronous>, transform_indices = @transform_7, window_bounds = array<i64: 256, 256>}, {pipeline_mode = #tpu.pipeline_mode<synchronous>, transform_indices = @transform_8, window_bounds = array<i64: 1, 256>}, {pipeline_mode = #tpu.pipeline_mode<synchronous>, transform_indices = @transform_9, window_bounds = array<i64: 256, 256>}, {pipeline_mode = #tpu.pipeline_mode<synchronous>, transform_indices = @transform_10, window_bounds = array<i64: 1, 256>}, {pipeline_mode = #tpu.pipeline_mode<synchronous>, transform_indices = @transform_11, window_bounds = array<i64: 128, 256>}, {pipeline_mode = #tpu.pipeline_mode<synchronous>, transform_indices = @transform_12, window_bounds = array<i64: 1, 256>}, {pipeline_mode = #tpu.pipeline_mode<synchronous>, transform_indices = @transform_13, window_bounds = array<i64: 256, 256>}, {pipeline_mode = #tpu.pipeline_mode<synchronous>, transform_indices = @transform_14, window_bounds = array<i64: 1, 256>}, {pipeline_mode = #tpu.pipeline_mode<synchronous>, transform_indices = @transform_15, window_bounds = array<i64: 256, 256>}, {pipeline_mode = #tpu.pipeline_mode<synchronous>, transform_indices = @transform_16, window_bounds = array<i64: 1, 256>}, {pipeline_mode = #tpu.pipeline_mode<synchronous>, transform_indices = @transform_17, window_bounds = array<i64: 256, 896>}, {pipeline_mode = #tpu.pipeline_mode<synchronous>, transform_indices = @transform_18, window_bounds = array<i64: 1, 896>}, {transform_indices = @transform_19, window_bounds = array<i64: 16, 896>}, {transform_indices = @transform_20, window_bounds = array<i64: 16, 128>}]} {
    %c0 = arith.constant 0 : index
    %c0_0 = arith.constant 0 : index
    %0 = vector.load %arg2[%c0, %c0_0] : memref<16x128xf32, #tpu.memory_space<vmem>>, vector<16x128xf32>
    %c0_1 = arith.constant 0 : index
    %c0_2 = arith.constant 0 : index
    %1 = vector.load %arg1[%c0_1, %c0_2] : memref<16x784xf32, #tpu.memory_space<vmem>>, vector<16x784xf32>
    %2 = arith.truncf %1 : vector<16x784xf32> to vector<16x784xbf16>
    %c0_3 = arith.constant 0 : index
    %c0_4 = arith.constant 0 : index
    %3 = vector.load %arg3[%c0_3, %c0_4] : memref<784x256xbf16, #tpu.memory_space<vmem>>, vector<784x256xbf16>
    %cst = arith.constant dense<0.000000e+00> : vector<16x256xf32>
    %4 = tpu.matmul %2, %3, %cst {dimension_numbers = #tpu.dot_dimension_numbers<[1], [0], [0], [1], [0, 0, 1, 1], [], []>} : vector<16x784xbf16>, vector<784x256xbf16>, vector<16x256xf32> -> vector<16x256xf32>
    %5 = arith.truncf %0 : vector<16x128xf32> to vector<16x128xbf16>
    %c0_5 = arith.constant 0 : index
    %c0_6 = arith.constant 0 : index
    %6 = vector.load %arg4[%c0_5, %c0_6] : memref<128x256xbf16, #tpu.memory_space<vmem>>, vector<128x256xbf16>
    %cst_7 = arith.constant dense<0.000000e+00> : vector<16x256xf32>
    %7 = tpu.matmul %5, %6, %cst_7 {dimension_numbers = #tpu.dot_dimension_numbers<[1], [0], [0], [1], [0, 0, 1, 1], [], []>} : vector<16x128xbf16>, vector<128x256xbf16>, vector<16x256xf32> -> vector<16x256xf32>
    %8 = arith.addf %4, %7 : vector<16x256xf32>
    %c0_8 = arith.constant 0 : index
    %c0_9 = arith.constant 0 : index
    %9 = vector.load %arg5[%c0_8, %c0_9] : memref<1x256xf32, #tpu.memory_space<vmem>>, vector<1x256xf32>
    %10 = vector.broadcast %9 : vector<1x256xf32> to vector<16x256xf32>
    %11 = arith.addf %8, %10 : vector<16x256xf32>
    %cst_10 = arith.constant 0.000000e+00 : f32
    %12 = vector.broadcast %cst_10 : f32 to vector<16x256xf32>
    %13 = arith.maximumf %11, %12 : vector<16x256xf32>
    %14 = arith.truncf %13 : vector<16x256xf32> to vector<16x256xbf16>
    %c0_11 = arith.constant 0 : index
    %c0_12 = arith.constant 0 : index
    %15 = vector.load %arg6[%c0_11, %c0_12] : memref<256x256xbf16, #tpu.memory_space<vmem>>, vector<256x256xbf16>
    %cst_13 = arith.constant dense<0.000000e+00> : vector<16x256xf32>
    %16 = tpu.matmul %14, %15, %cst_13 {dimension_numbers = #tpu.dot_dimension_numbers<[1], [0], [0], [1], [0, 0, 1, 1], [], []>} : vector<16x256xbf16>, vector<256x256xbf16>, vector<16x256xf32> -> vector<16x256xf32>
    %c0_14 = arith.constant 0 : index
    %c0_15 = arith.constant 0 : index
    %17 = vector.load %arg7[%c0_14, %c0_15] : memref<1x256xf32, #tpu.memory_space<vmem>>, vector<1x256xf32>
    %18 = vector.broadcast %17 : vector<1x256xf32> to vector<16x256xf32>
    %19 = arith.addf %16, %18 : vector<16x256xf32>
    %cst_16 = arith.constant 0.000000e+00 : f32
    %20 = vector.broadcast %cst_16 : f32 to vector<16x256xf32>
    %21 = arith.maximumf %19, %20 : vector<16x256xf32>
    %22 = arith.truncf %21 : vector<16x256xf32> to vector<16x256xbf16>
    %c0_17 = arith.constant 0 : index
    %c0_18 = arith.constant 0 : index
    %23 = vector.load %arg8[%c0_17, %c0_18] : memref<256x256xbf16, #tpu.memory_space<vmem>>, vector<256x256xbf16>
    %cst_19 = arith.constant dense<0.000000e+00> : vector<16x256xf32>
    %24 = tpu.matmul %22, %23, %cst_19 {dimension_numbers = #tpu.dot_dimension_numbers<[1], [0], [0], [1], [0, 0, 1, 1], [], []>} : vector<16x256xbf16>, vector<256x256xbf16>, vector<16x256xf32> -> vector<16x256xf32>
    %c0_20 = arith.constant 0 : index
    %c0_21 = arith.constant 0 : index
    %25 = vector.load %arg9[%c0_20, %c0_21] : memref<1x256xf32, #tpu.memory_space<vmem>>, vector<1x256xf32>
    %26 = vector.broadcast %25 : vector<1x256xf32> to vector<16x256xf32>
    %27 = arith.addf %24, %26 : vector<16x256xf32>
    %cst_22 = arith.constant 0.000000e+00 : f32
    %28 = vector.broadcast %cst_22 : f32 to vector<16x256xf32>
    %29 = arith.maximumf %27, %28 : vector<16x256xf32>
    %30 = arith.truncf %29 : vector<16x256xf32> to vector<16x256xbf16>
    %c0_23 = arith.constant 0 : index
    %c0_24 = arith.constant 0 : index
    %31 = vector.load %arg10[%c0_23, %c0_24] : memref<256x256xbf16, #tpu.memory_space<vmem>>, vector<256x256xbf16>
    %cst_25 = arith.constant dense<0.000000e+00> : vector<16x256xf32>
    %32 = tpu.matmul %30, %31, %cst_25 {dimension_numbers = #tpu.dot_dimension_numbers<[1], [0], [0], [1], [0, 0, 1, 1], [], []>} : vector<16x256xbf16>, vector<256x256xbf16>, vector<16x256xf32> -> vector<16x256xf32>
    %c0_26 = arith.constant 0 : index
    %c0_27 = arith.constant 0 : index
    %33 = vector.load %arg11[%c0_26, %c0_27] : memref<1x256xf32, #tpu.memory_space<vmem>>, vector<1x256xf32>
    %34 = vector.broadcast %33 : vector<1x256xf32> to vector<16x256xf32>
    %35 = arith.addf %32, %34 : vector<16x256xf32>
    %36 = vector.extract_strided_slice %35 {offsets = [0, 0], sizes = [16, 128], strides = [1, 1]} : vector<16x256xf32> to vector<16x128xf32>
    %c0_28 = arith.constant 0 : index
    %c0_29 = arith.constant 0 : index
    %37 = vector.load %arg21[%c0_28, %c0_29] : memref<16x128xf32, #tpu.memory_space<vmem>>, vector<16x128xf32>
    tpu.vector_store %arg21[%c0_28, %c0_29], %36 {strides = array<i32>} : memref<16x128xf32, #tpu.memory_space<vmem>>, vector<16x128xf32>,
    %38 = vector.extract_strided_slice %35 {offsets = [0, 0], sizes = [16, 128], strides = [1, 1]} : vector<16x256xf32> to vector<16x128xf32>
    %39 = vector.extract_strided_slice %35 {offsets = [0, 128], sizes = [16, 128], strides = [1, 1]} : vector<16x256xf32> to vector<16x128xf32>
    %cst_30 = arith.constant 5.000000e-01 : f32
    %40 = vector.broadcast %cst_30 : f32 to vector<16x128xf32>
    %41 = arith.mulf %40, %39 : vector<16x128xf32>
    %42 = math.exp %41 : vector<16x128xf32>
    %43 = arith.mulf %42, %0 : vector<16x128xf32>
    %44 = arith.addf %38, %43 : vector<16x128xf32>
    %45 = arith.truncf %44 : vector<16x128xf32> to vector<16x128xbf16>
    %c0_31 = arith.constant 0 : index
    %c0_32 = arith.constant 0 : index
    %46 = vector.load %arg12[%c0_31, %c0_32] : memref<128x256xbf16, #tpu.memory_space<vmem>>, vector<128x256xbf16>
    %cst_33 = arith.constant dense<0.000000e+00> : vector<16x256xf32>
    %47 = tpu.matmul %45, %46, %cst_33 {dimension_numbers = #tpu.dot_dimension_numbers<[1], [0], [0], [1], [0, 0, 1, 1], [], []>} : vector<16x128xbf16>, vector<128x256xbf16>, vector<16x256xf32> -> vector<16x256xf32>
    %c0_34 = arith.constant 0 : index
    %c0_35 = arith.constant 0 : index
    %48 = vector.load %arg13[%c0_34, %c0_35] : memref<1x256xf32, #tpu.memory_space<vmem>>, vector<1x256xf32>
    %49 = vector.broadcast %48 : vector<1x256xf32> to vector<16x256xf32>
    %50 = arith.addf %47, %49 : vector<16x256xf32>
    %cst_36 = arith.constant 0.000000e+00 : f32
    %51 = vector.broadcast %cst_36 : f32 to vector<16x256xf32>
    %52 = arith.maximumf %50, %51 : vector<16x256xf32>
    %53 = arith.truncf %52 : vector<16x256xf32> to vector<16x256xbf16>
    %c0_37 = arith.constant 0 : index
    %c0_38 = arith.constant 0 : index
    %54 = vector.load %arg14[%c0_37, %c0_38] : memref<256x256xbf16, #tpu.memory_space<vmem>>, vector<256x256xbf16>
    %cst_39 = arith.constant dense<0.000000e+00> : vector<16x256xf32>
    %55 = tpu.matmul %53, %54, %cst_39 {dimension_numbers = #tpu.dot_dimension_numbers<[1], [0], [0], [1], [0, 0, 1, 1], [], []>} : vector<16x256xbf16>, vector<256x256xbf16>, vector<16x256xf32> -> vector<16x256xf32>
    %c0_40 = arith.constant 0 : index
    %c0_41 = arith.constant 0 : index
    %56 = vector.load %arg15[%c0_40, %c0_41] : memref<1x256xf32, #tpu.memory_space<vmem>>, vector<1x256xf32>
    %57 = vector.broadcast %56 : vector<1x256xf32> to vector<16x256xf32>
    %58 = arith.addf %55, %57 : vector<16x256xf32>
    %cst_42 = arith.constant 0.000000e+00 : f32
    %59 = vector.broadcast %cst_42 : f32 to vector<16x256xf32>
    %60 = arith.maximumf %58, %59 : vector<16x256xf32>
    %61 = arith.truncf %60 : vector<16x256xf32> to vector<16x256xbf16>
    %c0_43 = arith.constant 0 : index
    %c0_44 = arith.constant 0 : index
    %62 = vector.load %arg16[%c0_43, %c0_44] : memref<256x256xbf16, #tpu.memory_space<vmem>>, vector<256x256xbf16>
    %cst_45 = arith.constant dense<0.000000e+00> : vector<16x256xf32>
    %63 = tpu.matmul %61, %62, %cst_45 {dimension_numbers = #tpu.dot_dimension_numbers<[1], [0], [0], [1], [0, 0, 1, 1], [], []>} : vector<16x256xbf16>, vector<256x256xbf16>, vector<16x256xf32> -> vector<16x256xf32>
    %c0_46 = arith.constant 0 : index
    %c0_47 = arith.constant 0 : index
    %64 = vector.load %arg17[%c0_46, %c0_47] : memref<1x256xf32, #tpu.memory_space<vmem>>, vector<1x256xf32>
    %65 = vector.broadcast %64 : vector<1x256xf32> to vector<16x256xf32>
    %66 = arith.addf %63, %65 : vector<16x256xf32>
    %cst_48 = arith.constant 0.000000e+00 : f32
    %67 = vector.broadcast %cst_48 : f32 to vector<16x256xf32>
    %68 = arith.maximumf %66, %67 : vector<16x256xf32>
    %69 = arith.truncf %68 : vector<16x256xf32> to vector<16x256xbf16>
    %c0_49 = arith.constant 0 : index
    %c0_50 = arith.constant 0 : index
    %70 = vector.load %arg18[%c0_49, %c0_50] : memref<256x896xbf16, #tpu.memory_space<vmem>>, vector<256x896xbf16>
    %cst_51 = arith.constant dense<0.000000e+00> : vector<16x896xf32>
    %71 = tpu.matmul %69, %70, %cst_51 {dimension_numbers = #tpu.dot_dimension_numbers<[1], [0], [0], [1], [0, 0, 1, 1], [], []>} : vector<16x256xbf16>, vector<256x896xbf16>, vector<16x896xf32> -> vector<16x896xf32>
    %c0_52 = arith.constant 0 : index
    %c0_53 = arith.constant 0 : index
    %72 = vector.load %arg19[%c0_52, %c0_53] : memref<1x896xf32, #tpu.memory_space<vmem>>, vector<1x896xf32>
    %73 = vector.broadcast %72 : vector<1x896xf32> to vector<16x896xf32>
    %74 = arith.addf %71, %73 : vector<16x896xf32>
    %75 = arith.negf %74 : vector<16x896xf32>
    %76 = math.exp %75 : vector<16x896xf32>
    %cst_54 = arith.constant 1.000000e+00 : f32
    %77 = vector.broadcast %cst_54 : f32 to vector<16x896xf32>
    %78 = arith.addf %77, %76 : vector<16x896xf32>
    %79 = arith.divf %77, %78 : vector<16x896xf32>
    %80 = arith.truncf %79 : vector<16x896xf32> to vector<16x896xbf16>
    %c0_55 = arith.constant 0 : index
    %c0_56 = arith.constant 0 : index
    %81 = vector.load %arg20[%c0_55, %c0_56] : memref<16x896xbf16, #tpu.memory_space<vmem>>, vector<16x896xbf16>
    tpu.vector_store %arg20[%c0_55, %c0_56], %80 {strides = array<i32>} : memref<16x896xbf16, #tpu.memory_space<vmem>>, vector<16x896xbf16>,
    return
  }
  func.func @transform_0(%arg0: i32) -> (i32, i32) {
    %c0_i32 = arith.constant 0 : i32
    %c0_i32_0 = arith.constant 0 : i32
    return %arg0, %c0_i32 : i32, i32
  }
  func.func @transform_1(%arg0: i32) -> (i32, i32) {
    %c0_i32 = arith.constant 0 : i32
    %c0_i32_0 = arith.constant 0 : i32
    return %arg0, %c0_i32 : i32, i32
  }
  func.func @transform_2(%arg0: i32) -> (i32, i32) {
    %c0_i32 = arith.constant 0 : i32
    %c0_i32_0 = arith.constant 0 : i32
    %c0_i32_1 = arith.constant 0 : i32
    return %c0_i32, %c0_i32_0 : i32, i32
  }
  func.func @transform_3(%arg0: i32) -> (i32, i32) {
    %c0_i32 = arith.constant 0 : i32
    %c0_i32_0 = arith.constant 0 : i32
    %c0_i32_1 = arith.constant 0 : i32
    return %c0_i32, %c0_i32_0 : i32, i32
  }
  func.func @transform_4(%arg0: i32) -> (i32, i32) {
    %c0_i32 = arith.constant 0 : i32
    %c0_i32_0 = arith.constant 0 : i32
    %c0_i32_1 = arith.constant 0 : i32
    return %c0_i32, %c0_i32_0 : i32, i32
  }
  func.func @transform_5(%arg0: i32) -> (i32, i32) {
    %c0_i32 = arith.constant 0 : i32
    %c0_i32_0 = arith.constant 0 : i32
    %c0_i32_1 = arith.constant 0 : i32
    return %c0_i32, %c0_i32_0 : i32, i32
  }
  func.func @transform_6(%arg0: i32) -> (i32, i32) {
    %c0_i32 = arith.constant 0 : i32
    %c0_i32_0 = arith.constant 0 : i32
    %c0_i32_1 = arith.constant 0 : i32
    return %c0_i32, %c0_i32_0 : i32, i32
  }
  func.func @transform_7(%arg0: i32) -> (i32, i32) {
    %c0_i32 = arith.constant 0 : i32
    %c0_i32_0 = arith.constant 0 : i32
    %c0_i32_1 = arith.constant 0 : i32
    return %c0_i32, %c0_i32_0 : i32, i32
  }
  func.func @transform_8(%arg0: i32) -> (i32, i32) {
    %c0_i32 = arith.constant 0 : i32
    %c0_i32_0 = arith.constant 0 : i32
    %c0_i32_1 = arith.constant 0 : i32
    return %c0_i32, %c0_i32_0 : i32, i32
  }
  func.func @transform_9(%arg0: i32) -> (i32, i32) {
    %c0_i32 = arith.constant 0 : i32
    %c0_i32_0 = arith.constant 0 : i32
    %c0_i32_1 = arith.constant 0 : i32
    return %c0_i32, %c0_i32_0 : i32, i32
  }
  func.func @transform_10(%arg0: i32) -> (i32, i32) {
    %c0_i32 = arith.constant 0 : i32
    %c0_i32_0 = arith.constant 0 : i32
    %c0_i32_1 = arith.constant 0 : i32
    return %c0_i32, %c0_i32_0 : i32, i32
  }
  func.func @transform_11(%arg0: i32) -> (i32, i32) {
    %c0_i32 = arith.constant 0 : i32
    %c0_i32_0 = arith.constant 0 : i32
    %c0_i32_1 = arith.constant 0 : i32
    return %c0_i32, %c0_i32_0 : i32, i32
  }
  func.func @transform_12(%arg0: i32) -> (i32, i32) {
    %c0_i32 = arith.constant 0 : i32
    %c0_i32_0 = arith.constant 0 : i32
    %c0_i32_1 = arith.constant 0 : i32
    return %c0_i32, %c0_i32_0 : i32, i32
  }
  func.func @transform_13(%arg0: i32) -> (i32, i32) {
    %c0_i32 = arith.constant 0 : i32
    %c0_i32_0 = arith.constant 0 : i32
    %c0_i32_1 = arith.constant 0 : i32
    return %c0_i32, %c0_i32_0 : i32, i32
  }
  func.func @transform_14(%arg0: i32) -> (i32, i32) {
    %c0_i32 = arith.constant 0 : i32
    %c0_i32_0 = arith.constant 0 : i32
    %c0_i32_1 = arith.constant 0 : i32
    return %c0_i32, %c0_i32_0 : i32, i32
  }
  func.func @transform_15(%arg0: i32) -> (i32, i32) {
    %c0_i32 = arith.constant 0 : i32
    %c0_i32_0 = arith.constant 0 : i32
    %c0_i32_1 = arith.constant 0 : i32
    return %c0_i32, %c0_i32_0 : i32, i32
  }
  func.func @transform_16(%arg0: i32) -> (i32, i32) {
    %c0_i32 = arith.constant 0 : i32
    %c0_i32_0 = arith.constant 0 : i32
    %c0_i32_1 = arith.constant 0 : i32
    return %c0_i32, %c0_i32_0 : i32, i32
  }
  func.func @transform_17(%arg0: i32) -> (i32, i32) {
    %c0_i32 = arith.constant 0 : i32
    %c0_i32_0 = arith.constant 0 : i32
    %c0_i32_1 = arith.constant 0 : i32
    return %c0_i32, %c0_i32_0 : i32, i32
  }
  func.func @transform_18(%arg0: i32) -> (i32, i32) {
    %c0_i32 = arith.constant 0 : i32
    %c0_i32_0 = arith.constant 0 : i32
    %c0_i32_1 = arith.constant 0 : i32
    return %c0_i32, %c0_i32_0 : i32, i32
  }
  func.func @transform_19(%arg0: i32) -> (i32, i32) {
    %c0_i32 = arith.constant 0 : i32
    %c0_i32_0 = arith.constant 0 : i32
    return %arg0, %c0_i32 : i32, i32
  }
  func.func @transform_20(%arg0: i32) -> (i32, i32) {
    %c0_i32 = arith.constant 0 : i32
    %c0_i32_0 = arith.constant 0 : i32
    return %arg0, %c0_i32 : i32, i32
  }
}

</mosaic_0001>

<bundles_post_ra>
// kernel: cvae_forward.1
= control target key start
LH: loop header
LB: loop body
LE: loop exit
PB: predicated region body
PF: predicated region fallthrough
CT: control target
= control target key end

     0   :  { %s6807_s0 = inlined_call_operand.vmem [shape: f32[16,784], index: 0, kind: input, shape index: {}]   ;;  %s6808_s1 = inlined_call_operand.vmem [shape: f32[16,128], index: 1, kind: input, shape index: {}]   ;;  %s6809_s2 = inlined_call_operand.hbm [shape: bf16[784,256], index: 2, kind: input, shape index: {}]   ;;  %s6810_s3 = inlined_call_operand.hbm [shape: bf16[128,256], index: 3, kind: input, shape index: {}]   ;;  %s6811_s4 = inlined_call_operand.vmem [shape: f32[1,256], index: 4, kind: input, shape index: {}]   ;;  %s6812_s5 = inlined_call_operand.vmem [shape: bf16[256,256], index: 5, kind: input, shape index: {}]   ;;  %s6813_s6 = inlined_call_operand.vmem [shape: f32[1,256], index: 6, kind: input, shape index: {}]   ;;  %s6814_s7 = inlined_call_operand.hbm [shape: bf16[256,256], index: 7, kind: input, shape index: {}]   ;;  %s6815_s8 = inlined_call_operand.vmem [shape: f32[1,256], index: 8, kind: input, shape index: {}]   ;;  %s6816_s9 = inlined_call_operand.hbm [shape: bf16[256,256], index: 9, kind: input, shape index: {}]   ;;  %s6817_s10 = inlined_call_operand.vmem [shape: f32[1,256], index: 10, kind: input, shape index: {}]   ;;  %s6818_s11 = inlined_call_operand.hbm [shape: bf16[128,256], index: 11, kind: input, shape index: {}]   ;;  %s6819_s12 = inlined_call_operand.vmem [shape: f32[1,256], index: 12, kind: input, shape index: {}]   ;;  %s6820_s13 = inlined_call_operand.hbm [shape: bf16[256,256], index: 13, kind: input, shape index: {}]   ;;  %s6821_s14 = inlined_call_operand.vmem [shape: f32[1,256], index: 14, kind: input, shape index: {}]   ;;  %s6822_s15 = inlined_call_operand.hbm [shape: bf16[256,256], index: 15, kind: input, shape index: {}]   ;;  %s6823_s16 = inlined_call_operand.vmem [shape: f32[1,256], index: 16, kind: input, shape index: {}]   ;;  %s6824_s17 = inlined_call_operand.hbm [shape: bf16[256,896], index: 17, kind: input, shape index: {}]   ;;  %s6825_s18 = inlined_call_operand.vmem [shape: f32[1,896], index: 18, kind: input, shape index: {}]   ;;  %s6826_s19 = inlined_call_operand.vmem [shape: bf16[16,896], index: 19, kind: output, shape index: {0}]   ;;  %s6827_s20 = inlined_call_operand.vmem [shape: f32[16,128], index: 20, kind: output, shape index: {1}]  }
   0x1   :  { %6830 = sst [smem:[#allocation20_spill]] %s6807_s0 }
   0x2   :  { %6831 = sst [smem:[#allocation21_spill]] %s6808_s1 }
   0x3   :  { %6832 = sst [smem:[#allocation22_spill]] %s6809_s2 }
   0x4   :  { %6833 = sst [smem:[#allocation23_spill]] %s6810_s3 }
   0x5   :  { %6834 = sst [smem:[#allocation24_spill]] %s6811_s4 }
   0x6   :  { %26 = vsyncpa [#allocation3], 0 }
   0x7   :  { %27 = vsyncpa [#allocation5], 0 }
   0x8   :  { %28 = vsyncpa [#allocation8], 0 }
   0x9   :  { %29 = vsyncpa [#allocation11], 0 }
   0xa   :  { %30 = vsyncpa [#allocation14], 0  ;;  %s6835_s23 = sld [smem:[#allocation23_spill]]  ;;  %s6098_s2 = smov [#allocation4]  }
   0xb   :  { %s54_s25 = sshll.u32 %s6098_s2, 4  ;;  %s86_s27 = sshll.u32 %s6816_s9, 4  ;;  %s55_s25 = int_to_ptr.vmem [resolvable:$true] %s54_s25  ;;  %s87_s27 = int_to_ptr.hbm [resolvable:$true] %s86_s27 }
   0xc   :  { %s6099_s28 = smov 128   ;;  %s6100_s4 = smov 8  }
   0xd   :  { %s6101_s29 = smov [#allocation7]   ;;  %s116_s1 = sshll.u32 %s6820_s13, 4  ;;  %s117_s1 = int_to_ptr.hbm [resolvable:$true] %s116_s1 }
   0xe   :  { %s88_s30 = sshll.u32 %s6101_s29, 4  ;;  %s6102_s3 = smov [#allocation10]   ;;  %s89_s30 = int_to_ptr.vmem [resolvable:$true] %s88_s30 }
   0xf   :  { %94 = dma.hbm_to_vmem [thread:$0]  %s87_s27, 4096, %s89_s30, [#allocation8], %s6099_s28, %s6099_s28, %s6100_s4  }
  0x10   :  { %s52_s24 = sshll.u32 %s6835_s23, 4  ;;  %s6836_s23 = sld [smem:[#allocation22_spill]]  ;;  %s53_s24 = int_to_ptr.hbm [resolvable:$true] %s52_s24 }
  0x11   :  { %60 = dma.hbm_to_vmem [thread:$0]  %s53_s24, 2048, %s55_s25, [#allocation5], %s6099_s28, %s6099_s28, %s6100_s4  }
  0x12   :  { %s118_s26 = sshll.u32 %s6102_s3, 4  ;;  %s6103_s24 = smov [#allocation2]   ;;  %s119_s26 = int_to_ptr.vmem [resolvable:$true] %s118_s26 }
  0x13   :  { %124 = dma.hbm_to_vmem [thread:$0]  %s117_s1, 4096, %s119_s26, [#allocation11], %s6099_s28, %s6099_s28, %s6100_s4  }
  0x14   :  { %s41_s13 = sshll.u32 %s6103_s24, 4  ;;  %s71_s0 = sshll.u32 %s6814_s7, 4  ;;  %s42_s13 = int_to_ptr.vmem [resolvable:$true] %s41_s13  ;;  %s72_s0 = int_to_ptr.hbm [resolvable:$true] %s71_s0 }
  0x15   :  { %s101_s21 = sshll.u32 %s6818_s11, 4  ;;  %s6104_s9 = smov [#allocation6]   ;;  %s102_s21 = int_to_ptr.hbm [resolvable:$true] %s101_s21 }
  0x16   :  { %s39_s2 = sshll.u32 %s6836_s23, 4  ;;  %s73_s22 = sshll.u32 %s6104_s9, 4  ;;  %s40_s2 = int_to_ptr.hbm [resolvable:$true] %s39_s2  ;;  %s74_s22 = int_to_ptr.vmem [resolvable:$true] %s73_s22 }
  0x17   :  { %47 = dma.hbm_to_vmem [thread:$0]  %s40_s2, 12544, %s42_s13, [#allocation3], %s6099_s28, %s6099_s28, %s6100_s4  }
  0x18   :  { %79 = dma.hbm_to_vmem [thread:$0]  %s72_s0, 4096, %s74_s22, [#allocation5], %s6099_s28, %s6099_s28, %s6100_s4  }
  0x19   :  { %s6105_s1 = smov [#allocation9]   ;;  %s131_s26 = sshll.u32 %s6822_s15, 4  ;;  %s132_s26 = int_to_ptr.hbm [resolvable:$true] %s131_s26 }
  0x1a   :  { %s103_s7 = sshll.u32 %s6105_s1, 4  ;;  %s146_s24 = sshll.u32 %s6824_s17, 4  ;;  %s104_s7 = int_to_ptr.vmem [resolvable:$true] %s103_s7  ;;  %s147_s24 = int_to_ptr.hbm [resolvable:$true] %s146_s24 }
  0x1b   :  { %109 = dma.hbm_to_vmem [thread:$0]  %s102_s21, 2048, %s104_s7, [#allocation8], %s6099_s28, %s6099_s28, %s6100_s4  }
  0x1c   :  { %s6106_s13 = smov [#allocation12]   ;;  %s6107_s29 = smov [#allocation13]  }
  0x1d   :  { %s133_s25 = sshll.u32 %s6106_s13, 4  ;;  %s148_s15 = sshll.u32 %s6107_s29, 4  ;;  %s134_s25 = int_to_ptr.vmem [resolvable:$true] %s133_s25  ;;  %s149_s15 = int_to_ptr.vmem [resolvable:$true] %s148_s15 }
  0x1e   :  { %139 = dma.hbm_to_vmem [thread:$0]  %s132_s26, 4096, %s134_s25, [#allocation11], %s6099_s28, %s6099_s28, %s6100_s4  }
  0x1f   :  { %s6108_s0 = smov 448   ;;  %s6109_s27 = smov 28  }
  0x20   :  { %154 = dma.hbm_to_vmem [thread:$0]  %s147_s24, 14336, %s149_s15, [#allocation14], %s6108_s0, %s6108_s0, %s6109_s27  }
  0x21   :  { %6088 = dma.done.wait [#allocation3], 12544  }
  0x22   :  { %6089 = vsyncadd [#allocation3], 4294954752 }
  0x23   :  { %6090 = dma.done.wait [#allocation5], 6144  }
  0x24   :  { %6091 = vsyncadd [#allocation5], 4294961152 }
  0x25   :  { %6092 = dma.done.wait [#allocation8], 6144  }
  0x26   :  { %6093 = vsyncadd [#allocation8], 4294961152 }
  0x27   :  { %6094 = dma.done.wait [#allocation11], 8192  }
  0x28   :  { %6095 = vsyncadd [#allocation11], 4294959104 }
  0x29   :  { %6096 = dma.done.wait [#allocation14], 14336  }
  0x2a   :  { %6097 = vsyncadd [#allocation14], 4294952960  ;;  %v3854_v0 = vld [vmem:[#allocation4 + $0x70] sm:$0xf]  ;;  %v5533_v1 = vld [vmem:[#allocation4 + $0x74] sm:$0xf0] }
  0x2b   :  { %v5532_v2 = vld [vmem:[#allocation4 + $0x74] sm:$0xf]  ;;  %v3855_v3 = vor.u32 %v5533_v1, %v3854_v0  ;;  %v3856_v4 = vld [vmem:[#allocation4 + $0x78] sm:$0xf0]  ;;  %v3918_v5 = vld [vmem:[#allocation2 + $0x70] sm:$0xf] }
  0x2c   :  { %v5435_v6 = vld [vmem:[#allocation2 + $0x74] sm:$0xf0]  ;;  %v3859_v7 = vor.u32 %v5532_v2, %v3856_v4  ;;  %v3982_v9 = vld [vmem:[#allocation2 + $0xf0] sm:$0xf]  ;;  %v5530_v14 = vld [vmem:[#allocation4 + $0x64] sm:$0xf] }
  0x2d   :  { %v3919_v8 = vor.u32 %v5435_v6, %v3918_v5  ;;  %v5451_v10 = vld [vmem:[#allocation2 + $0xf4] sm:$0xf0]  ;;  %v3846_v11 = vld [vmem:[#allocation4 + $0x60] sm:$0xf]  ;;  %408 = vmatpush.bf16.msra.mxu0 %v3855_v3  ;;  %v3848_v15 = vld [vmem:[#allocation4 + $0x68] sm:$0xf0] }
  0x2e   :  { %v3983_v12 = vor.u32 %v5451_v10, %v3982_v9  ;;  %v5531_v13 = vld [vmem:[#allocation4 + $0x64] sm:$0xf0]  ;;  %422 = vmatpush.bf16.msra.mxu1 %v3859_v7  ;;  %v3851_v17 = vor.u32 %v5530_v14, %v3848_v15  ;;  %v3910_v18 = vld [vmem:[#allocation2 + $0x60] sm:$0xf]  ;;  %v5433_v19 = vld [vmem:[#allocation2 + $0x64] sm:$0xf0] }
  0x2f   :  { %930 = vmatpush.bf16.msra.mxu2 %v3919_v8  ;;  %v3847_v16 = vor.u32 %v5531_v13, %v3846_v11  ;;  %v3974_v20 = vld [vmem:[#allocation2 + $0xe0] sm:$0xf]  ;;  %v3911_v21 = vor.u32 %v5433_v19, %v3910_v18  ;;  %v5449_v22 = vld [vmem:[#allocation2 + $0xe4] sm:$0xf0]  ;;  %v5528_v26 = vld [vmem:[#allocation4 + $0x54] sm:$0xf] }
  0x30   :  { %944 = vmatpush.bf16.msra.mxu3 %v3983_v12  ;;  %v3838_v23 = vld [vmem:[#allocation4 + $0x50] sm:$0xf]  ;;  %v5529_v24 = vld [vmem:[#allocation4 + $0x54] sm:$0xf0]  ;;  %v3975_v25 = vor.u32 %v5449_v22, %v3974_v20  ;;  %v3840_v27 = vld [vmem:[#allocation4 + $0x58] sm:$0xf0] }
  0x31   :  { %v3902_v28 = vld [vmem:[#allocation2 + $0x50] sm:$0xf]  ;;  %409 = vmatpush.bf16.msra.mxu0 %v3847_v16  ;;  %v3839_v29 = vor.u32 %v5529_v24, %v3838_v23  ;;  %v5431_v30 = vld [vmem:[#allocation2 + $0x54] sm:$0xf0]  ;;  %v3843_v33 = vor.u32 %v5528_v26, %v3840_v27  ;;  %v5526_v37 = vld [vmem:[#allocation4 + $0x44] sm:$0xf] }
  0x32   :  { %v3966_v31 = vld [vmem:[#allocation2 + $0xd0] sm:$0xf]  ;;  %v5447_v32 = vld [vmem:[#allocation2 + $0xd4] sm:$0xf0]  ;;  %423 = vmatpush.bf16.msra.mxu1 %v3851_v17  ;;  %v3903_v34 = vor.u32 %v5431_v30, %v3902_v28  ;;  %v3832_v39 = vld [vmem:[#allocation4 + $0x48] sm:$0xf0] }
  0x33   :  { %931 = vmatpush.bf16.msra.mxu2 %v3911_v21  ;;  %v3830_v35 = vld [vmem:[#allocation4 + $0x40] sm:$0xf]  ;;  %v5527_v36 = vld [vmem:[#allocation4 + $0x44] sm:$0xf0]  ;;  %v3967_v38 = vor.u32 %v5447_v32, %v3966_v31  ;;  %v3894_v40 = vld [vmem:[#allocation2 + $0x40] sm:$0xf]  ;;  %v3835_v45 = vor.u32 %v5526_v37, %v3832_v39 }
  0x34   :  { %945 = vmatpush.bf16.msra.mxu3 %v3975_v25  ;;  %v5429_v41 = vld [vmem:[#allocation2 + $0x44] sm:$0xf0]  ;;  %v3958_v42 = vld [vmem:[#allocation2 + $0xc0] sm:$0xf]  ;;  %v3831_v44 = vor.u32 %v5527_v36, %v3830_v35  ;;  %v5524_v49 = vld [vmem:[#allocation4 + $0x34] sm:$0xf] }
  0x35   :  { %v5445_v43 = vld [vmem:[#allocation2 + $0xc4] sm:$0xf0]  ;;  %410 = vmatpush.bf16.msra.mxu0 %v3839_v29  ;;  %v3895_v46 = vor.u32 %v5429_v41, %v3894_v40  ;;  %v3822_v47 = vld [vmem:[#allocation4 + $0x30] sm:$0xf]  ;;  %v3824_v51 = vld [vmem:[#allocation4 + $0x38] sm:$0xf0] }
  0x36   :  { %424 = vmatpush.bf16.msra.mxu1 %v3843_v33  ;;  %v5525_v48 = vld [vmem:[#allocation4 + $0x34] sm:$0xf0]  ;;  %v3959_v50 = vor.u32 %v5445_v43, %v3958_v42  ;;  %v3886_v52 = vld [vmem:[#allocation2 + $0x30] sm:$0xf]  ;;  %v5427_v53 = vld [vmem:[#allocation2 + $0x34] sm:$0xf0]  ;;  %v3827_v57 = vor.u32 %v5524_v49, %v3824_v51 }
  0x37   :  { %932 = vmatpush.bf16.msra.mxu2 %v3903_v34  ;;  %v3950_v54 = vld [vmem:[#allocation2 + $0xb0] sm:$0xf]  ;;  %v5443_v55 = vld [vmem:[#allocation2 + $0xb4] sm:$0xf0]  ;;  %v3823_v56 = vor.u32 %v5525_v48, %v3822_v47  ;;  %v3887_v58 = vor.u32 %v5427_v53, %v3886_v52  ;;  %v5522_v61 = vld [vmem:[#allocation4 + $0x24] sm:$0xf] }
  0x38   :  { %946 = vmatpush.bf16.msra.mxu3 %v3967_v38  ;;  %v3814_v59 = vld [vmem:[#allocation4 + $0x20] sm:$0xf]  ;;  %v5523_v60 = vld [vmem:[#allocation4 + $0x24] sm:$0xf0]  ;;  %v3951_v62 = vor.u32 %v5443_v55, %v3950_v54  ;;  %v3816_v63 = vld [vmem:[#allocation4 + $0x28] sm:$0xf0] }
  0x39   :  { %411 = vmatpush.bf16.msra.mxu0 %v3831_v44  ;;  %v3878_v0 = vld [vmem:[#allocation2 + $0x20] sm:$0xf]  ;;  %v5425_v1 = vld [vmem:[#allocation2 + $0x24] sm:$0xf0]  ;;  %v3815_v4 = vor.u32 %v5523_v60, %v3814_v59  ;;  %v3819_v5 = vor.u32 %v5522_v61, %v3816_v63  ;;  %v5520_v9 = vld [vmem:[#allocation4 + $0x14] sm:$0xf] }
  0x3a   :  { %425 = vmatpush.bf16.msra.mxu1 %v3835_v45  ;;  %v3942_v2 = vld [vmem:[#allocation2 + $0xa0] sm:$0xf]  ;;  %v5441_v3 = vld [vmem:[#allocation2 + $0xa4] sm:$0xf0]  ;;  %v3879_v6 = vor.u32 %v5425_v1, %v3878_v0  ;;  %v3808_v11 = vld [vmem:[#allocation4 + $0x18] sm:$0xf0] }
  0x3b   :  { %933 = vmatpush.bf16.msra.mxu2 %v3895_v46  ;;  %v3806_v7 = vld [vmem:[#allocation4 + $0x10] sm:$0xf]  ;;  %v5521_v8 = vld [vmem:[#allocation4 + $0x14] sm:$0xf0]  ;;  %v3943_v10 = vor.u32 %v5441_v3, %v3942_v2  ;;  %v3870_v12 = vld [vmem:[#allocation2 + $0x10] sm:$0xf]  ;;  %v3811_v19 = vor.u32 %v5520_v9, %v3808_v11 }
  0x3c   :  { %947 = vmatpush.bf16.msra.mxu3 %v3959_v50  ;;  %v5423_v13 = vld [vmem:[#allocation2 + $0x14] sm:$0xf0]  ;;  %v3934_v14 = vld [vmem:[#allocation2 + $0x90] sm:$0xf]  ;;  %v3807_v16 = vor.u32 %v5521_v8, %v3806_v7  ;;  %v5518_v21 = vld [vmem:[#allocation4 + $0x4] sm:$0xf] }
  0x3d   :  { %412 = vmatpush.bf16.msra.mxu0 %v3823_v56  ;;  %v5439_v15 = vld [vmem:[#allocation2 + $0x94] sm:$0xf0]  ;;  %v3798_v17 = vld [vmem:[#allocation4] sm:$0xf]  ;;  %v3871_v20 = vor.u32 %v5423_v13, %v3870_v12  ;;  %v3800_v22 = vld [vmem:[#allocation4 + $0x8] sm:$0xf0] }
  0x3e   :  { %426 = vmatpush.bf16.msra.mxu1 %v3827_v57  ;;  %v5519_v18 = vld [vmem:[#allocation4 + $0x4] sm:$0xf0]  ;;  %v3862_v23 = vld [vmem:[#allocation2] sm:$0xf]  ;;  %v3935_v24 = vor.u32 %v5439_v15, %v3934_v14  ;;  %v5421_v25 = vld [vmem:[#allocation2 + $0x4] sm:$0xf0]  ;;  %v3803_v35 = vor.u32 %v5518_v21, %v3800_v22 }
  0x3f   :  { %934 = vmatpush.bf16.msra.mxu2 %v3887_v58  ;;  %v4046_v26 = vld [vmem:[#allocation2 + $0x170] sm:$0xf]  ;;  %v5467_v27 = vld [vmem:[#allocation2 + $0x174] sm:$0xf0]  ;;  %v3799_v31 = vor.u32 %v5519_v18, %v3798_v17  ;;  %v3926_v33 = vld [vmem:[#allocation2 + $0x80] sm:$0xf]  ;;  %v3863_v36 = vor.u32 %v5421_v25, %v3862_v23 }
  0x40   :  { %948 = vmatpush.bf16.msra.mxu3 %v3951_v62  ;;  %v4110_v28 = vld [vmem:[#allocation2 + $0x1f0] sm:$0xf]  ;;  %v5483_v29 = vld [vmem:[#allocation2 + $0x1f4] sm:$0xf0]  ;;  %v5437_v34 = vld [vmem:[#allocation2 + $0x84] sm:$0xf0]  ;;  %v4047_v39 = vor.u32 %v5467_v27, %v4046_v26 }
  0x41   :  { %413 = vmatpush.bf16.msra.mxu0 %v3815_v4  ;;  %v4174_v30 = vld [vmem:[#allocation2 + $0x270] sm:$0xf]  ;;  %v5499_v32 = vld [vmem:[#allocation2 + $0x274] sm:$0xf0]  ;;  %v4111_v40 = vor.u32 %v5483_v29, %v4110_v28  ;;  %v4038_v41 = vld [vmem:[#allocation2 + $0x160] sm:$0xf]  ;;  %v3927_v44 = vor.u32 %v5437_v34, %v3926_v33 }
  0x42   :  { %427 = vmatpush.bf16.msra.mxu1 %v3819_v5  ;;  %v4238_v37 = vld [vmem:[#allocation2 + $0x2f0] sm:$0xf]  ;;  %v5515_v38 = vld [vmem:[#allocation2 + $0x2f4] sm:$0xf0]  ;;  %v5465_v42 = vld [vmem:[#allocation2 + $0x164] sm:$0xf0]  ;;  %v4175_v43 = vor.u32 %v5499_v32, %v4174_v30 }
  0x43   :  { %935 = vmatpush.bf16.msra.mxu2 %v3879_v6  ;;  %v4102_v45 = vld [vmem:[#allocation2 + $0x1e0] sm:$0xf]  ;;  %v5481_v46 = vld [vmem:[#allocation2 + $0x1e4] sm:$0xf0]  ;;  %v4239_v48 = vor.u32 %v5515_v38, %v4238_v37  ;;  %s6837_s4 = sld [smem:[#allocation21_spill]]  ;;  %v4039_v55 = vor.u32 %v5465_v42, %v4038_v41  ;;  %vm926_vm0 = vcmask 130048  }
  0x44   :  { %949 = vmatpush.bf16.msra.mxu3 %v3943_v10  ;;  %v4166_v47 = vld [vmem:[#allocation2 + $0x260] sm:$0xf]  ;;  %v5497_v49 = vld [vmem:[#allocation2 + $0x264] sm:$0xf0]  ;;  %s6838_s1 = sld [smem:[#allocation20_spill]]  ;;  %v4103_v56 = vor.u32 %v5481_v46, %v4102_v45 }
  0x45   :  { %414 = vmatpush.bf16.msra.mxu0 %v3807_v16  ;;  %v4230_v50 = vld [vmem:[#allocation2 + $0x2e0] sm:$0xf]  ;;  %v5513_v51 = vld [vmem:[#allocation2 + $0x2e4] sm:$0xf0]  ;;  %v4030_v57 = vld [vmem:[#allocation2 + $0x150] sm:$0xf]  ;;  %v4167_v61 = vor.u32 %v5497_v49, %v4166_v47 }
  0x46   :  { %428 = vmatpush.bf16.msra.mxu1 %v3811_v19  ;;  %v5463_v58 = vld [vmem:[#allocation2 + $0x154] sm:$0xf0]  ;;  %v4094_v62 = vld [vmem:[#allocation2 + $0x1d0] sm:$0xf]  ;;  %v4231_v2 = vor.u32 %v5513_v51, %v4230_v50  ;;  %v4022_v11 = vld [vmem:[#allocation2 + $0x140] sm:$0xf] }
  0x47   :  { %936 = vmatpush.bf16.msra.mxu2 %v3871_v20  ;;  %v5479_v63 = vld [vmem:[#allocation2 + $0x1d4] sm:$0xf0]  ;;  %v4158_v0 = vld [vmem:[#allocation2 + $0x250] sm:$0xf]  ;;  %v4031_v9 = vor.u32 %v5463_v58, %v4030_v57  ;;  %v5461_v13 = vld [vmem:[#allocation2 + $0x144] sm:$0xf0] }
  0x48   :  { %950 = vmatpush.bf16.msra.mxu3 %v3935_v24  ;;  %v5495_v3 = vld [vmem:[#allocation2 + $0x254] sm:$0xf0]  ;;  %v4222_v6 = vld [vmem:[#allocation2 + $0x2d0] sm:$0xf]  ;;  %v4095_v10 = vor.u32 %v5479_v63, %v4094_v62  ;;  %v4086_v14 = vld [vmem:[#allocation2 + $0x1c0] sm:$0xf]  ;;  %v4023_v21 = vor.u32 %v5461_v13, %v4022_v11 }
  0x49   :  { %415 = vmatpush.bf16.msra.mxu0 %v3799_v31  ;;  %v190_v52 = vld [vmem:[%s6837_s4] sm:$0xff]  ;;  %v191_v53 = vld [vmem:[%s6837_s4 + $0x8] sm:$0xff]  ;;  %v5511_v7 = vld [vmem:[#allocation2 + $0x2d4] sm:$0xf0]  ;;  %v4159_v12 = vor.u32 %v5495_v3, %v4158_v0  ;;  %s6839_s27 = sld [smem:[#allocation24_spill]] }
  0x4a   :  { %429 = vmatpush.bf16.msra.mxu1 %v3803_v35  ;;  %v192_v54 = vld [vmem:[%s6838_s1] sm:$0xff]  ;;  %v311_v59 = vpack.c.bf16 %v191_v53, %v190_v52  ;;  %v199_v60 = vld [vmem:[%s6838_s1 + $0x38] sm:$0xff]  ;;  %v193_v4 = vld [vmem:[%s6838_s1 + $0x8] sm:$0xff]  ;;  %v4223_v16 = vor.u32 %v5511_v7, %v4222_v6 }
  0x4b   :  { %937 = vmatpush.bf16.msra.mxu2 %v3863_v36  ;;  %v6272_v1 = vpack.c.bf16 %v199_v60, %v192_v54  ;;  %v200_v5 = vld [vmem:[%s6838_s1 + $0x40] sm:$0xff]  ;;  %v5477_v15 = vld [vmem:[#allocation2 + $0x1c4] sm:$0xf0]  ;;  %v4014_v23 = vld [vmem:[#allocation2 + $0x130] sm:$0xf] }
  0x4c   :  { %951 = vmatpush.bf16.msra.mxu3 %v3927_v44  ;;  %416 = vmatmul.bf16.vlgmr.msra.gmra.mxu0 %v311_v59  ;;  %v6281_v8 = vpack.c.bf16 %v200_v5, %v193_v4  ;;  %v4150_v17 = vld [vmem:[#allocation2 + $0x240] sm:$0xf]  ;;  %v5493_v18 = vld [vmem:[#allocation2 + $0x244] sm:$0xf0]  ;;  %v4087_v22 = vor.u32 %v5477_v15, %v4086_v14  ;;  %v5459_v25 = vld [vmem:[#allocation2 + $0x134] sm:$0xf0] }
  0x4d   :  { %958 = vmatpush.bf16.msrb.mxu0 %v4047_v39  ;;  %430 = vmatmul.bf16.vlgmr.msra.gmra.mxu1 %v311_v59  ;;  %v4214_v19 = vld [vmem:[#allocation2 + $0x2c0] sm:$0xf]  ;;  %v5509_v20 = vld [vmem:[#allocation2 + $0x2c4] sm:$0xf0]  ;;  %v4151_v24 = vor.u32 %v5493_v18, %v4150_v17  ;;  %v4078_v26 = vld [vmem:[#allocation2 + $0x1b0] sm:$0xf]  ;;  %v4015_v33 = vor.u32 %v5459_v25, %v4014_v23 }
  0x4e   :  { %972 = vmatpush.bf16.msrb.mxu1 %v4111_v40  ;;  %938 = vmatmul.bf16.vlgmr.msra.gmra.mxu2 %v6272_v1  ;;  %v5475_v27 = vld [vmem:[#allocation2 + $0x1b4] sm:$0xf0]  ;;  %v4215_v28 = vor.u32 %v5509_v20, %v4214_v19  ;;  %v4142_v29 = vld [vmem:[#allocation2 + $0x230] sm:$0xf]  ;;  %v4006_v35 = vld [vmem:[#allocation2 + $0x120] sm:$0xf] }
  0x4f   :  { %986 = vmatpush.bf16.msrb.mxu2 %v4175_v43  ;;  %952 = vmatmul.bf16.vlgmr.msra.gmra.mxu3 %v6281_v8  ;;  %v5491_v30 = vld [vmem:[#allocation2 + $0x234] sm:$0xf0]  ;;  %v4206_v31 = vld [vmem:[#allocation2 + $0x2b0] sm:$0xf]  ;;  %v4079_v34 = vor.u32 %v5475_v27, %v4078_v26  ;;  %v5457_v37 = vld [vmem:[#allocation2 + $0x124] sm:$0xf0] }
  0x50   :  { %1000 = vmatpush.bf16.msrb.mxu3 %v4239_v48  ;;  %v5507_v32 = vld [vmem:[#allocation2 + $0x2b4] sm:$0xf0]  ;;  %v4143_v36 = vor.u32 %v5491_v30, %v4142_v29  ;;  %v4070_v38 = vld [vmem:[#allocation2 + $0x1a0] sm:$0xf]  ;;  %v5473_v39 = vld [vmem:[#allocation2 + $0x1a4] sm:$0xf0]  ;;  %v4007_v45 = vor.u32 %v5457_v37, %v4006_v35 }
  0x51   :  { %959 = vmatpush.bf16.msrb.mxu0 %v4039_v55  ;;  %v4207_v40 = vor.u32 %v5507_v32, %v4206_v31  ;;  %v4134_v41 = vld [vmem:[#allocation2 + $0x220] sm:$0xf]  ;;  %v5489_v42 = vld [vmem:[#allocation2 + $0x224] sm:$0xf0]  ;;  %v4071_v46 = vor.u32 %v5473_v39, %v4070_v38  ;;  %v3998_v47 = vld [vmem:[#allocation2 + $0x110] sm:$0xf] }
  0x52   :  { %973 = vmatpush.bf16.msrb.mxu1 %v4103_v56  ;;  %v4198_v43 = vld [vmem:[#allocation2 + $0x2a0] sm:$0xf]  ;;  %v5505_v44 = vld [vmem:[#allocation2 + $0x2a4] sm:$0xf0]  ;;  %v5455_v48 = vld [vmem:[#allocation2 + $0x114] sm:$0xf0]  ;;  %v4135_v49 = vor.u32 %v5489_v42, %v4134_v41 }
  0x53   :  { %987 = vmatpush.bf16.msrb.mxu2 %v4167_v61  ;;  %v4062_v50 = vld [vmem:[#allocation2 + $0x190] sm:$0xf]  ;;  %v5471_v51 = vld [vmem:[#allocation2 + $0x194] sm:$0xf0]  ;;  %v4199_v53 = vor.u32 %v5505_v44, %v4198_v43  ;;  %v3990_v57 = vld [vmem:[#allocation2 + $0x100] sm:$0xf]  ;;  %v3999_v61 = vor.u32 %v5455_v48, %v3998_v47 }
  0x54   :  { %1001 = vmatpush.bf16.msrb.mxu3 %v4231_v2  ;;  %v4126_v52 = vld [vmem:[#allocation2 + $0x210] sm:$0xf]  ;;  %v5487_v54 = vld [vmem:[#allocation2 + $0x214] sm:$0xf0]  ;;  %v5453_v58 = vld [vmem:[#allocation2 + $0x104] sm:$0xf0]  ;;  %v4063_v62 = vor.u32 %v5471_v51, %v4062_v50 }
  0x55   :  { %960 = vmatpush.bf16.msrb.mxu0 %v4031_v9  ;;  %v4190_v55 = vld [vmem:[#allocation2 + $0x290] sm:$0xf]  ;;  %v5503_v56 = vld [vmem:[#allocation2 + $0x294] sm:$0xf0]  ;;  %v4054_v59 = vld [vmem:[#allocation2 + $0x180] sm:$0xf]  ;;  %v4127_v4 = vor.u32 %v5487_v54, %v4126_v52 }
  0x56   :  { %974 = vmatpush.bf16.msrb.mxu1 %v4095_v10  ;;  %v5469_v60 = vld [vmem:[#allocation2 + $0x184] sm:$0xf0]  ;;  %v4118_v63 = vld [vmem:[#allocation2 + $0x200] sm:$0xf]  ;;  %v5434_v2 = vld [vmem:[#allocation2 + $0x74] sm:$0xf]  ;;  %v4191_v9 = vor.u32 %v5503_v56, %v4190_v55 }
  0x57   :  { %988 = vmatpush.bf16.msrb.mxu2 %v4159_v12  ;;  %v5485_v0 = vld [vmem:[#allocation2 + $0x204] sm:$0xf0]  ;;  %v3920_v3 = vld [vmem:[#allocation2 + $0x78] sm:$0xf0]  ;;  %v5450_v5 = vld [vmem:[#allocation2 + $0xf4] sm:$0xf]  ;;  %v4055_v17 = vor.u32 %v5469_v60, %v4054_v59 }
  0x58   :  { %1002 = vmatpush.bf16.msrb.mxu3 %v4223_v16  ;;  %v3984_v6 = vld [vmem:[#allocation2 + $0xf8] sm:$0xf0]  ;;  %v4182_v7 = vld [vmem:[#allocation2 + $0x280] sm:$0xf]  ;;  %v5501_v10 = vld [vmem:[#allocation2 + $0x284] sm:$0xf0]  ;;  %v3991_v16 = vor.u32 %v5453_v58, %v3990_v57 }
  0x59   :  { %961 = vmatpush.bf16.msrb.mxu0 %v4023_v21  ;;  %v194_v11 = vld [vmem:[%s6838_s1 + $0x10] sm:$0xff]  ;;  %v201_v12 = vld [vmem:[%s6838_s1 + $0x48] sm:$0xff]  ;;  %v196_v13 = vld [vmem:[%s6838_s1 + $0x20] sm:$0xff]  ;;  %v4119_v21 = vor.u32 %v5485_v0, %v4118_v63  ;;  %v3987_v26 = vor.u32 %v5450_v5, %v3984_v6  ;;  %v4183_v27 = vor.u32 %v5501_v10, %v4182_v7 }
  0x5a   :  { %975 = vmatpush.bf16.msrb.mxu1 %v4087_v22  ;;  %v203_v14 = vld [vmem:[%s6838_s1 + $0x58] sm:$0xff]  ;;  %v5466_v15 = vld [vmem:[#allocation2 + $0x174] sm:$0xf]  ;;  %v3923_v22 = vor.u32 %v5434_v2, %v3920_v3  ;;  %v197_v23 = vld [vmem:[%s6838_s1 + $0x28] sm:$0xff]  ;;  %v6308_v31 = vpack.c.bf16 %v201_v12, %v194_v11 }
  0x5b   :  { %989 = vmatpush.bf16.msrb.mxu2 %v4151_v24  ;;  %v4048_v18 = vld [vmem:[#allocation2 + $0x178] sm:$0xf0]  ;;  %v202_v20 = vld [vmem:[%s6838_s1 + $0x50] sm:$0xff]  ;;  %v204_v24 = vld [vmem:[%s6838_s1 + $0x60] sm:$0xff] }
  0x5c   :  { %1003 = vmatpush.bf16.msrb.mxu3 %v4215_v28  ;;  %v195_v19 = vld [vmem:[%s6838_s1 + $0x18] sm:$0xff]  ;;  %v5432_v25 = vld [vmem:[#allocation2 + $0x64] sm:$0xf]  ;;  %v3912_v28 = vld [vmem:[#allocation2 + $0x68] sm:$0xf0]  ;;  %v4051_v32 = vor.u32 %v5466_v15, %v4048_v18  ;;  %v6314_v41 = vpack.c.bf16 %v204_v24, %v197_v23 }
  0x5d   :  { %962 = vmatpush.bf16.msrb.mxu0 %v4015_v33  ;;  %v5448_v29 = vld [vmem:[#allocation2 + $0xe4] sm:$0xf]  ;;  %v3976_v30 = vld [vmem:[#allocation2 + $0xe8] sm:$0xf0]  ;;  %v5517_v35 = vld [vmem:[#allocation2 + $0x304] sm:$0xf0]  ;;  %v6312_v37 = vpack.c.bf16 %v202_v20, %v195_v19  ;;  %v3915_v42 = vor.u32 %v5432_v25, %v3912_v28 }
  0x5e   :  { %976 = vmatpush.bf16.msrb.mxu1 %v4079_v34  ;;  %v5464_v33 = vld [vmem:[#allocation2 + $0x164] sm:$0xf]  ;;  %v4246_v34 = vld [vmem:[#allocation2 + $0x300] sm:$0xf]  ;;  %v4040_v38 = vld [vmem:[#allocation2 + $0x168] sm:$0xf0]  ;;  %v3979_v43 = vor.u32 %v5448_v29, %v3976_v30 }
  0x5f   :  { %990 = vmatpush.bf16.msrb.mxu2 %v4143_v36  ;;  %v6310_v36 = vpack.c.bf16 %v203_v14, %v196_v13  ;;  %v5482_v39 = vld [vmem:[#allocation2 + $0x1f4] sm:$0xf]  ;;  %v4043_v47 = vor.u32 %v5464_v33, %v4040_v38  ;;  %v4032_v52 = vld [vmem:[#allocation2 + $0x158] sm:$0xf0]  ;;  %v4104_v54 = vld [vmem:[#allocation2 + $0x1e8] sm:$0xf0] }
  0x60   :  { %1004 = vmatpush.bf16.msrb.mxu3 %v4207_v40  ;;  %v4112_v40 = vld [vmem:[#allocation2 + $0x1f8] sm:$0xf0]  ;;  %v5430_v44 = vld [vmem:[#allocation2 + $0x54] sm:$0xf]  ;;  %v5428_v57 = vld [vmem:[#allocation2 + $0x44] sm:$0xf] }
  0x61   :  { %963 = vmatpush.bf16.msrb.mxu0 %v4007_v45  ;;  %v3904_v45 = vld [vmem:[#allocation2 + $0x58] sm:$0xf0]  ;;  %v5446_v48 = vld [vmem:[#allocation2 + $0xd4] sm:$0xf]  ;;  %v4115_v51 = vor.u32 %v5482_v39, %v4112_v40  ;;  %v3896_v58 = vld [vmem:[#allocation2 + $0x48] sm:$0xf0] }
  0x62   :  { %977 = vmatpush.bf16.msrb.mxu1 %v4071_v46  ;;  %v4247_v46 = vor.u32 %v5517_v35, %v4246_v34  ;;  %v5462_v50 = vld [vmem:[#allocation2 + $0x154] sm:$0xf]  ;;  %v3907_v55 = vor.u32 %v5430_v44, %v3904_v45  ;;  %v5444_v60 = vld [vmem:[#allocation2 + $0xc4] sm:$0xf]  ;;  %v4024_v0 = vld [vmem:[#allocation2 + $0x148] sm:$0xf0] }
  0x63   :  { %991 = vmatpush.bf16.msrb.mxu2 %v4135_v49  ;;  %v3968_v49 = vld [vmem:[#allocation2 + $0xd8] sm:$0xf0]  ;;  %v4035_v59 = vor.u32 %v5462_v50, %v4032_v52  ;;  %v5478_v2 = vld [vmem:[#allocation2 + $0x1d4] sm:$0xf]  ;;  %v205_v14 = vld [vmem:[%s6838_s1 + $0x68] sm:$0xff] }
  0x64   :  { %1005 = vmatpush.bf16.msrb.mxu3 %v4199_v53  ;;  %v5480_v53 = vld [vmem:[#allocation2 + $0x1e4] sm:$0xf]  ;;  %v3971_v56 = vor.u32 %v5446_v48, %v3968_v49  ;;  %v4096_v3 = vld [vmem:[#allocation2 + $0x1d8] sm:$0xf0]  ;;  %v5426_v6 = vld [vmem:[#allocation2 + $0x34] sm:$0xf] }
  0x65   :  { %964 = vmatpush.bf16.msrb.mxu0 %v3999_v61  ;;  %v3960_v61 = vld [vmem:[#allocation2 + $0xc8] sm:$0xf0]  ;;  %v4107_v63 = vor.u32 %v5480_v53, %v4104_v54  ;;  %v3888_v7 = vld [vmem:[#allocation2 + $0x38] sm:$0xf0]  ;;  %v5442_v10 = vld [vmem:[#allocation2 + $0xb4] sm:$0xf]  ;;  %v4099_v13 = vor.u32 %v5478_v2, %v4096_v3 }
  0x66   :  { %978 = vmatpush.bf16.msrb.mxu1 %v4063_v62  ;;  %v5460_v62 = vld [vmem:[#allocation2 + $0x144] sm:$0xf]  ;;  %v3963_v5 = vor.u32 %v5444_v60, %v3960_v61  ;;  %v3952_v11 = vld [vmem:[#allocation2 + $0xb8] sm:$0xf0]  ;;  %v198_v12 = vld [vmem:[%s6838_s1 + $0x30] sm:$0xff] }
  0x67   :  { %992 = vmatpush.bf16.msrb.mxu2 %v4127_v4  ;;  %v3899_v4 = vor.u32 %v5428_v57, %v3896_v58  ;;  %v5458_v15 = vld [vmem:[#allocation2 + $0x134] sm:$0xf]  ;;  %v5476_v18 = vld [vmem:[#allocation2 + $0x1c4] sm:$0xf]  ;;  %v4088_v19 = vld [vmem:[#allocation2 + $0x1c8] sm:$0xf0]  ;;  %v3955_v20 = vor.u32 %v5442_v10, %v3952_v11  ;;  %v6326_v23 = vpack.c.bf16 %v205_v14, %v198_v12 }
  0x68   :  { %1006 = vmatpush.bf16.msrb.mxu3 %v4191_v9  ;;  %v4027_v9 = vor.u32 %v5460_v62, %v4024_v0  ;;  %v5440_v25 = vld [vmem:[#allocation2 + $0xa4] sm:$0xf]  ;;  %v4008_v28 = vld [vmem:[#allocation2 + $0x128] sm:$0xf0]  ;;  %v4091_v29 = vor.u32 %v5476_v18, %v4088_v19  ;;  %v4080_v33 = vld [vmem:[#allocation2 + $0x1b8] sm:$0xf0] }
  0x69   :  { %965 = vmatpush.bf16.msrb.mxu0 %v3991_v16  ;;  %v4016_v16 = vld [vmem:[#allocation2 + $0x138] sm:$0xf0]  ;;  %v5422_v35 = vld [vmem:[#allocation2 + $0x14] sm:$0xf]  ;;  %v5472_v48 = vld [vmem:[#allocation2 + $0x1a4] sm:$0xf] }
  0x6a   :  { %979 = vmatpush.bf16.msrb.mxu1 %v4055_v17  ;;  %v3891_v17 = vor.u32 %v5426_v6, %v3888_v7  ;;  %v4019_v24 = vor.u32 %v5458_v15, %v4016_v16  ;;  %v3872_v38 = vld [vmem:[#allocation2 + $0x18] sm:$0xf0]  ;;  %v5438_v40 = vld [vmem:[#allocation2 + $0x94] sm:$0xf]  ;;  %v4072_v49 = vld [vmem:[#allocation2 + $0x1a8] sm:$0xf0] }
  0x6b   :  { %993 = vmatpush.bf16.msrb.mxu2 %v4119_v21  ;;  %v5424_v21 = vld [vmem:[#allocation2 + $0x24] sm:$0xf]  ;;  %v4000_v44 = vld [vmem:[#allocation2 + $0x118] sm:$0xf0]  ;;  %v3928_v53 = vld [vmem:[#allocation2 + $0x88] sm:$0xf0]  ;;  %v4075_v61 = vor.u32 %v5472_v48, %v4072_v49 }
  0x6c   :  { %1007 = vmatpush.bf16.msrb.mxu3 %v4183_v27  ;;  %966 = vmatmul.bf16.vlgmr.msrb.gmra.mxu0 %v6308_v31  ;;  %v5456_v27 = vld [vmem:[#allocation2 + $0x124] sm:$0xf]  ;;  %v5514_v57 = vld [vmem:[#allocation2 + $0x2f4] sm:$0xf]  ;;  %v4240_v58 = vld [vmem:[#allocation2 + $0x2f8] sm:$0xf0] }
  0x6d   :  { %980 = vmatmul.bf16.vlgmr.msrb.gmra.mxu1 %v6312_v37  ;;  %1021 = vmatpush.bf16.msra.mxu0 %v4247_v46  ;;  %v4011_v39 = vor.u32 %v5456_v27, %v4008_v28  ;;  %v3875_v46 = vor.u32 %v5422_v35, %v3872_v38  ;;  %v5436_v52 = vld [vmem:[#allocation2 + $0x84] sm:$0xf]  ;;  %v3992_v60 = vld [vmem:[#allocation2 + $0x108] sm:$0xf0]  ;;  %v4064_v0 = vld [vmem:[#allocation2 + $0x198] sm:$0xf0]  ;;  %v4243_v6 = vor.u32 %v5514_v57, %v4240_v58 }
  0x6e   :  { %1028 = vmatpush.bf16.msra.mxu1 %v3923_v22  ;;  %994 = vmatmul.bf16.vlgmr.msrb.gmra.mxu2 %v6310_v36  ;;  %v3880_v22 = vld [vmem:[#allocation2 + $0x28] sm:$0xf0]  ;;  %v3931_v2 = vor.u32 %v5436_v52, %v3928_v53  ;;  %v5512_v11 = vld [vmem:[#allocation2 + $0x2e4] sm:$0xf]  ;;  %v5494_v19 = vld [vmem:[#allocation2 + $0x254] sm:$0xf] }
  0x6f   :  { %1042 = vmatpush.bf16.msra.mxu2 %v3987_v26  ;;  %1008 = vmatmul.bf16.vlgmr.msrb.gmra.mxu3 %v6314_v41  ;;  %v3944_v26 = vld [vmem:[#allocation2 + $0xa8] sm:$0xf0]  ;;  %v3883_v30 = vor.u32 %v5424_v21, %v3880_v22  ;;  %v5468_v14 = vld [vmem:[#allocation2 + $0x184] sm:$0xf]  ;;  %v5510_v21 = vld [vmem:[#allocation2 + $0x2d4] sm:$0xf] }
  0x70   :  { %1056 = vmatpush.bf16.msra.mxu3 %v4051_v32  ;;  %v5474_v32 = vld [vmem:[#allocation2 + $0x1b4] sm:$0xf]  ;;  %v3947_v34 = vor.u32 %v5440_v25, %v3944_v26  ;;  %v4168_v10 = vld [vmem:[#allocation2 + $0x268] sm:$0xf0]  ;;  %v4224_v22 = vld [vmem:[#allocation2 + $0x2d8] sm:$0xf0] }
  0x71   :  { %1070 = vmatpush.bf16.msrb.mxu0 %v4115_v51  ;;  %v4083_v45 = vor.u32 %v5474_v32, %v4080_v33  ;;  %v3864_v51 = vld [vmem:[#allocation2 + $0x8] sm:$0xf0]  ;;  %v4227_v26 = vor.u32 %v5510_v21, %v4224_v22  ;;  %v5492_v27 = vld [vmem:[#allocation2 + $0x244] sm:$0xf]  ;;  %v5490_v33 = vld [vmem:[#allocation2 + $0x234] sm:$0xf] }
  0x72   :  { %1029 = vmatpush.bf16.msra.mxu1 %v3915_v42  ;;  %v3936_v42 = vld [vmem:[#allocation2 + $0x98] sm:$0xf0]  ;;  %v4232_v12 = vld [vmem:[#allocation2 + $0x2e8] sm:$0xf0]  ;;  %v5500_v53 = vld [vmem:[#allocation2 + $0x284] sm:$0xf] }
  0x73   :  { %1043 = vmatpush.bf16.msra.mxu2 %v3979_v43  ;;  %v5454_v43 = vld [vmem:[#allocation2 + $0x114] sm:$0xf]  ;;  %v3939_v50 = vor.u32 %v5438_v40, %v3936_v42  ;;  %v4056_v15 = vld [vmem:[#allocation2 + $0x188] sm:$0xf0]  ;;  %v4235_v18 = vor.u32 %v5512_v11, %v4232_v12  ;;  %v4208_v35 = vld [vmem:[#allocation2 + $0x2b8] sm:$0xf0] }
  0x74   :  { %1057 = vmatpush.bf16.msra.mxu3 %v4043_v47  ;;  %v5420_v47 = vld [vmem:[#allocation2 + $0x4] sm:$0xf]  ;;  %v4003_v54 = vor.u32 %v5454_v43, %v4000_v44  ;;  %v4152_v28 = vld [vmem:[#allocation2 + $0x248] sm:$0xf0]  ;;  %v4192_v48 = vld [vmem:[#allocation2 + $0x298] sm:$0xf0] }
  0x75   :  { %1071 = vmatpush.bf16.msrb.mxu0 %v4107_v63  ;;  %v3867_v62 = vor.u32 %v5420_v47, %v3864_v51  ;;  %v5470_v63 = vld [vmem:[#allocation2 + $0x194] sm:$0xf]  ;;  %v4136_v40 = vld [vmem:[#allocation2 + $0x228] sm:$0xf0]  ;;  %v5504_v42 = vld [vmem:[#allocation2 + $0x2a4] sm:$0xf] }
  0x76   :  { %1030 = vmatpush.bf16.msra.mxu1 %v3907_v55  ;;  %v5498_v55 = vld [vmem:[#allocation2 + $0x274] sm:$0xf]  ;;  %v4200_v43 = vld [vmem:[#allocation2 + $0x2a8] sm:$0xf0]  ;;  %v4128_v47 = vld [vmem:[#allocation2 + $0x218] sm:$0xf0] }
  0x77   :  { %1044 = vmatpush.bf16.msra.mxu2 %v3971_v56  ;;  %v4176_v56 = vld [vmem:[#allocation2 + $0x278] sm:$0xf0]  ;;  %v5484_v51 = vld [vmem:[#allocation2 + $0x204] sm:$0xf]  ;;  %v4120_v52 = vld [vmem:[#allocation2 + $0x208] sm:$0xf0] }
  0x78   :  { %1058 = vmatpush.bf16.msra.mxu3 %v4035_v59  ;;  %v5452_v59 = vld [vmem:[#allocation2 + $0x104] sm:$0xf]  ;;  %v4179_v3 = vor.u32 %v5498_v55, %v4176_v56  ;;  %v4123_v55 = vor.u32 %v5484_v51, %v4120_v52  ;;  %v5549_v57 = vld [vmem:[%s6812_s5 + $0x74] sm:$0xf0]  ;;  %v5548_v58 = vld [vmem:[%s6812_s5 + $0x74] sm:$0xf] }
  0x79   :  { %1072 = vmatpush.bf16.msrb.mxu0 %v4099_v13  ;;  %v3995_v7 = vor.u32 %v5452_v59, %v3992_v60  ;;  %v4067_v13 = vor.u32 %v5470_v63, %v4064_v0  ;;  %v4314_v60 = vld [vmem:[%s6812_s5 + $0x78] sm:$0xf0]  ;;  %v4306_v0 = vld [vmem:[%s6812_s5 + $0x68] sm:$0xf0]  ;;  %v4288_v11 = vld [vmem:[%s6812_s5 + $0x40] sm:$0xf] }
  0x7a   :  { %1031 = vmatpush.bf16.msra.mxu1 %v3899_v4  ;;  %v5516_v4 = vld [vmem:[#allocation2 + $0x304] sm:$0xf]  ;;  %v5543_v12 = vld [vmem:[%s6812_s5 + $0x44] sm:$0xf0]  ;;  %v4282_v22 = vld [vmem:[%s6812_s5 + $0x38] sm:$0xf0] }
  0x7b   :  { %1045 = vmatpush.bf16.msra.mxu2 %v3963_v5  ;;  %v4248_v5 = vld [vmem:[#allocation2 + $0x308] sm:$0xf0] }
  0x7c   :  { %1059 = vmatpush.bf16.msra.mxu3 %v4027_v9  ;;  %4252 = vmatmul.msk.bf16.vlgmr.msra.gmra.mxu0 %vm926_vm0, %v6326_v23  ;;  %v5496_v9 = vld [vmem:[#allocation2 + $0x264] sm:$0xf]  ;;  %v4251_v16 = vor.u32 %v5516_v4, %v4248_v5  ;;  %v5545_v4 = vld [vmem:[%s6812_s5 + $0x54] sm:$0xf0]  ;;  %v5544_v5 = vld [vmem:[%s6812_s5 + $0x54] sm:$0xf] }
  0x7d   :  { %1073 = vmatpush.bf16.msrb.mxu0 %v4091_v29  ;;  %v5508_v29 = vld [vmem:[#allocation2 + $0x2c4] sm:$0xf] }
  0x7e   :  { %1032 = vmatpush.bf16.msra.mxu1 %v3891_v17  ;;  %v4171_v17 = vor.u32 %v5496_v9, %v4168_v10 }
  0x7f   :  { %1046 = vmatpush.bf16.msra.mxu2 %v3955_v20  ;;  %v4160_v20 = vld [vmem:[#allocation2 + $0x258] sm:$0xf0] }
  0x80   :  { %1060 = vmatpush.bf16.msra.mxu3 %v4019_v24  ;;  %v4059_v24 = vor.u32 %v5468_v14, %v4056_v15  ;;  %v4163_v25 = vor.u32 %v5494_v19, %v4160_v20  ;;  %v4289_v14 = vor.u32 %v5543_v12, %v4288_v11  ;;  %v4290_v15 = vld [vmem:[%s6812_s5 + $0x48] sm:$0xf0]  ;;  %v5541_v19 = vld [vmem:[%s6812_s5 + $0x34] sm:$0xf0]  ;;  %v5540_v20 = vld [vmem:[%s6812_s5 + $0x34] sm:$0xf] }
  0x81   :  { %1074 = vmatpush.bf16.msrb.mxu0 %v4083_v45  ;;  %v4203_v45 = vor.u32 %v5504_v42, %v4200_v43  ;;  %v4256_v42 = vld [vmem:[%s6812_s5] sm:$0xf]  ;;  %v5535_v43 = vld [vmem:[%s6812_s5 + $0x4] sm:$0xf0]  ;;  %v5562_v12 = vld [vmem:[%s6812_s5 + $0xe4] sm:$0xf] }
  0x82   :  { %1033 = vmatpush.bf16.msra.mxu1 %v3883_v30  ;;  %v4216_v30 = vld [vmem:[#allocation2 + $0x2c8] sm:$0xf0] }
  0x83   :  { %1047 = vmatpush.bf16.msra.mxu2 %v3947_v34  ;;  %v4219_v32 = vor.u32 %v5508_v29, %v4216_v30  ;;  %v5506_v34 = vld [vmem:[#allocation2 + $0x2b4] sm:$0xf]  ;;  %v4274_v30 = vld [vmem:[%s6812_s5 + $0x28] sm:$0xf0] }
  0x84   :  { %1061 = vmatpush.bf16.msra.mxu3 %v4011_v39  ;;  %v4211_v38 = vor.u32 %v5506_v34, %v4208_v35  ;;  %v5488_v39 = vld [vmem:[#allocation2 + $0x224] sm:$0xf]  ;;  %v5537_v34 = vld [vmem:[%s6812_s5 + $0x14] sm:$0xf0]  ;;  %v5536_v35 = vld [vmem:[%s6812_s5 + $0x14] sm:$0xf] }
  0x85   :  { %1075 = vmatpush.bf16.msrb.mxu0 %v4075_v61  ;;  %v4139_v44 = vor.u32 %v5488_v39, %v4136_v40  ;;  %v5547_v61 = vld [vmem:[%s6812_s5 + $0x64] sm:$0xf0] }
  0x86   :  { %1034 = vmatpush.bf16.msra.mxu1 %v3875_v46  ;;  %v5486_v46 = vld [vmem:[#allocation2 + $0x214] sm:$0xf] }
  0x87   :  { %1048 = vmatpush.bf16.msra.mxu2 %v3939_v50  ;;  %v4131_v49 = vor.u32 %v5486_v46, %v4128_v47  ;;  %v4257_v47 = vor.u32 %v5535_v43, %v4256_v42  ;;  %v4344_v43 = vld [vmem:[%s6812_s5 + $0xb0] sm:$0xf] }
  0x88   :  { %1062 = vmatpush.bf16.msra.mxu3 %v4003_v54  ;;  %v4184_v54 = vld [vmem:[#allocation2 + $0x288] sm:$0xf0] }
  0x89   :  { %1076 = vmatpush.bf16.msrb.mxu0 %v4067_v13  ;;  %v4187_v56 = vor.u32 %v5500_v53, %v4184_v54  ;;  %v5542_v13 = vld [vmem:[%s6812_s5 + $0x44] sm:$0xf] }
  0x8a   :  { %1035 = vmatpush.bf16.msra.mxu1 %v3867_v62  ;;  %v5546_v62 = vld [vmem:[%s6812_s5 + $0x64] sm:$0xf] }
  0x8b   :  { %1049 = vmatpush.bf16.msra.mxu2 %v3931_v2  ;;  %v4309_v2 = vor.u32 %v5546_v62, %v4306_v0  ;;  %v6441_v62 = vld [vmem:[%s6839_s27] sm:$0x3] }
  0x8c   :  { %1063 = vmatpush.bf16.msra.mxu3 %v3995_v7  ;;  %v4298_v7 = vld [vmem:[%s6812_s5 + $0x58] sm:$0xf0] }
  0x8d   :  { %1036 = vmatmul.bf16.vlgmr.msra.gmra.mxu1 %v6272_v1  ;;  %1077 = vmatpush.bf16.msrb.mxu0 %v4059_v24  ;;  %v4155_v1 = vor.u32 %v5492_v27, %v4152_v28  ;;  %v4301_v9 = vor.u32 %v5544_v5, %v4298_v7  ;;  %v4285_v24 = vor.u32 %v5540_v20, %v4282_v22  ;;  %v5539_v27 = vld [vmem:[%s6812_s5 + $0x24] sm:$0xf0]  ;;  %v5538_v28 = vld [vmem:[%s6812_s5 + $0x24] sm:$0xf]  ;;  %v4368_v7 = vld [vmem:[%s6812_s5 + $0xe0] sm:$0xf] }
  0x8e   :  { %1084 = vmatpush.bf16.msrb.mxu1 %v4179_v3  ;;  %1050 = vmatmul.bf16.vlgmr.msra.gmra.mxu2 %v6281_v8  ;;  %v4144_v8 = vld [vmem:[#allocation2 + $0x238] sm:$0xf0]  ;;  %v4296_v3 = vld [vmem:[%s6812_s5 + $0x50] sm:$0xf] }
  0x8f   :  { %1098 = vmatpush.bf16.msrb.mxu2 %v4243_v6  ;;  %1064 = vmatmul.bf16.vlgmr.msra.gmra.mxu3 %v6308_v31  ;;  %v4147_v31 = vor.u32 %v5490_v33, %v4144_v8  ;;  %v4297_v6 = vor.u32 %v5545_v4, %v4296_v3  ;;  %v4277_v33 = vor.u32 %v5538_v28, %v4274_v30  ;;  %v4264_v8 = vld [vmem:[%s6812_s5 + $0x10] sm:$0xf]  ;;  %v5565_v3 = vld [vmem:[%s6812_s5 + $0xf4] sm:$0xf0]  ;;  %v5564_v4 = vld [vmem:[%s6812_s5 + $0xf4] sm:$0xf] }
  0x90   :  { %1119 = vmatpush.bf16.msrb.mxu3 %v4251_v16  ;;  %1078 = vmatmul.bf16.vlgmr.msrb.gmra.mxu0 %v6312_v37  ;;  %v5502_v37 = vld [vmem:[#allocation2 + $0x294] sm:$0xf]  ;;  %v4293_v16 = vor.u32 %v5542_v13, %v4290_v15  ;;  %v4370_v13 = vld [vmem:[%s6812_s5 + $0xe8] sm:$0xf0]  ;;  %v4362_v30 = vld [vmem:[%s6812_s5 + $0xd8] sm:$0xf0] }
  0x91   :  { %v4195_v50 = vor.u32 %v5502_v37, %v4192_v48  ;;  %v4258_v37 = vld [vmem:[%s6812_s5 + $0x8] sm:$0xf0] }
  0x92   :  { %1085 = vmatpush.bf16.msrb.mxu1 %v4171_v17 }
  0x93   :  { %1099 = vmatpush.bf16.msrb.mxu2 %v4235_v18  ;;  %v4280_v18 = vld [vmem:[%s6812_s5 + $0x30] sm:$0xf] }
  0x94   :  { %v4281_v21 = vor.u32 %v5541_v19, %v4280_v18  ;;  %v1128_v18 = vperm.slane %v6441_v62, 0  ;;  %v4373_v19 = vor.u32 %v5562_v12, %v4370_v13 }
  0x96   :  { %1086 = vmatpush.bf16.msrb.mxu1 %v4163_v25 }
  0x97   :  { %1100 = vmatpush.bf16.msrb.mxu2 %v4227_v26  ;;  %v4272_v26 = vld [vmem:[%s6812_s5 + $0x20] sm:$0xf] }
  0x98   :  { %v4273_v29 = vor.u32 %v5539_v27, %v4272_v26  ;;  %v5561_v26 = vld [vmem:[%s6812_s5 + $0xd4] sm:$0xf0]  ;;  %v5560_v27 = vld [vmem:[%s6812_s5 + $0xd4] sm:$0xf] }
  0x9a   :  { %1087 = vmatpush.bf16.msrb.mxu1 %v4155_v1 }
  0x9b   :  { %1101 = vmatpush.bf16.msrb.mxu2 %v4219_v32 }
  0x9e   :  { %1088 = vmatpush.bf16.msrb.mxu1 %v4147_v31  ;;  %v4265_v31 = vor.u32 %v5537_v34, %v4264_v8  ;;  %v4352_v8 = vld [vmem:[%s6812_s5 + $0xc0] sm:$0xf]  ;;  %v5559_v34 = vld [vmem:[%s6812_s5 + $0xc4] sm:$0xf0] }
  0x9f   :  { %1102 = vmatpush.bf16.msrb.mxu2 %v4211_v38  ;;  %4253 = vmatmul.msk.bf16.vlgmr.msrb.gmra.mxu3 %vm926_vm0, %v6326_v23  ;;  %v4312_v23 = vld [vmem:[%s6812_s5 + $0x70] sm:$0xf]  ;;  %v4266_v38 = vld [vmem:[%s6812_s5 + $0x18] sm:$0xf0] }
  0xa0   :  { %v4313_v59 = vor.u32 %v5549_v57, %v4312_v23  ;;  %v4269_v40 = vor.u32 %v5536_v35, %v4266_v38  ;;  %v5558_v35 = vld [vmem:[%s6812_s5 + $0xc4] sm:$0xf]  ;;  %v4353_v38 = vor.u32 %v5559_v34, %v4352_v8 }
  0xa2   :  { %1089 = vmatpush.bf16.msrb.mxu1 %v4139_v44  ;;  %1340 = vmatpush.bf16.msra.mxu0 %v4313_v59  ;;  %v5534_v44 = vld [vmem:[%s6812_s5 + $0x4] sm:$0xf] }
  0xa3   :  { %1103 = vmatpush.bf16.msrb.mxu2 %v4203_v45  ;;  %v4261_v48 = vor.u32 %v5534_v44, %v4258_v37  ;;  %v5557_v44 = vld [vmem:[%s6812_s5 + $0xb4] sm:$0xf0] }
  0xa6   :  { %1090 = vmatpush.bf16.msrb.mxu1 %v4131_v49 }
  0xa7   :  { %1104 = vmatpush.bf16.msrb.mxu2 %v4195_v50 }
  0xaa   :  { %1091 = vmatpush.bf16.msrb.mxu1 %v4123_v55 }
  0xab   :  { %1105 = vmatpush.bf16.msrb.mxu2 %v4187_v56 }
  0xad   :  { %1092 = vmatmul.bf16.vlgmr.msrb.gmra.mxu1 %v6310_v36  ;;  %v4317_v36 = vor.u32 %v5548_v58, %v4314_v60 }
  0xae   :  { %1106 = vmatmul.bf16.vlgmr.msrb.gmra.mxu2 %v6314_v41  ;;  %v4304_v41 = vld [vmem:[%s6812_s5 + $0x60] sm:$0xf] }
  0xaf   :  { %1368 = vmatpush.bf16.msra.mxu1 %v4317_v36  ;;  %v4305_v63 = vor.u32 %v5547_v61, %v4304_v41 }
  0xb1   :  { %1341 = vmatpush.bf16.msra.mxu0 %v4305_v63 }
  0xb3   :  { %1369 = vmatpush.bf16.msra.mxu1 %v4309_v2  ;;  %v4376_v2 = vld [vmem:[%s6812_s5 + $0xf0] sm:$0xf] }
  0xb4   :  { %v4377_v5 = vor.u32 %v5565_v3, %v4376_v2  ;;  %v4322_v2 = vld [vmem:[%s6812_s5 + $0x88] sm:$0xf0] }
  0xb5   :  { %1342 = vmatpush.bf16.msra.mxu0 %v4297_v6  ;;  %v4378_v6 = vld [vmem:[%s6812_s5 + $0xf8] sm:$0xf0] }
  0xb6   :  { %v4381_v11 = vor.u32 %v5564_v4, %v4378_v6  ;;  %1354 = vmatpush.bf16.msra.mxu3 %v4377_v5 }
  0xb7   :  { %1370 = vmatpush.bf16.msra.mxu1 %v4301_v9  ;;  %v5563_v9 = vld [vmem:[%s6812_s5 + $0xe4] sm:$0xf0] }
  0xb8   :  { %v4369_v15 = vor.u32 %v5563_v9, %v4368_v7  ;;  %1382 = vmatpush.bf16.msra.mxu2 %v4381_v11 }
  0xb9   :  { %1343 = vmatpush.bf16.msra.mxu0 %v4289_v14 }
  0xba   :  { %1355 = vmatpush.bf16.msra.mxu3 %v4369_v15 }
  0xbb   :  { %1371 = vmatpush.bf16.msra.mxu1 %v4293_v16 }
  0xbc   :  { %1383 = vmatpush.bf16.msra.mxu2 %v4373_v19 }
  0xbd   :  { %1344 = vmatpush.bf16.msra.mxu0 %v4281_v21 }
  0xbf   :  { %1372 = vmatpush.bf16.msra.mxu1 %v4285_v24 }
  0xc1   :  { %1345 = vmatpush.bf16.msra.mxu0 %v4273_v29 }
  0xc3   :  { %1373 = vmatpush.bf16.msra.mxu1 %v4277_v33 }
  0xc5   :  { %1346 = vmatpush.bf16.msra.mxu0 %v4265_v31 }
  0xc7   :  { %1374 = vmatpush.bf16.msra.mxu1 %v4269_v40  ;;  %v4354_v40 = vld [vmem:[%s6812_s5 + $0xc8] sm:$0xf0] }
  0xc8   :  { %v4357_v42 = vor.u32 %v5558_v35, %v4354_v40  ;;  %v4440_v35 = vld [vmem:[#allocation6 + $0x70] sm:$0xf] }
  0xc9   :  { %v417_v10 = vpop.f32.mrf.mxu0  ;;  %1347 = vmatpush.bf16.msra.mxu0 %v4257_v47  ;;  %v4346_v47 = vld [vmem:[%s6812_s5 + $0xb8] sm:$0xf0] }
  0xca   :  { %v6386_v17 = vpop.f32.mrf.mxu1 }
  0xcb   :  { %1375 = vmatpush.bf16.msra.mxu1 %v4261_v48  ;;  %v4336_v48 = vld [vmem:[%s6812_s5 + $0xa0] sm:$0xf] }
  0xd1   :  { %v939_v25 = vpop.f32.mrf.mxu2  ;;  %v419_v1 = vpop.f32.mrf.mxu0 }
  0xd2   :  { %v953_v32 = vpop.f32.mrf.mxu3  ;;  %v6424_v39 = vpop.f32.mrf.mxu1  ;;  %v940_v45 = vadd.f32 %v939_v25, %v417_v10  ;;  %v4360_v25 = vld [vmem:[%s6812_s5 + $0xd0] sm:$0xf] }
  0xd3   :  { %v4361_v29 = vor.u32 %v5561_v26, %v4360_v25 }
  0xd4   :  { %v954_v51 = vadd.f32 %v953_v32, %v940_v45  ;;  %v5556_v45 = vld [vmem:[%s6812_s5 + $0xb4] sm:$0xf] }
  0xd5   :  { %1356 = vmatpush.bf16.msra.mxu3 %v4361_v29  ;;  %v4349_v37 = vor.u32 %v5556_v45, %v4346_v47  ;;  %v4506_v47 = vld [vmem:[#allocation6 + $0xf8] sm:$0xf0] }
  0xd9   :  { %v941_v46 = vpop.f32.mrf.mxu2  ;;  %1357 = vmatpush.bf16.msra.mxu3 %v4353_v38  ;;  %v4504_v38 = vld [vmem:[#allocation6 + $0xf0] sm:$0xf] }
  0xda   :  { %v955_v49 = vpop.f32.mrf.mxu3  ;;  %v942_v53 = vadd.f32 %v941_v46, %v419_v1  ;;  %v4365_v1 = vor.u32 %v5560_v27, %v4362_v30  ;;  %v4345_v46 = vor.u32 %v5557_v44, %v4344_v43  ;;  %v5580_v43 = vld [vmem:[#allocation6 + $0x74] sm:$0xf]  ;;  %v4442_v44 = vld [vmem:[#allocation6 + $0x78] sm:$0xf0] }
  0xdb   :  { %v4445_v45 = vor.u32 %v5580_v43, %v4442_v44  ;;  %v5586_v43 = vld [vmem:[#allocation6 + $0xa4] sm:$0xf]  ;;  %v4466_v44 = vld [vmem:[#allocation6 + $0xa8] sm:$0xf0] }
  0xdc   :  { %v956_v23 = vadd.f32 %v955_v49, %v942_v53  ;;  %1384 = vmatpush.bf16.msra.mxu2 %v4365_v1  ;;  %v5555_v49 = vld [vmem:[%s6812_s5 + $0xa4] sm:$0xf0] }
  0xdd   :  { %1358 = vmatpush.bf16.msra.mxu3 %v4345_v46  ;;  %v5596_v46 = vld [vmem:[#allocation6 + $0xf4] sm:$0xf]  ;;  %1628 = vmatpush.bf16.msrb.mxu1 %v4445_v45  ;;  %v4392_v45 = vld [vmem:[#allocation6 + $0x10] sm:$0xf] }
  0xe0   :  { %1385 = vmatpush.bf16.msra.mxu2 %v4357_v42  ;;  %v5597_v42 = vld [vmem:[#allocation6 + $0xf4] sm:$0xf0] }
  0xe4   :  { %1386 = vmatpush.bf16.msra.mxu2 %v4349_v37  ;;  %v4432_v37 = vld [vmem:[#allocation6 + $0x60] sm:$0xf] }
  0xe9   :  { %v967_v50 = vpop.f32.mrf.mxu0 }
  0xea   :  { %v981_v52 = vpop.f32.mrf.mxu1  ;;  %v968_v54 = vadd.f32 %v967_v50, %v954_v51  ;;  %v5554_v50 = vld [vmem:[%s6812_s5 + $0xa4] sm:$0xf]  ;;  %v4337_v51 = vor.u32 %v5555_v49, %v4336_v48  ;;  %v4509_v48 = vor.u32 %v5596_v46, %v4506_v47  ;;  %v5579_v49 = vld [vmem:[#allocation6 + $0x64] sm:$0xf0]  ;;  %v5569_v46 = vld [vmem:[#allocation6 + $0x14] sm:$0xf0] }
  0xeb   :  { %v4456_v47 = vld [vmem:[#allocation6 + $0x90] sm:$0xf] }
  0xec   :  { %v982_v57 = vadd.f32 %v981_v52, %v968_v54  ;;  %v4338_v52 = vld [vmem:[%s6812_s5 + $0xa8] sm:$0xf0]  ;;  %1359 = vmatpush.bf16.msra.mxu3 %v4337_v51  ;;  %v5595_v51 = vld [vmem:[#allocation6 + $0xe4] sm:$0xf0] }
  0xed   :  { %v4341_v53 = vor.u32 %v5554_v50, %v4338_v52  ;;  %v4496_v50 = vld [vmem:[#allocation6 + $0xe0] sm:$0xf]  ;;  %v4433_v52 = vor.u32 %v5579_v49, %v4432_v37  ;;  %v4393_v37 = vor.u32 %v5569_v46, %v4392_v45  ;;  %v5568_v49 = vld [vmem:[#allocation6 + $0x14] sm:$0xf] }
  0xef   :  { %1387 = vmatpush.bf16.msra.mxu2 %v4341_v53  ;;  %v4497_v53 = vor.u32 %v5595_v51, %v4496_v50  ;;  %v4394_v50 = vld [vmem:[#allocation6 + $0x18] sm:$0xf0] }
  0xf1   :  { %v995_v55 = vpop.f32.mrf.mxu2  ;;  %v969_v56 = vpop.f32.mrf.mxu0 }
  0xf2   :  { %v1009_v58 = vpop.f32.mrf.mxu3  ;;  %v996_v59 = vadd.f32 %v995_v55, %v982_v57  ;;  %v970_v60 = vadd.f32 %v969_v56, %v956_v23  ;;  %v983_v36 = vpop.f32.mrf.mxu1  ;;  %v4328_v55 = vld [vmem:[%s6812_s5 + $0x90] sm:$0xf]  ;;  %v5553_v56 = vld [vmem:[%s6812_s5 + $0x94] sm:$0xf0]  ;;  %v5552_v23 = vld [vmem:[%s6812_s5 + $0x94] sm:$0xf] }
  0xf3   :  { %v4329_v57 = vor.u32 %v5553_v56, %v4328_v55  ;;  %v4434_v55 = vld [vmem:[#allocation6 + $0x68] sm:$0xf0]  ;;  %v5594_v56 = vld [vmem:[#allocation6 + $0xe4] sm:$0xf] }
  0xf4   :  { %v1010_v63 = vadd.f32 %v1009_v58, %v996_v59  ;;  %v984_v0 = vadd.f32 %v983_v36, %v970_v60  ;;  %v4330_v58 = vld [vmem:[%s6812_s5 + $0x98] sm:$0xf0]  ;;  %v4320_v60 = vld [vmem:[%s6812_s5 + $0x80] sm:$0xf]  ;;  %v5551_v36 = vld [vmem:[%s6812_s5 + $0x84] sm:$0xf0] }
  0xf5   :  { %v4333_v59 = vor.u32 %v5552_v23, %v4330_v58  ;;  %1360 = vmatpush.bf16.msra.mxu3 %v4329_v57  ;;  %v4498_v57 = vld [vmem:[#allocation6 + $0xe8] sm:$0xf0]  ;;  %v4424_v58 = vld [vmem:[#allocation6 + $0x50] sm:$0xf] }
  0xf7   :  { %1388 = vmatpush.bf16.msra.mxu2 %v4333_v59  ;;  %v5577_v59 = vld [vmem:[#allocation6 + $0x54] sm:$0xf0] }
  0xf9   :  { %v997_v41 = vpop.f32.mrf.mxu2  ;;  %v1023_v61 = vpop.f32.mrf.mxu0 }
  0xfa   :  { %v998_v10 = vadd.f32 %v997_v41, %v984_v0  ;;  %v1011_v14 = vpop.f32.mrf.mxu3  ;;  %v1024_v16 = vadd.f32 %v1023_v61, %v1010_v63  ;;  %v5550_v41 = vld [vmem:[%s6812_s5 + $0x84] sm:$0xf]  ;;  %v4321_v0 = vor.u32 %v5551_v36, %v4320_v60  ;;  %v4501_v60 = vor.u32 %v5594_v56, %v4498_v57  ;;  %v4488_v36 = vld [vmem:[#allocation6 + $0xd0] sm:$0xf]  ;;  %v4384_v56 = vld [vmem:[#allocation6] sm:$0xf] }
  0xfb   :  { %v4325_v3 = vor.u32 %v5550_v41, %v4322_v2  ;;  %v5593_v41 = vld [vmem:[#allocation6 + $0xd4] sm:$0xf0]  ;;  %v5592_v2 = vld [vmem:[#allocation6 + $0xd4] sm:$0xf]  ;;  %v4448_v57 = vld [vmem:[#allocation6 + $0x80] sm:$0xf] }
  0xfc   :  { %v1012_v20 = vadd.f32 %v1011_v14, %v998_v10  ;;  %v1132_v22 = vadd.f32 %v1128_v18, %v1024_v16  ;;  %1361 = vmatpush.bf16.msra.mxu3 %v4321_v0  ;;  %v4426_v0 = vld [vmem:[#allocation6 + $0x58] sm:$0xf0] }
  0xfd   :  { %1389 = vmatpush.bf16.msra.mxu2 %v4325_v3  ;;  %v4490_v3 = vld [vmem:[#allocation6 + $0xd8] sm:$0xf0] }
  0xfe   :  { %v1136_v32 = vmax.f32 %v1132_v22, 0.0 }
 0x101   :  { %v1025_v21 = vpop.f32.mrf.mxu0  ;;  %1642 = vmatpush.bf16.msrb.mxu2 %v4509_v48  ;;  %v5585_v48 = vld [vmem:[#allocation6 + $0x94] sm:$0xf0] }
 0x102   :  { %v1026_v24 = vadd.f32 %v1025_v21, %v1012_v20  ;;  %v4457_v51 = vor.u32 %v5585_v48, %v4456_v47 }
 0x104   :  { %v1134_v28 = vadd.f32 %v1128_v18, %v1026_v24 }
 0x105   :  { %1643 = vmatpush.bf16.msrb.mxu2 %v4501_v60  ;;  %v5566_v60 = vld [vmem:[#allocation6 + $0x4] sm:$0xf] }
 0x106   :  { %v1138_v33 = vmax.f32 %v1134_v28, 0.0 }
 0x108   :  { %v1140_v31 = vpack.c.bf16 %v1138_v33, %v1136_v32 }
 0x10a   :  { %1348 = vmatmul.bf16.vlgmr.msra.gmra.mxu0 %v1140_v31  ;;  %1376 = vmatmul.bf16.vlgmr.msra.gmra.mxu1 %v1140_v31  ;;  %v1037_v54 = vpop.f32.mrf.mxu1  ;;  %v5581_v31 = vld [vmem:[#allocation6 + $0x74] sm:$0xf0] }
 0x10b   :  { %v1038_v5 = vadd.f32 %v1037_v54, %v6386_v17  ;;  %v1129_v17 = vperm.slane %v6441_v62, 1  ;;  %v4441_v40 = vor.u32 %v5581_v31, %v4440_v35  ;;  %v4505_v62 = vor.u32 %v5597_v42, %v4504_v38  ;;  %v5578_v54 = vld [vmem:[#allocation6 + $0x64] sm:$0xf]  ;;  %v5587_v35 = vld [vmem:[#allocation6 + $0xa4] sm:$0xf0] }
 0x10c   :  { %v4437_v23 = vor.u32 %v5578_v54, %v4434_v55  ;;  %v5570_v31 = vld [vmem:[#allocation6 + $0x24] sm:$0xf]  ;;  %v4402_v38 = vld [vmem:[#allocation6 + $0x28] sm:$0xf0]  ;;  %v4458_v54 = vld [vmem:[#allocation6 + $0x98] sm:$0xf0] }
 0x10d   :  { %v1079_v7 = vpop.f32.mrf.mxu0  ;;  %1600 = vmatpush.bf16.msrb.mxu0 %v4441_v40  ;;  %1614 = vmatpush.bf16.msrb.mxu3 %v4505_v62  ;;  %v4405_v42 = vor.u32 %v5570_v31, %v4402_v38  ;;  %v4469_v62 = vor.u32 %v5586_v43, %v4466_v44  ;;  %v1174_v44 = vld [vmem:[%s6813_s6] sm:$0x3] }
 0x10e   :  { %1629 = vmatpush.bf16.msrb.mxu1 %v4437_v23  ;;  %v5567_v23 = vld [vmem:[#allocation6 + $0x4] sm:$0xf0]  ;;  %v1176_v46 = vperm.slane %v1174_v44, 0  ;;  %v1177_v47 = vperm.slane %v1174_v44, 1  ;;  %v5600_v44 = vld [vmem:[#allocation7 + $0x14] sm:$0xf] }
 0x111   :  { %v1051_v61 = vpop.f32.mrf.mxu2  ;;  %1601 = vmatpush.bf16.msrb.mxu0 %v4433_v52  ;;  %1615 = vmatpush.bf16.msrb.mxu3 %v4497_v53  ;;  %v4397_v52 = vor.u32 %v5568_v49, %v4394_v50  ;;  %v5584_v53 = vld [vmem:[#allocation6 + $0x94] sm:$0xf] }
 0x112   :  { %v1065_v63 = vpop.f32.mrf.mxu3  ;;  %v1039_v4 = vpop.f32.mrf.mxu1  ;;  %v1052_v6 = vadd.f32 %v1051_v61, %v1038_v5  ;;  %v5576_v61 = vld [vmem:[#allocation6 + $0x54] sm:$0xf]  ;;  %v4461_v55 = vor.u32 %v5584_v53, %v4458_v54 }
 0x113   :  { %v1040_v12 = vadd.f32 %v1039_v4, %v6424_v39  ;;  %v4489_v4 = vor.u32 %v5593_v41, %v4488_v36  ;;  %v4429_v5 = vor.u32 %v5576_v61, %v4426_v0  ;;  %v4386_v36 = vld [vmem:[#allocation6 + $0x8] sm:$0xf0] }
 0x114   :  { %v1066_v13 = vadd.f32 %v1065_v63, %v1052_v6  ;;  %v4425_v63 = vor.u32 %v5577_v59, %v4424_v58  ;;  %v4416_v6 = vld [vmem:[#allocation6 + $0x40] sm:$0xf]  ;;  %v4385_v58 = vor.u32 %v5567_v23, %v4384_v56  ;;  %v5583_v59 = vld [vmem:[#allocation6 + $0x84] sm:$0xf0]  ;;  %v4389_v61 = vor.u32 %v5566_v60, %v4386_v36  ;;  %v4450_v0 = vld [vmem:[#allocation6 + $0x88] sm:$0xf0] }
 0x115   :  { %v1081_v21 = vpop.f32.mrf.mxu0  ;;  %1616 = vmatpush.bf16.msrb.mxu3 %v4489_v4  ;;  %1630 = vmatpush.bf16.msrb.mxu1 %v4429_v5  ;;  %v4449_v41 = vor.u32 %v5583_v59, %v4448_v57  ;;  %v5613_v4 = vld [vmem:[#allocation7 + $0x74] sm:$0xf0]  ;;  %v4632_v5 = vld [vmem:[#allocation7 + $0xf0] sm:$0xf] }
 0x116   :  { %v1080_v15 = vadd.f32 %v1079_v7, %v1066_v13  ;;  %v5575_v7 = vld [vmem:[#allocation6 + $0x44] sm:$0xf0]  ;;  %v4418_v13 = vld [vmem:[#allocation6 + $0x48] sm:$0xf0]  ;;  %1602 = vmatpush.bf16.msrb.mxu0 %v4425_v63  ;;  %v5582_v63 = vld [vmem:[#allocation6 + $0x84] sm:$0xf] }
 0x119   :  { %v1053_v9 = vpop.f32.mrf.mxu2 }
 0x11a   :  { %v1067_v10 = vpop.f32.mrf.mxu3  ;;  %v1054_v14 = vadd.f32 %v1053_v9, %v1040_v12  ;;  %v4480_v9 = vld [vmem:[#allocation6 + $0xc0] sm:$0xf]  ;;  %v5574_v12 = vld [vmem:[#allocation6 + $0x44] sm:$0xf] }
 0x11c   :  { %v1068_v19 = vadd.f32 %v1067_v10, %v1054_v14  ;;  %v4493_v10 = vor.u32 %v5592_v2, %v4490_v3  ;;  %v5590_v14 = vld [vmem:[#allocation6 + $0xc4] sm:$0xf]  ;;  %v4453_v2 = vor.u32 %v5582_v63, %v4450_v0  ;;  %v4568_v3 = vld [vmem:[#allocation7 + $0x70] sm:$0xf]  ;;  %v4544_v63 = vld [vmem:[#allocation7 + $0x40] sm:$0xf] }
 0x11d   :  { %v5607_v0 = vld [vmem:[#allocation7 + $0x44] sm:$0xf0] }
 0x11e   :  { %v1082_v25 = vadd.f32 %v1081_v21, %v1068_v19  ;;  %v4421_v19 = vor.u32 %v5574_v12, %v4418_v13  ;;  %1644 = vmatpush.bf16.msrb.mxu2 %v4493_v10  ;;  %v4408_v21 = vld [vmem:[#allocation6 + $0x30] sm:$0xf]  ;;  %v4570_v10 = vld [vmem:[#allocation7 + $0x78] sm:$0xf0]  ;;  %v5628_v13 = vld [vmem:[#allocation7 + $0xf4] sm:$0xf] }
 0x120   :  { %1631 = vmatpush.bf16.msrb.mxu1 %v4421_v19  ;;  %v4624_v19 = vld [vmem:[#allocation7 + $0xe0] sm:$0xf] }
 0x122   :  { %v1121_v16 = vpop.f32.mrf.mxu3 }
 0x12a   :  { %v1093_v11 = vpop.f32.mrf.mxu1  ;;  %v1123_v30 = vpop.f32.mrf.mxu3 }
 0x12b   :  { %v1094_v20 = vadd.f32 %v1093_v11, %v1080_v15  ;;  %v5591_v11 = vld [vmem:[#allocation6 + $0xc4] sm:$0xf0]  ;;  %v4482_v15 = vld [vmem:[#allocation6 + $0xc8] sm:$0xf0] }
 0x131   :  { %v1107_v18 = vpop.f32.mrf.mxu2 }
 0x132   :  { %v1108_v22 = vadd.f32 %v1107_v18, %v1094_v20  ;;  %v1095_v24 = vpop.f32.mrf.mxu1  ;;  %v4481_v18 = vor.u32 %v5591_v11, %v4480_v9  ;;  %v4485_v20 = vor.u32 %v5590_v14, %v4482_v15  ;;  %v5612_v9 = vld [vmem:[#allocation7 + $0x74] sm:$0xf]  ;;  %v4634_v14 = vld [vmem:[#allocation7 + $0xf8] sm:$0xf0]  ;;  %v4560_v15 = vld [vmem:[#allocation7 + $0x60] sm:$0xf] }
 0x133   :  { %v1096_v27 = vadd.f32 %v1095_v24, %v1082_v25  ;;  %v4472_v24 = vld [vmem:[#allocation6 + $0xb0] sm:$0xf]  ;;  %v4573_v12 = vor.u32 %v5612_v9, %v4570_v10  ;;  %v5622_v9 = vld [vmem:[#allocation7 + $0xc4] sm:$0xf]  ;;  %v4610_v10 = vld [vmem:[#allocation7 + $0xc8] sm:$0xf0] }
 0x134   :  { %v1122_v26 = vadd.f32 %v1121_v16, %v1108_v22  ;;  %v4417_v16 = vor.u32 %v5575_v7, %v4416_v6  ;;  %1617 = vmatpush.bf16.msrb.mxu3 %v4481_v18  ;;  %1645 = vmatpush.bf16.msrb.mxu2 %v4485_v20  ;;  %v5573_v22 = vld [vmem:[#allocation6 + $0x34] sm:$0xf0]  ;;  %v4569_v6 = vor.u32 %v5613_v4, %v4568_v3  ;;  %v5611_v18 = vld [vmem:[#allocation7 + $0x64] sm:$0xf0]  ;;  %v4608_v3 = vld [vmem:[#allocation7 + $0xc0] sm:$0xf] }
 0x135   :  { %v4409_v25 = vor.u32 %v5573_v22, %v4408_v21  ;;  %v5629_v7 = vld [vmem:[#allocation7 + $0xf4] sm:$0xf0]  ;;  %v5627_v20 = vld [vmem:[#allocation7 + $0xe4] sm:$0xf0]  ;;  %v4561_v21 = vor.u32 %v5611_v18, %v4560_v15  ;;  %v4600_v15 = vld [vmem:[#allocation7 + $0xb0] sm:$0xf] }
 0x136   :  { %v1133_v1 = vadd.f32 %v1129_v17, %v1122_v26  ;;  %1603 = vmatpush.bf16.msrb.mxu0 %v4417_v16  ;;  %v5589_v26 = vld [vmem:[#allocation6 + $0xb4] sm:$0xf0]  ;;  %v4633_v11 = vor.u32 %v5629_v7, %v4632_v5  ;;  %v4637_v16 = vor.u32 %v5628_v13, %v4634_v14  ;;  %v4625_v22 = vor.u32 %v5627_v20, %v4624_v19  ;;  %v5623_v4 = vld [vmem:[#allocation7 + $0xc4] sm:$0xf0]  ;;  %v5606_v5 = vld [vmem:[#allocation7 + $0x44] sm:$0xf] }
 0x137   :  { %v4546_v7 = vld [vmem:[#allocation7 + $0x48] sm:$0xf0]  ;;  %v4536_v13 = vld [vmem:[#allocation7 + $0x30] sm:$0xf]  ;;  %v5605_v14 = vld [vmem:[#allocation7 + $0x34] sm:$0xf0] }
 0x138   :  { %v1137_v33 = vmax.f32 %v1133_v1, 0.0  ;;  %v4474_v1 = vld [vmem:[#allocation6 + $0xb8] sm:$0xf0]  ;;  %v5621_v18 = vld [vmem:[#allocation7 + $0xb4] sm:$0xf0] }
 0x139   :  { %v1109_v28 = vpop.f32.mrf.mxu2  ;;  %v5604_v19 = vld [vmem:[#allocation7 + $0x34] sm:$0xf]  ;;  %v4538_v20 = vld [vmem:[#allocation7 + $0x38] sm:$0xf0] }
 0x13a   :  { %v1110_v29 = vadd.f32 %v1109_v28, %v1096_v27  ;;  %v4410_v27 = vld [vmem:[#allocation6 + $0x38] sm:$0xf0]  ;;  %v4473_v28 = vor.u32 %v5589_v26, %v4472_v24  ;;  %1604 = vmatpush.bf16.msrb.mxu0 %v4409_v25  ;;  %v5610_v24 = vld [vmem:[#allocation7 + $0x64] sm:$0xf]  ;;  %v4562_v25 = vld [vmem:[#allocation7 + $0x68] sm:$0xf0] }
 0x13b   :  { %v5626_v26 = vld [vmem:[#allocation7 + $0xe4] sm:$0xf] }
 0x13c   :  { %v1124_v39 = vadd.f32 %v1123_v30, %v1110_v29  ;;  %v5588_v30 = vld [vmem:[#allocation6 + $0xb4] sm:$0xf]  ;;  %1618 = vmatpush.bf16.msrb.mxu3 %v4473_v28  ;;  %v4552_v28 = vld [vmem:[#allocation7 + $0x50] sm:$0xf] }
 0x13e   :  { %v1135_v32 = vadd.f32 %v1129_v17, %v1124_v39  ;;  %v5572_v17 = vld [vmem:[#allocation6 + $0x34] sm:$0xf]  ;;  %v4477_v39 = vor.u32 %v5588_v30, %v4474_v1  ;;  %v4616_v1 = vld [vmem:[#allocation7 + $0xd0] sm:$0xf] }
 0x13f   :  { %v4413_v29 = vor.u32 %v5572_v17, %v4410_v27  ;;  %v4565_v17 = vor.u32 %v5610_v24, %v4562_v25  ;;  %v4626_v27 = vld [vmem:[#allocation7 + $0xe8] sm:$0xf0]  ;;  %v5620_v24 = vld [vmem:[#allocation7 + $0xb4] sm:$0xf]  ;;  %v4602_v25 = vld [vmem:[#allocation7 + $0xb8] sm:$0xf0] }
 0x140   :  { %v1139_v8 = vmax.f32 %v1135_v32, 0.0  ;;  %v4400_v32 = vld [vmem:[#allocation6 + $0x20] sm:$0xf]  ;;  %1646 = vmatpush.bf16.msrb.mxu2 %v4477_v39  ;;  %v4629_v30 = vor.u32 %v5626_v26, %v4626_v27  ;;  %v5625_v39 = vld [vmem:[#allocation7 + $0xd4] sm:$0xf0]  ;;  %v4605_v26 = vor.u32 %v5620_v24, %v4602_v25 }
 0x141   :  { %1632 = vmatpush.bf16.msrb.mxu1 %v4413_v29  ;;  %v5609_v29 = vld [vmem:[#allocation7 + $0x54] sm:$0xf0]  ;;  %v4617_v31 = vor.u32 %v5625_v39, %v4616_v1  ;;  %v5603_v27 = vld [vmem:[#allocation7 + $0x24] sm:$0xf0]  ;;  %v5602_v1 = vld [vmem:[#allocation7 + $0x24] sm:$0xf] }
 0x142   :  { %v1141_v34 = vpack.c.bf16 %v1139_v8, %v1137_v33  ;;  %v5571_v33 = vld [vmem:[#allocation6 + $0x24] sm:$0xf0]  ;;  %v4464_v8 = vld [vmem:[#allocation6 + $0xa0] sm:$0xf]  ;;  %v4530_v39 = vld [vmem:[#allocation7 + $0x28] sm:$0xf0] }
 0x143   :  { %v4465_v40 = vor.u32 %v5587_v35, %v4464_v8  ;;  %v4554_v8 = vld [vmem:[#allocation7 + $0x58] sm:$0xf0]  ;;  %v4696_v24 = vld [vmem:[#allocation9 + $0x70] sm:$0xf]  ;;  %v5645_v25 = vld [vmem:[#allocation9 + $0x74] sm:$0xf0] }
 0x144   :  { %1362 = vmatmul.bf16.vlgmr.msra.gmra.mxu3 %v1141_v34  ;;  %1390 = vmatmul.bf16.vlgmr.msra.gmra.mxu2 %v1141_v34  ;;  %v4401_v34 = vor.u32 %v5571_v33, %v4400_v32  ;;  %v5608_v32 = vld [vmem:[#allocation7 + $0x54] sm:$0xf]  ;;  %v4553_v33 = vor.u32 %v5609_v29, %v4552_v28  ;;  %v4618_v35 = vld [vmem:[#allocation7 + $0xd8] sm:$0xf0]  ;;  %v4592_v28 = vld [vmem:[#allocation7 + $0xa0] sm:$0xf] }
 0x145   :  { %1619 = vmatpush.bf16.msrb.mxu3 %v4465_v40  ;;  %1633 = vmatpush.bf16.msrb.mxu1 %v4405_v42  ;;  %v4557_v38 = vor.u32 %v5608_v32, %v4554_v8  ;;  %v5618_v8 = vld [vmem:[#allocation7 + $0xa4] sm:$0xf] }
 0x146   :  { %1605 = vmatpush.bf16.msrb.mxu0 %v4401_v34  ;;  %1647 = vmatpush.bf16.msrb.mxu2 %v4469_v62  ;;  %v5624_v34 = vld [vmem:[#allocation7 + $0xd4] sm:$0xf] }
 0x147   :  { %v4621_v40 = vor.u32 %v5624_v34, %v4618_v35  ;;  %v4594_v34 = vld [vmem:[#allocation7 + $0xa8] sm:$0xf0] }
 0x148   :  { %v4597_v35 = vor.u32 %v5618_v8, %v4594_v34  ;;  %v4680_v8 = vld [vmem:[#allocation9 + $0x50] sm:$0xf]  ;;  %v5641_v34 = vld [vmem:[#allocation9 + $0x54] sm:$0xf0] }
 0x149   :  { %1620 = vmatpush.bf16.msrb.mxu3 %v4457_v51  ;;  %1634 = vmatpush.bf16.msrb.mxu1 %v4397_v52 }
 0x14a   :  { %1606 = vmatpush.bf16.msrb.mxu0 %v4393_v37  ;;  %1648 = vmatpush.bf16.msrb.mxu2 %v4461_v55 }
 0x14d   :  { %1621 = vmatpush.bf16.msrb.mxu3 %v4449_v41  ;;  %1635 = vmatpush.bf16.msrb.mxu1 %v4389_v61 }
 0x14e   :  { %1607 = vmatpush.bf16.msrb.mxu0 %v4385_v58  ;;  %1649 = vmatpush.bf16.msrb.mxu2 %v4453_v2  ;;  %v4545_v2 = vor.u32 %v5607_v0, %v4544_v63 }
 0x151   :  { %1874 = vmatpush.bf16.msra.mxu3 %v4633_v11  ;;  %1888 = vmatpush.bf16.msra.mxu1 %v4573_v12  ;;  %v4549_v11 = vor.u32 %v5606_v5, %v4546_v7  ;;  %v4613_v12 = vor.u32 %v5622_v9, %v4610_v10 }
 0x152   :  { %1860 = vmatpush.bf16.msra.mxu0 %v4569_v6  ;;  %1902 = vmatpush.bf16.msra.mxu2 %v4637_v16  ;;  %v4609_v6 = vor.u32 %v5623_v4, %v4608_v3  ;;  %v4537_v16 = vor.u32 %v5605_v14, %v4536_v13 }
 0x155   :  { %1875 = vmatpush.bf16.msra.mxu3 %v4625_v22  ;;  %1889 = vmatpush.bf16.msra.mxu1 %v4565_v17  ;;  %v4541_v22 = vor.u32 %v5604_v19, %v4538_v20  ;;  %v4528_v17 = vld [vmem:[#allocation7 + $0x20] sm:$0xf] }
 0x156   :  { %1861 = vmatpush.bf16.msra.mxu0 %v4561_v21  ;;  %1903 = vmatpush.bf16.msra.mxu2 %v4629_v30  ;;  %v4601_v21 = vor.u32 %v5621_v18, %v4600_v15  ;;  %v4529_v29 = vor.u32 %v5603_v27, %v4528_v17  ;;  %v5619_v30 = vld [vmem:[#allocation7 + $0xa4] sm:$0xf0]  ;;  %v4697_v17 = vor.u32 %v5645_v25, %v4696_v24  ;;  %v4698_v27 = vld [vmem:[#allocation9 + $0x78] sm:$0xf0] }
 0x157   :  { %v4593_v32 = vor.u32 %v5619_v30, %v4592_v28  ;;  %v5643_v30 = vld [vmem:[#allocation9 + $0x64] sm:$0xf0] }
 0x159   :  { %1876 = vmatpush.bf16.msra.mxu3 %v4617_v31  ;;  %1890 = vmatpush.bf16.msra.mxu1 %v4557_v38  ;;  %v4520_v31 = vld [vmem:[#allocation7 + $0x10] sm:$0xf]  ;;  %v5601_v38 = vld [vmem:[#allocation7 + $0x14] sm:$0xf0] }
 0x15a   :  { %1862 = vmatpush.bf16.msra.mxu0 %v4553_v33  ;;  %1904 = vmatpush.bf16.msra.mxu2 %v4621_v40  ;;  %v4533_v33 = vor.u32 %v5602_v1, %v4530_v39  ;;  %v4584_v40 = vld [vmem:[#allocation7 + $0x90] sm:$0xf]  ;;  %v5642_v1 = vld [vmem:[#allocation9 + $0x64] sm:$0xf] }
 0x15d   :  { %1877 = vmatpush.bf16.msra.mxu3 %v4609_v6  ;;  %1891 = vmatpush.bf16.msra.mxu1 %v4549_v11 }
 0x15e   :  { %1863 = vmatpush.bf16.msra.mxu0 %v4545_v2  ;;  %1905 = vmatpush.bf16.msra.mxu2 %v4613_v12 }
 0x161   :  { %1878 = vmatpush.bf16.msra.mxu3 %v4601_v21  ;;  %1892 = vmatpush.bf16.msra.mxu1 %v4541_v22 }
 0x162   :  { %1864 = vmatpush.bf16.msra.mxu0 %v4537_v16  ;;  %1906 = vmatpush.bf16.msra.mxu2 %v4605_v26  ;;  %v5644_v26 = vld [vmem:[#allocation9 + $0x74] sm:$0xf] }
 0x163   :  { %v4701_v28 = vor.u32 %v5644_v26, %v4698_v27  ;;  %v5676_v27 = vld [vmem:[#allocation10 + $0xf4] sm:$0xf] }
 0x165   :  { %1879 = vmatpush.bf16.msra.mxu3 %v4593_v32  ;;  %1893 = vmatpush.bf16.msra.mxu1 %v4533_v33  ;;  %v4690_v32 = vld [vmem:[#allocation9 + $0x68] sm:$0xf0] }
 0x166   :  { %1865 = vmatpush.bf16.msra.mxu0 %v4529_v29  ;;  %1907 = vmatpush.bf16.msra.mxu2 %v4597_v35  ;;  %v4688_v29 = vld [vmem:[#allocation9 + $0x60] sm:$0xf]  ;;  %v4693_v33 = vor.u32 %v5642_v1, %v4690_v32  ;;  %v5640_v35 = vld [vmem:[#allocation9 + $0x54] sm:$0xf] }
 0x167   :  { %v4689_v39 = vor.u32 %v5643_v30, %v4688_v29 }
 0x187   :  { %v1349_v42 = vpop.f32.mrf.mxu0  ;;  %v1377_v43 = vpop.f32.mrf.mxu1 }
 0x188   :  { %v1350_v49 = vadd.f32 %v1349_v42, %v1176_v46  ;;  %v1378_v50 = vadd.f32 %v1377_v43, %v1177_v47  ;;  %v4521_v42 = vor.u32 %v5601_v38, %v4520_v31  ;;  %v5617_v43 = vld [vmem:[#allocation7 + $0x94] sm:$0xf0]  ;;  %v4681_v31 = vor.u32 %v5641_v34, %v4680_v8  ;;  %v4682_v38 = vld [vmem:[#allocation9 + $0x58] sm:$0xf0]  ;;  %v5656_v34 = vld [vmem:[#allocation10 + $0x54] sm:$0xf] }
 0x189   :  { %v5657_v8 = vld [vmem:[#allocation10 + $0x54] sm:$0xf0] }
 0x18a   :  { %1866 = vmatpush.bf16.msra.mxu0 %v4521_v42  ;;  %v4672_v42 = vld [vmem:[#allocation9 + $0x40] sm:$0xf] }
 0x18f   :  { %v1351_v37 = vpop.f32.mrf.mxu0  ;;  %v1379_v48 = vpop.f32.mrf.mxu1 }
 0x190   :  { %v1352_v51 = vadd.f32 %v1351_v37, %v1176_v46  ;;  %v1380_v52 = vadd.f32 %v1379_v48, %v1177_v47  ;;  %v5616_v47 = vld [vmem:[#allocation7 + $0x94] sm:$0xf]  ;;  %v4586_v37 = vld [vmem:[#allocation7 + $0x98] sm:$0xf0] }
 0x191   :  { %v4589_v48 = vor.u32 %v5616_v47, %v4586_v37  ;;  %v4664_v47 = vld [vmem:[#allocation9 + $0x30] sm:$0xf]  ;;  %v5637_v37 = vld [vmem:[#allocation9 + $0x34] sm:$0xf0] }
 0x193   :  { %1908 = vmatpush.bf16.msra.mxu2 %v4589_v48  ;;  %v5636_v48 = vld [vmem:[#allocation9 + $0x34] sm:$0xf] }
 0x1c7   :  { %v1363_v62 = vpop.f32.mrf.mxu3  ;;  %v1391_v45 = vpop.f32.mrf.mxu2 }
 0x1c8   :  { %v1364_v53 = vadd.f32 %v1363_v62, %v1350_v49  ;;  %v1392_v54 = vadd.f32 %v1391_v45, %v1378_v50  ;;  %v4522_v62 = vld [vmem:[#allocation7 + $0x18] sm:$0xf0]  ;;  %v4585_v45 = vor.u32 %v5617_v43, %v4584_v40  ;;  %v4512_v49 = vld [vmem:[#allocation7] sm:$0xf]  ;;  %v5599_v50 = vld [vmem:[#allocation7 + $0x4] sm:$0xf0]  ;;  %v4685_v40 = vor.u32 %v5640_v35, %v4682_v38 }
 0x1c9   :  { %v4525_v46 = vor.u32 %v5600_v44, %v4522_v62  ;;  %v5639_v43 = vld [vmem:[#allocation9 + $0x44] sm:$0xf0]  ;;  %v5638_v44 = vld [vmem:[#allocation9 + $0x44] sm:$0xf]  ;;  %v4746_v38 = vld [vmem:[#allocation10 + $0x58] sm:$0xf0] }
 0x1ca   :  { %v1396_v58 = vmax.f32 %v1364_v53, 0.0  ;;  %v1397_v59 = vmax.f32 %v1392_v54, 0.0  ;;  %1880 = vmatpush.bf16.msra.mxu3 %v4585_v45  ;;  %v5615_v53 = vld [vmem:[#allocation7 + $0x84] sm:$0xf0]  ;;  %v5598_v54 = vld [vmem:[#allocation7 + $0x4] sm:$0xf]  ;;  %v4673_v62 = vor.u32 %v5639_v43, %v4672_v42 }
 0x1cb   :  { %1894 = vmatpush.bf16.msra.mxu1 %v4525_v46  ;;  %v4674_v45 = vld [vmem:[#allocation9 + $0x48] sm:$0xf0]  ;;  %v5675_v42 = vld [vmem:[#allocation10 + $0xe4] sm:$0xf0]  ;;  %v5674_v43 = vld [vmem:[#allocation10 + $0xe4] sm:$0xf] }
 0x1cc   :  { %v4677_v46 = vor.u32 %v5638_v44, %v4674_v45  ;;  %v4818_v44 = vld [vmem:[#allocation10 + $0xe8] sm:$0xf0] }
 0x1cf   :  { %v1365_v55 = vpop.f32.mrf.mxu3  ;;  %v1393_v56 = vpop.f32.mrf.mxu2 }
 0x1d0   :  { %v1366_v23 = vadd.f32 %v1365_v55, %v1352_v51  ;;  %v1394_v57 = vadd.f32 %v1393_v56, %v1380_v52  ;;  %v4576_v51 = vld [vmem:[#allocation7 + $0x80] sm:$0xf]  ;;  %v4513_v52 = vor.u32 %v5599_v50, %v4512_v49  ;;  %v4514_v55 = vld [vmem:[#allocation7 + $0x8] sm:$0xf0]  ;;  %v4665_v49 = vor.u32 %v5637_v37, %v4664_v47  ;;  %v4666_v50 = vld [vmem:[#allocation9 + $0x38] sm:$0xf0] }
 0x1d1   :  { %v4577_v56 = vor.u32 %v5615_v53, %v4576_v51  ;;  %v4669_v51 = vor.u32 %v5636_v48, %v4666_v50  ;;  %v5635_v53 = vld [vmem:[#allocation9 + $0x24] sm:$0xf0]  ;;  %v4821_v47 = vor.u32 %v5674_v43, %v4818_v44  ;;  %v4736_v37 = vld [vmem:[#allocation10 + $0x40] sm:$0xf]  ;;  %v5649_v43 = vld [vmem:[#allocation10 + $0x14] sm:$0xf0] }
 0x1d2   :  { %v1398_v60 = vmax.f32 %v1366_v23, 0.0  ;;  %v1399_v36 = vmax.f32 %v1394_v57, 0.0  ;;  %v4517_v23 = vor.u32 %v5598_v54, %v4514_v55  ;;  %v5614_v57 = vld [vmem:[#allocation7 + $0x84] sm:$0xf]  ;;  %1867 = vmatpush.bf16.msra.mxu0 %v4513_v52  ;;  %v4656_v52 = vld [vmem:[#allocation9 + $0x20] sm:$0xf] }
 0x1d3   :  { %1881 = vmatpush.bf16.msra.mxu3 %v4577_v56  ;;  %v5634_v54 = vld [vmem:[#allocation9 + $0x24] sm:$0xf]  ;;  %v4657_v55 = vor.u32 %v5635_v53, %v4656_v52  ;;  %v4658_v56 = vld [vmem:[#allocation9 + $0x28] sm:$0xf0]  ;;  %v5655_v48 = vld [vmem:[#allocation10 + $0x44] sm:$0xf0] }
 0x1d4   :  { %v1400_v41 = vpack.c.bf16 %v1398_v60, %v1396_v58  ;;  %v1401_v61 = vpack.c.bf16 %v1399_v36, %v1397_v59  ;;  %v4578_v58 = vld [vmem:[#allocation7 + $0x88] sm:$0xf0]  ;;  %1895 = vmatpush.bf16.msra.mxu1 %v4517_v23  ;;  %v4661_v23 = vor.u32 %v5634_v54, %v4658_v56  ;;  %v5654_v52 = vld [vmem:[#allocation10 + $0x44] sm:$0xf]  ;;  %v4808_v53 = vld [vmem:[#allocation10 + $0xd0] sm:$0xf] }
 0x1d5   :  { %v4581_v59 = vor.u32 %v5614_v57, %v4578_v58  ;;  %v4648_v57 = vld [vmem:[#allocation9 + $0x10] sm:$0xf]  ;;  %v5633_v58 = vld [vmem:[#allocation9 + $0x14] sm:$0xf0]  ;;  %v5672_v56 = vld [vmem:[#allocation10 + $0xd4] sm:$0xf] }
 0x1d6   :  { %1608 = vmatmul.bf16.vlgmr.msrb.gmra.mxu0 %v1400_v41  ;;  %1622 = vmatmul.bf16.vlgmr.msrb.gmra.mxu3 %v1401_v61  ;;  %v5673_v54 = vld [vmem:[#allocation10 + $0xd4] sm:$0xf0]  ;;  %v5648_v44 = vld [vmem:[#allocation10 + $0x14] sm:$0xf] }
 0x1d7   :  { %1636 = vmatmul.bf16.vlgmr.msrb.gmra.mxu1 %v1400_v41  ;;  %1650 = vmatmul.bf16.vlgmr.msrb.gmra.mxu2 %v1401_v61  ;;  %v1434_v41 = vld [vmem:[%s6815_s8] sm:$0x3] }
 0x1d8   :  { %1909 = vmatpush.bf16.msra.mxu2 %v4581_v59  ;;  %v1436_v63 = vperm.slane %v1434_v41, 0  ;;  %v1437_v2 = vperm.slane %v1434_v41, 1  ;;  %2031 = vmatpush.bf16.msrb.mxu0 %v4697_v17  ;;  %v5632_v59 = vld [vmem:[#allocation9 + $0x14] sm:$0xf]  ;;  %v5677_v17 = vld [vmem:[#allocation10 + $0xf4] sm:$0xf0] }
 0x1d9   :  { %2045 = vmatpush.bf16.msrb.mxu3 %v4701_v28  ;;  %v4826_v28 = vld [vmem:[#allocation10 + $0xf8] sm:$0xf0] }
 0x1da   :  { %v4829_v32 = vor.u32 %v5676_v27, %v4826_v28  ;;  %v4802_v27 = vld [vmem:[#allocation10 + $0xc8] sm:$0xf0] }
 0x1dc   :  { %2032 = vmatpush.bf16.msrb.mxu0 %v4689_v39 }
 0x1dd   :  { %2046 = vmatpush.bf16.msrb.mxu3 %v4693_v33  ;;  %v4744_v33 = vld [vmem:[#allocation10 + $0x50] sm:$0xf] }
 0x1de   :  { %v4745_v45 = vor.u32 %v5657_v8, %v4744_v33  ;;  %v4792_v8 = vld [vmem:[#allocation10 + $0xb0] sm:$0xf] }
 0x1e0   :  { %2033 = vmatpush.bf16.msrb.mxu0 %v4681_v31 }
 0x1e1   :  { %2047 = vmatpush.bf16.msrb.mxu3 %v4685_v40  ;;  %v4816_v40 = vld [vmem:[#allocation10 + $0xe0] sm:$0xf] }
 0x1e4   :  { %2034 = vmatpush.bf16.msrb.mxu0 %v4673_v62 }
 0x1e5   :  { %2048 = vmatpush.bf16.msrb.mxu3 %v4677_v46  ;;  %v4817_v46 = vor.u32 %v5675_v42, %v4816_v40  ;;  %v4712_v42 = vld [vmem:[#allocation10 + $0x10] sm:$0xf] }
 0x1e8   :  { %2035 = vmatpush.bf16.msrb.mxu0 %v4665_v49 }
 0x1e9   :  { %2049 = vmatpush.bf16.msrb.mxu3 %v4669_v51  ;;  %v4749_v51 = vor.u32 %v5656_v34, %v4746_v38  ;;  %v5669_v34 = vld [vmem:[#allocation10 + $0xb4] sm:$0xf0]  ;;  %v4794_v38 = vld [vmem:[#allocation10 + $0xb8] sm:$0xf0] }
 0x1ec   :  { %2036 = vmatpush.bf16.msrb.mxu0 %v4657_v55  ;;  %v4738_v55 = vld [vmem:[#allocation10 + $0x48] sm:$0xf0] }
 0x1ed   :  { %2050 = vmatpush.bf16.msrb.mxu3 %v4661_v23  ;;  %v4810_v23 = vld [vmem:[#allocation10 + $0xd8] sm:$0xf0] }
 0x253   :  { %v1609_v60 = vpop.f32.mrf.mxu0 }
 0x254   :  { %v1637_v36 = vpop.f32.mrf.mxu1  ;;  %v1610_v4 = vadd.f32 %v1609_v60, %v1436_v63  ;;  %v4649_v60 = vor.u32 %v5633_v58, %v4648_v57  ;;  %v4809_v57 = vor.u32 %v5673_v54, %v4808_v53  ;;  %v4813_v58 = vor.u32 %v5672_v56, %v4810_v23  ;;  %v5647_v53 = vld [vmem:[#allocation10 + $0x4] sm:$0xf0]  ;;  %v5646_v54 = vld [vmem:[#allocation10 + $0x4] sm:$0xf]  ;;  %v4706_v56 = vld [vmem:[#allocation10 + $0x8] sm:$0xf0] }
 0x255   :  { %v1638_v6 = vadd.f32 %v1637_v36, %v1437_v2  ;;  %v4650_v36 = vld [vmem:[#allocation9 + $0x18] sm:$0xf0]  ;;  %v4709_v23 = vor.u32 %v5646_v54, %v4706_v56  ;;  %v5704_v56 = vld [vmem:[#allocation12 + $0xd4] sm:$0xf] }
 0x256   :  { %v4653_v41 = vor.u32 %v5632_v59, %v4650_v36  ;;  %2037 = vmatpush.bf16.msrb.mxu0 %v4649_v60 }
 0x258   :  { %2051 = vmatpush.bf16.msrb.mxu3 %v4653_v41  ;;  %v4737_v41 = vor.u32 %v5655_v48, %v4736_v37  ;;  %v5667_v37 = vld [vmem:[#allocation10 + $0xa4] sm:$0xf0]  ;;  %v5666_v48 = vld [vmem:[#allocation10 + $0xa4] sm:$0xf] }
 0x259   :  { %v1623_v61 = vpop.f32.mrf.mxu3 }
 0x25a   :  { %v1651_v0 = vpop.f32.mrf.mxu2  ;;  %v1624_v7 = vadd.f32 %v1623_v61, %v1610_v4  ;;  %v4640_v61 = vld [vmem:[#allocation9] sm:$0xf]  ;;  %v6552_v4 = vld [vmem:[%s6817_s10] sm:$0x3] }
 0x25b   :  { %v1611_v3 = vpop.f32.mrf.mxu0  ;;  %v1652_v10 = vadd.f32 %v1651_v0, %v1638_v6  ;;  %v5630_v0 = vld [vmem:[#allocation9 + $0x4] sm:$0xf] }
 0x25c   :  { %v1639_v5 = vpop.f32.mrf.mxu1  ;;  %v1612_v9 = vadd.f32 %v1611_v3, %v1436_v63  ;;  %v1656_v16 = vmax.f32 %v1624_v7, 0.0  ;;  %v5631_v63 = vld [vmem:[#allocation9 + $0x4] sm:$0xf0]  ;;  %v4642_v3 = vld [vmem:[#allocation9 + $0x8] sm:$0xf0] }
 0x25d   :  { %v1640_v11 = vadd.f32 %v1639_v5, %v1437_v2  ;;  %v1657_v19 = vmax.f32 %v1652_v10, 0.0  ;;  %v4641_v2 = vor.u32 %v5631_v63, %v4640_v61  ;;  %v4645_v5 = vor.u32 %v5630_v0, %v4642_v3 }
 0x25e   :  { %v1697_v10 = vperm.slane %v6552_v4, 1  ;;  %v4741_v0 = vor.u32 %v5654_v52, %v4738_v55  ;;  %v4704_v52 = vld [vmem:[#allocation10] sm:$0xf] }
 0x25f   :  { %2038 = vmatpush.bf16.msrb.mxu0 %v4641_v2  ;;  %2052 = vmatpush.bf16.msrb.mxu3 %v4645_v5  ;;  %v4705_v55 = vor.u32 %v5647_v53, %v4704_v52  ;;  %v5688_v52 = vld [vmem:[#allocation12 + $0x54] sm:$0xf]  ;;  %v4874_v53 = vld [vmem:[#allocation12 + $0x58] sm:$0xf0] }
 0x261   :  { %v1625_v12 = vpop.f32.mrf.mxu3 }
 0x262   :  { %v1626_v13 = vadd.f32 %v1625_v12, %v1612_v9  ;;  %v1653_v14 = vpop.f32.mrf.mxu2  ;;  %v1696_v9 = vperm.slane %v6552_v4, 0  ;;  %v5661_v12 = vld [vmem:[#allocation10 + $0x74] sm:$0xf0] }
 0x263   :  { %v1654_v15 = vadd.f32 %v1653_v14, %v1640_v11  ;;  %v4760_v11 = vld [vmem:[#allocation10 + $0x70] sm:$0xf] }
 0x264   :  { %v1658_v18 = vmax.f32 %v1626_v13, 0.0  ;;  %v5660_v13 = vld [vmem:[#allocation10 + $0x74] sm:$0xf]  ;;  %v4761_v14 = vor.u32 %v5661_v12, %v4760_v11  ;;  %v5895_v11 = vld [vmem:[%s6837_s4 + $0x8] sm:$0xff] }
 0x265   :  { %v1659_v20 = vmax.f32 %v1654_v15, 0.0  ;;  %v4762_v15 = vld [vmem:[#allocation10 + $0x78] sm:$0xf0] }
 0x266   :  { %v1660_v21 = vpack.c.bf16 %v1658_v18, %v1656_v16  ;;  %v4752_v16 = vld [vmem:[#allocation10 + $0x60] sm:$0xf]  ;;  %v5659_v18 = vld [vmem:[#allocation10 + $0x64] sm:$0xf0]  ;;  %2263 = vmatpush.bf16.msrb.mxu1 %v4761_v14 }
 0x267   :  { %v1661_v22 = vpack.c.bf16 %v1659_v20, %v1657_v19  ;;  %v4765_v19 = vor.u32 %v5660_v13, %v4762_v15  ;;  %v5658_v20 = vld [vmem:[#allocation10 + $0x64] sm:$0xf]  ;;  %v4753_v26 = vor.u32 %v5659_v18, %v4752_v16  ;;  %v4728_v16 = vld [vmem:[#allocation10 + $0x30] sm:$0xf]  ;;  %v5653_v18 = vld [vmem:[#allocation10 + $0x34] sm:$0xf0] }
 0x268   :  { %1868 = vmatmul.bf16.vlgmr.msra.gmra.mxu0 %v1660_v21  ;;  %1896 = vmatmul.bf16.vlgmr.msra.gmra.mxu1 %v1660_v21  ;;  %v4754_v21 = vld [vmem:[#allocation10 + $0x68] sm:$0xf0] }
 0x269   :  { %1882 = vmatmul.bf16.vlgmr.msra.gmra.mxu3 %v1661_v22  ;;  %1910 = vmatmul.bf16.vlgmr.msra.gmra.mxu2 %v1661_v22  ;;  %v4824_v22 = vld [vmem:[#allocation10 + $0xf0] sm:$0xf]  ;;  %v4757_v1 = vor.u32 %v5658_v20, %v4754_v21  ;;  %v4729_v20 = vor.u32 %v5653_v18, %v4728_v16  ;;  %v4730_v21 = vld [vmem:[#allocation10 + $0x38] sm:$0xf0] }
 0x26a   :  { %2291 = vmatpush.bf16.msra.mxu0 %v4765_v19  ;;  %v4825_v39 = vor.u32 %v5677_v17, %v4824_v22  ;;  %2305 = vmatpush.bf16.msra.mxu3 %v4829_v32  ;;  %v5652_v19 = vld [vmem:[#allocation10 + $0x34] sm:$0xf]  ;;  %v4722_v32 = vld [vmem:[#allocation10 + $0x28] sm:$0xf0]  ;;  %v4954_v16 = vld [vmem:[#allocation12 + $0xf8] sm:$0xf0] }
 0x26b   :  { %2264 = vmatpush.bf16.msrb.mxu1 %v4753_v26  ;;  %v4733_v22 = vor.u32 %v5652_v19, %v4730_v21  ;;  %v5670_v26 = vld [vmem:[#allocation10 + $0xc4] sm:$0xf]  ;;  %v1945_v19 = vld [vmem:[%s6819_s12] sm:$0x3] }
 0x26c   :  { %2277 = vmatpush.bf16.msrb.mxu2 %v4825_v39  ;;  %v4805_v28 = vor.u32 %v5670_v26, %v4802_v27  ;;  %v1947_v21 = vperm.slane %v1945_v19, 0  ;;  %v1948_v26 = vperm.slane %v1945_v19, 1 }
 0x26e   :  { %2292 = vmatpush.bf16.msra.mxu0 %v4757_v1  ;;  %2306 = vmatpush.bf16.msra.mxu3 %v4821_v47  ;;  %v5650_v1 = vld [vmem:[#allocation10 + $0x24] sm:$0xf]  ;;  %v4784_v47 = vld [vmem:[#allocation10 + $0xa0] sm:$0xf] }
 0x26f   :  { %2265 = vmatpush.bf16.msrb.mxu1 %v4745_v45  ;;  %v4725_v33 = vor.u32 %v5650_v1, %v4722_v32  ;;  %v4714_v45 = vld [vmem:[#allocation10 + $0x18] sm:$0xf0] }
 0x270   :  { %2278 = vmatpush.bf16.msrb.mxu2 %v4817_v46  ;;  %v4717_v46 = vor.u32 %v5648_v44, %v4714_v45  ;;  %v5706_v45 = vld [vmem:[#allocation12 + $0xe4] sm:$0xf] }
 0x272   :  { %2293 = vmatpush.bf16.msra.mxu0 %v4749_v51  ;;  %2307 = vmatpush.bf16.msra.mxu3 %v4813_v58  ;;  %v5665_v58 = vld [vmem:[#allocation10 + $0x94] sm:$0xf0] }
 0x273   :  { %2266 = vmatpush.bf16.msrb.mxu1 %v4737_v41 }
 0x274   :  { %2279 = vmatpush.bf16.msrb.mxu2 %v4809_v57  ;;  %v4776_v57 = vld [vmem:[#allocation10 + $0x90] sm:$0xf] }
 0x276   :  { %2294 = vmatpush.bf16.msra.mxu0 %v4741_v0  ;;  %2308 = vmatpush.bf16.msra.mxu3 %v4805_v28  ;;  %v5662_v0 = vld [vmem:[#allocation10 + $0x84] sm:$0xf] }
 0x277   :  { %2267 = vmatpush.bf16.msrb.mxu1 %v4729_v20 }
 0x27a   :  { %2295 = vmatpush.bf16.msra.mxu0 %v4733_v22 }
 0x27e   :  { %2296 = vmatpush.bf16.msra.mxu0 %v4725_v33 }
 0x282   :  { %2297 = vmatpush.bf16.msra.mxu0 %v4717_v46  ;;  %v4946_v46 = vld [vmem:[#allocation12 + $0xe8] sm:$0xf0] }
 0x286   :  { %2298 = vmatpush.bf16.msra.mxu0 %v4709_v23  ;;  %v4938_v23 = vld [vmem:[#allocation12 + $0xd8] sm:$0xf0] }
 0x2e5   :  { %v1869_v6 = vpop.f32.mrf.mxu0  ;;  %v1897_v7 = vpop.f32.mrf.mxu1 }
 0x2e6   :  { %v1870_v24 = vadd.f32 %v1869_v6, %v1696_v9  ;;  %v1898_v25 = vadd.f32 %v1897_v7, %v1697_v10  ;;  %v5894_v7 = vld [vmem:[%s6837_s4] sm:$0xff] }
 0x2ec   :  { %v1883_v29 = vpop.f32.mrf.mxu3  ;;  %v1911_v30 = vpop.f32.mrf.mxu2 }
 0x2ed   :  { %v1884_v35 = vadd.f32 %v1883_v29, %v1870_v24  ;;  %v1912_v31 = vadd.f32 %v1911_v30, %v1898_v25  ;;  %v1871_v49 = vpop.f32.mrf.mxu0  ;;  %v1899_v50 = vpop.f32.mrf.mxu1  ;;  %v4800_v24 = vld [vmem:[#allocation10 + $0xc0] sm:$0xf]  ;;  %v5671_v25 = vld [vmem:[#allocation10 + $0xc4] sm:$0xf0] }
 0x2ee   :  { %v1872_v60 = vadd.f32 %v1871_v49, %v1696_v9  ;;  %v1900_v36 = vadd.f32 %v1899_v50, %v1697_v10  ;;  %v4801_v17 = vor.u32 %v5671_v25, %v4800_v24  ;;  %v4720_v29 = vld [vmem:[#allocation10 + $0x20] sm:$0xf]  ;;  %v5651_v30 = vld [vmem:[#allocation10 + $0x24] sm:$0xf0]  ;;  %v4785_v49 = vor.u32 %v5667_v37, %v4784_v47  ;;  %v4786_v50 = vld [vmem:[#allocation10 + $0xa8] sm:$0xf0] }
 0x2ef   :  { %1916 = vst [vmem:[%s6827_s20] sm:$0xff] %v1884_v35  ;;  %v1918_v62 = vmul.f32 0.5, %v1912_v31  ;;  %v4721_v39 = vor.u32 %v5651_v30, %v4720_v29  ;;  %v5668_v31 = vld [vmem:[#allocation10 + $0xb4] sm:$0xf]  ;;  %v4789_v51 = vor.u32 %v5666_v48, %v4786_v50  ;;  %v4949_v47 = vor.u32 %v5706_v45, %v4946_v46  ;;  %v4872_v37 = vld [vmem:[#allocation12 + $0x50] sm:$0xf] }
 0x2f0   :  { %2280 = vmatpush.bf16.msrb.mxu2 %v4801_v17  ;;  %v4797_v40 = vor.u32 %v5668_v31, %v4794_v38  ;;  %v4944_v31 = vld [vmem:[#allocation12 + $0xe0] sm:$0xf]  ;;  %v5689_v48 = vld [vmem:[#allocation12 + $0x54] sm:$0xf0]  ;;  %v5679_v45 = vld [vmem:[#allocation12 + $0x4] sm:$0xf0] }
 0x2f1   :  { %v1920_v59 = vmul.f32 1.442695, %v1918_v62  ;;  %2268 = vmatpush.bf16.msrb.mxu1 %v4721_v39  ;;  %v4713_v62 = vor.u32 %v5649_v43, %v4712_v42  ;;  %v5690_v42 = vld [vmem:[#allocation12 + $0x64] sm:$0xf]  ;;  %v4882_v43 = vld [vmem:[#allocation12 + $0x68] sm:$0xf0]  ;;  %v4873_v50 = vor.u32 %v5689_v48, %v4872_v37 }
 0x2f2   :  { %2309 = vmatpush.bf16.msra.mxu3 %v4797_v40  ;;  %v5707_v40 = vld [vmem:[#allocation12 + $0xe4] sm:$0xf0]  ;;  %v4896_v46 = vld [vmem:[#allocation12 + $0x80] sm:$0xf]  ;;  %v5678_v48 = vld [vmem:[#allocation12 + $0x4] sm:$0xf] }
 0x2f3   :  { %5834 = vpow2.f32 %v1920_v59  ;;  %v5664_v59 = vld [vmem:[#allocation10 + $0x94] sm:$0xf]  ;;  %v4945_v44 = vor.u32 %v5707_v40, %v4944_v31  ;;  %v4842_v31 = vld [vmem:[#allocation12 + $0x18] sm:$0xf0]  ;;  %v5695_v37 = vld [vmem:[#allocation12 + $0x84] sm:$0xf0] }
 0x2f4   :  { %v1885_v61 = vpop.f32.mrf.mxu3  ;;  %v1913_v63 = vpop.f32.mrf.mxu2 }
 0x2f5   :  { %v1886_v2 = vadd.f32 %v1885_v61, %v1872_v60  ;;  %v1914_v3 = vadd.f32 %v1913_v63, %v1900_v36  ;;  %2269 = vmatpush.bf16.msrb.mxu1 %v4713_v62  ;;  %v4777_v60 = vor.u32 %v5665_v58, %v4776_v57  ;;  %v4778_v36 = vld [vmem:[#allocation10 + $0x98] sm:$0xf0]  ;;  %v4768_v61 = vld [vmem:[#allocation10 + $0x80] sm:$0xf]  ;;  %v5663_v63 = vld [vmem:[#allocation10 + $0x84] sm:$0xf0]  ;;  %v4885_v62 = vor.u32 %v5690_v42, %v4882_v43 }
 0x2f6   :  { %2310 = vmatpush.bf16.msra.mxu3 %v4789_v51  ;;  %v4781_v41 = vor.u32 %v5664_v59, %v4778_v36  ;;  %v5705_v51 = vld [vmem:[#allocation12 + $0xd4] sm:$0xf0]  ;;  %v4941_v57 = vor.u32 %v5704_v56, %v4938_v23  ;;  %v4864_v58 = vld [vmem:[#allocation12 + $0x40] sm:$0xf]  ;;  %v5687_v59 = vld [vmem:[#allocation12 + $0x44] sm:$0xf0] }
 0x2f7   :  { %1917 = vst [vmem:[%s6827_s20 + $0x8] sm:$0xff] %v1886_v2  ;;  %v1919_v4 = vmul.f32 0.5, %v1914_v3  ;;  %v4770_v3 = vld [vmem:[#allocation10 + $0x88] sm:$0xf0]  ;;  %v4865_v36 = vor.u32 %v5687_v59, %v4864_v58  ;;  %v5696_v42 = vld [vmem:[#allocation12 + $0x94] sm:$0xf] }
 0x2f8   :  { %v4906_v43 = vld [vmem:[#allocation12 + $0x98] sm:$0xf0]  ;;  %v5762_v56 = vld [vmem:[#allocation13 + $0x1a0] sm:$0xf0]  ;;  %v5380_v23 = vld [vmem:[#allocation13 + $0x348] sm:$0xf] }
 0x2f9   :  { %v1922_v5 = vmul.f32 1.442695, %v1919_v4  ;;  %v5835_v6 = vpop.eup %5834  ;;  %2270 = vmatpush.bf16.msrb.mxu1 %v4705_v55  ;;  %v4773_v4 = vor.u32 %v5662_v0, %v4770_v3  ;;  %v4877_v55 = vor.u32 %v5688_v52, %v4874_v53  ;;  %v5702_v3 = vld [vmem:[#allocation12 + $0xc4] sm:$0xf]  ;;  %v4898_v53 = vld [vmem:[#allocation12 + $0x88] sm:$0xf0] }
 0x2fa   :  { %v1924_v9 = vmul.f32 %v5894_v7, %v5835_v6  ;;  %2311 = vmatpush.bf16.msra.mxu3 %v4781_v41  ;;  %v5693_v6 = vld [vmem:[#allocation12 + $0x74] sm:$0xf0]  ;;  %v4952_v7 = vld [vmem:[#allocation12 + $0xf0] sm:$0xf]  ;;  %v5703_v41 = vld [vmem:[#allocation12 + $0xc4] sm:$0xf0] }
 0x2fb   :  { %5836 = vpow2.f32 %v1922_v5  ;;  %v4888_v5 = vld [vmem:[#allocation12 + $0x70] sm:$0xf]  ;;  %v5694_v52 = vld [vmem:[#allocation12 + $0x84] sm:$0xf]  ;;  %v5759_v59 = vld [vmem:[#allocation13 + $0x18c] sm:$0xf] }
 0x2fc   :  { %v1926_v13 = vadd.f32 %v1924_v9, %v1884_v35  ;;  %v4793_v35 = vor.u32 %v5669_v34, %v4792_v8  ;;  %v4889_v9 = vor.u32 %v5693_v6, %v4888_v5  ;;  %v4880_v34 = vld [vmem:[#allocation12 + $0x60] sm:$0xf]  ;;  %v4856_v6 = vld [vmem:[#allocation12 + $0x30] sm:$0xf]  ;;  %v5818_v58 = vld [vmem:[#allocation13 + $0x360] sm:$0xf0] }
 0x2fe   :  { %2281 = vmatpush.bf16.msrb.mxu2 %v4793_v35  ;;  %2312 = vmatpush.bf16.msra.mxu3 %v4773_v4  ;;  %v5691_v35 = vld [vmem:[#allocation12 + $0x64] sm:$0xf0]  ;;  %v4930_v4 = vld [vmem:[#allocation12 + $0xc8] sm:$0xf0] }
 0x2ff   :  { %2523 = vmatpush.bf16.msra.mxu1 %v4889_v9  ;;  %v4881_v38 = vor.u32 %v5691_v35, %v4880_v34  ;;  %v4933_v5 = vor.u32 %v5702_v3, %v4930_v4  ;;  %v4920_v9 = vld [vmem:[#allocation12 + $0xb0] sm:$0xf]  ;;  %v5697_v34 = vld [vmem:[#allocation12 + $0x94] sm:$0xf0]  ;;  %v5680_v35 = vld [vmem:[#allocation12 + $0x14] sm:$0xf] }
 0x300   :  { %v4845_v40 = vor.u32 %v5680_v35, %v4842_v31  ;;  %v5755_v3 = vld [vmem:[#allocation13 + $0x168] sm:$0xf0]  ;;  %v5352_v4 = vld [vmem:[#allocation13 + $0x310] sm:$0xf]  ;;  %v5298_v35 = vld [vmem:[#allocation13 + $0x2bc] sm:$0xf0] }
 0x301   :  { %v5837_v10 = vpop.eup %5836  ;;  %v2097_v31 = vld [vmem:[%s6821_s14] sm:$0x3] }
 0x302   :  { %v1925_v12 = vmul.f32 %v5895_v11, %v5837_v10  ;;  %2282 = vmatpush.bf16.msrb.mxu2 %v4785_v49  ;;  %v5709_v10 = vld [vmem:[#allocation12 + $0xf4] sm:$0xf0]  ;;  %v5692_v11 = vld [vmem:[#allocation12 + $0x74] sm:$0xf]  ;;  %v4936_v49 = vld [vmem:[#allocation12 + $0xd0] sm:$0xf] }
 0x303   :  { %2524 = vmatpush.bf16.msra.mxu1 %v4881_v38  ;;  %v4937_v54 = vor.u32 %v5705_v51, %v4936_v49  ;;  %v4834_v49 = vld [vmem:[#allocation12 + $0x8] sm:$0xf0] }
 0x304   :  { %v1927_v14 = vadd.f32 %v1925_v12, %v1886_v2  ;;  %v4769_v2 = vor.u32 %v5663_v63, %v4768_v61  ;;  %v4890_v12 = vld [vmem:[#allocation12 + $0x78] sm:$0xf0]  ;;  %v5686_v61 = vld [vmem:[#allocation12 + $0x44] sm:$0xf]  ;;  %v4866_v63 = vld [vmem:[#allocation12 + $0x48] sm:$0xf0]  ;;  %v4837_v51 = vor.u32 %v5678_v48, %v4834_v49 }
 0x305   :  { %v2099_v48 = vperm.slane %v2097_v31, 0  ;;  %v2100_v49 = vperm.slane %v2097_v31, 1  ;;  %v4962_v31 = vld [vmem:[#allocation13 + $0x1c] sm:$0xf0] }
 0x306   :  { %v1928_v15 = vpack.c.bf16 %v1927_v14, %v1926_v13  ;;  %2283 = vmatpush.bf16.msrb.mxu2 %v4777_v60  ;;  %v4953_v13 = vor.u32 %v5709_v10, %v4952_v7  ;;  %v4893_v14 = vor.u32 %v5692_v11, %v4890_v12  ;;  %v4928_v60 = vld [vmem:[#allocation12 + $0xc0] sm:$0xf]  ;;  %v5685_v7 = vld [vmem:[#allocation12 + $0x34] sm:$0xf0]  ;;  %v5684_v12 = vld [vmem:[#allocation12 + $0x34] sm:$0xf] }
 0x307   :  { %2525 = vmatpush.bf16.msra.mxu1 %v4873_v50  ;;  %v4929_v0 = vor.u32 %v5703_v41, %v4928_v60  ;;  %v4857_v10 = vor.u32 %v5685_v7, %v4856_v6  ;;  %v5701_v11 = vld [vmem:[#allocation12 + $0xb4] sm:$0xf0]  ;;  %v4897_v50 = vor.u32 %v5695_v37, %v4896_v46  ;;  %v5158_v60 = vld [vmem:[#allocation13 + $0x1a4] sm:$0xf0]  ;;  %v5790_v46 = vld [vmem:[#allocation13 + $0x280] sm:$0xf0] }
 0x308   :  { %2039 = vmatmul.bf16.vlgmr.msrb.gmra.mxu0 %v1928_v15  ;;  %2053 = vmatmul.bf16.vlgmr.msrb.gmra.mxu3 %v1928_v15  ;;  %v5708_v15 = vld [vmem:[#allocation12 + $0xf4] sm:$0xf]  ;;  %v5161_v41 = vor.u32 %v5759_v59, %v5158_v60  ;;  %v5046_v37 = vld [vmem:[#allocation13 + $0xc4] sm:$0xf0]  ;;  %v5783_v59 = vld [vmem:[#allocation13 + $0x248] sm:$0xf0] }
 0x309   :  { %v4957_v18 = vor.u32 %v5708_v15, %v4954_v16  ;;  %2551 = vmatpush.bf16.msrb.mxu0 %v4893_v14  ;;  %v4921_v14 = vor.u32 %v5701_v11, %v4920_v9  ;;  %v5700_v16 = vld [vmem:[#allocation12 + $0xb4] sm:$0xf] }
 0x30a   :  { %2284 = vmatpush.bf16.msrb.mxu2 %v4769_v2  ;;  %v4869_v2 = vor.u32 %v5686_v61, %v4866_v63  ;;  %v5815_v61 = vld [vmem:[#allocation13 + $0x34c] sm:$0xf]  ;;  %v5382_v63 = vld [vmem:[#allocation13 + $0x364] sm:$0xf0]  ;;  %v5752_v9 = vld [vmem:[#allocation13 + $0x154] sm:$0xf] }
 0x30b   :  { %2565 = vmatpush.bf16.msrb.mxu3 %v4957_v18  ;;  %2526 = vmatpush.bf16.msra.mxu1 %v4865_v36  ;;  %v4922_v18 = vld [vmem:[#allocation12 + $0xb8] sm:$0xf0]  ;;  %v5381_v36 = vor.u32 %v5818_v58, %v5380_v23  ;;  %v5808_v11 = vld [vmem:[#allocation13 + $0x314] sm:$0xf]  ;;  %v5240_v58 = vld [vmem:[#allocation13 + $0x230] sm:$0xf] }
 0x30c   :  { %v4925_v19 = vor.u32 %v5700_v16, %v4922_v18  ;;  %v5324_v18 = vld [vmem:[#allocation13 + $0x2d8] sm:$0xf] }
 0x30d   :  { %2552 = vmatpush.bf16.msrb.mxu0 %v4885_v62  ;;  %v4832_v62 = vld [vmem:[#allocation12] sm:$0xf] }
 0x30e   :  { %2537 = vmatpush.bf16.msra.mxu2 %v4953_v13  ;;  %v4858_v13 = vld [vmem:[#allocation12 + $0x38] sm:$0xf0] }
 0x30f   :  { %2566 = vmatpush.bf16.msrb.mxu3 %v4949_v47  ;;  %v4861_v15 = vor.u32 %v5684_v12, %v4858_v13  ;;  %2527 = vmatpush.bf16.msra.mxu1 %v4857_v10  ;;  %v4833_v47 = vor.u32 %v5679_v45, %v4832_v62  ;;  %v5130_v10 = vld [vmem:[#allocation13 + $0x16c] sm:$0xf0]  ;;  %v5268_v62 = vld [vmem:[#allocation13 + $0x268] sm:$0xf] }
 0x310   :  { %v5133_v12 = vor.u32 %v5752_v9, %v5130_v10  ;;  %v5354_v13 = vld [vmem:[#allocation13 + $0x32c] sm:$0xf0] }
 0x311   :  { %2553 = vmatpush.bf16.msrb.mxu0 %v4877_v55  ;;  %v5156_v55 = vld [vmem:[#allocation13 + $0x188] sm:$0xf]  ;;  %v5357_v16 = vor.u32 %v5808_v11, %v5354_v13  ;;  %v4988_v11 = vld [vmem:[#allocation13 + $0x38] sm:$0xf] }
 0x312   :  { %2538 = vmatpush.bf16.msra.mxu2 %v4945_v44  ;;  %v4909_v44 = vor.u32 %v5696_v42, %v4906_v43  ;;  %v5044_v43 = vld [vmem:[#allocation13 + $0xa8] sm:$0xf]  ;;  %v5212_v13 = vld [vmem:[#allocation13 + $0x1f8] sm:$0xf] }
 0x313   :  { %2567 = vmatpush.bf16.msrb.mxu3 %v4941_v57  ;;  %v5157_v57 = vor.u32 %v5762_v56, %v5156_v55  ;;  %v5269_v56 = vor.u32 %v5790_v46, %v5268_v62  ;;  %v5763_v62 = vld [vmem:[#allocation13 + $0x1a8] sm:$0xf0] }
 0x314   :  { %v5819_v46 = vld [vmem:[#allocation13 + $0x368] sm:$0xf0] }
 0x315   :  { %2554 = vmatpush.bf16.msrb.mxu0 %v4869_v2  ;;  %v5385_v2 = vor.u32 %v5815_v61, %v5382_v63 }
 0x316   :  { %2539 = vmatpush.bf16.msra.mxu2 %v4937_v54  ;;  %v4901_v54 = vor.u32 %v5694_v52, %v4898_v53  ;;  %v5016_v53 = vld [vmem:[#allocation13 + $0x70] sm:$0xf] }
 0x317   :  { %2568 = vmatpush.bf16.msrb.mxu3 %v4933_v5  ;;  %v5811_v5 = vld [vmem:[#allocation13 + $0x328] sm:$0xf0] }
 0x318   :  { %v5353_v7 = vor.u32 %v5811_v5, %v5352_v4  ;;  %v5241_v4 = vor.u32 %v5783_v59, %v5240_v58  ;;  %v5756_v58 = vld [vmem:[#allocation13 + $0x170] sm:$0xf0] }
 0x319   :  { %2555 = vmatpush.bf16.msrb.mxu0 %v4861_v15  ;;  %v5748_v15 = vld [vmem:[#allocation13 + $0x130] sm:$0xf0] }
 0x31a   :  { %2540 = vmatpush.bf16.msra.mxu2 %v4929_v0  ;;  %v5128_v0 = vld [vmem:[#allocation13 + $0x150] sm:$0xf] }
 0x31b   :  { %2569 = vmatpush.bf16.msrb.mxu3 %v4925_v19  ;;  %v5129_v6 = vor.u32 %v5755_v3, %v5128_v0  ;;  %v5804_v19 = vld [vmem:[#allocation13 + $0x2f0] sm:$0xf0] }
 0x31c   :  { %v5780_v0 = vld [vmem:[#allocation13 + $0x234] sm:$0xf] }
 0x31e   :  { %2541 = vmatpush.bf16.msra.mxu2 %v4921_v14  ;;  %v5100_v14 = vld [vmem:[#allocation13 + $0x118] sm:$0xf] }
 0x385   :  { %v2040_v20 = vpop.f32.mrf.mxu0 }
 0x386   :  { %v2041_v24 = vadd.f32 %v2040_v20, %v1947_v21  ;;  %v4848_v20 = vld [vmem:[#allocation12 + $0x20] sm:$0xf] }
 0x388   :  { %v2059_v27 = vmax.f32 %v2041_v24, 0.0 }
 0x38b   :  { %v2054_v22 = vpop.f32.mrf.mxu3 }
 0x38c   :  { %v2055_v29 = vadd.f32 %v2054_v22, %v1948_v26  ;;  %v4912_v22 = vld [vmem:[#allocation12 + $0xa0] sm:$0xf] }
 0x38d   :  { %v2042_v25 = vpop.f32.mrf.mxu0 }
 0x38e   :  { %v2043_v17 = vadd.f32 %v2042_v25, %v1947_v21  ;;  %v2060_v32 = vmax.f32 %v2055_v29, 0.0  ;;  %v5683_v21 = vld [vmem:[#allocation12 + $0x24] sm:$0xf0]  ;;  %v5698_v29 = vld [vmem:[#allocation12 + $0xa4] sm:$0xf] }
 0x38f   :  { %v4849_v24 = vor.u32 %v5683_v21, %v4848_v20  ;;  %v5699_v25 = vld [vmem:[#allocation12 + $0xa4] sm:$0xf0]  ;;  %v5745_v20 = vld [vmem:[#allocation13 + $0x11c] sm:$0xf]  ;;  %v5101_v21 = vor.u32 %v5748_v15, %v5100_v14  ;;  %v5776_v15 = vld [vmem:[#allocation13 + $0x210] sm:$0xf0] }
 0x390   :  { %v2061_v28 = vmax.f32 %v2043_v17, 0.0  ;;  %v4850_v17 = vld [vmem:[#allocation12 + $0x28] sm:$0xf0] }
 0x391   :  { %2528 = vmatpush.bf16.msra.mxu1 %v4849_v24  ;;  %v5801_v24 = vld [vmem:[#allocation13 + $0x2dc] sm:$0xf] }
 0x392   :  { %v2063_v30 = vpack.c.bf16 %v2061_v28, %v2059_v27  ;;  %v4913_v27 = vor.u32 %v5699_v25, %v4912_v22  ;;  %v5102_v22 = vld [vmem:[#allocation13 + $0x134] sm:$0xf0] }
 0x393   :  { %v2056_v1 = vpop.f32.mrf.mxu3  ;;  %v5326_v25 = vld [vmem:[#allocation13 + $0x2f4] sm:$0xf0] }
 0x394   :  { %v2057_v39 = vadd.f32 %v2056_v1, %v1948_v26  ;;  %2271 = vmatmul.bf16.vlgmr.msrb.gmra.mxu1 %v2063_v30  ;;  %2299 = vmatmul.bf16.vlgmr.msra.gmra.mxu0 %v2063_v30  ;;  %v5682_v26 = vld [vmem:[#allocation12 + $0x24] sm:$0xf]  ;;  %v4914_v30 = vld [vmem:[#allocation12 + $0xa8] sm:$0xf0] }
 0x395   :  { %v4853_v28 = vor.u32 %v5682_v26, %v4850_v17  ;;  %v4917_v1 = vor.u32 %v5698_v29, %v4914_v30  ;;  %2542 = vmatpush.bf16.msra.mxu2 %v4913_v27  ;;  %v5325_v26 = vor.u32 %v5804_v19, %v5324_v18  ;;  %v5105_v17 = vor.u32 %v5745_v20, %v5102_v22  ;;  %v5072_v27 = vld [vmem:[#allocation13 + $0xe0] sm:$0xf]  ;;  %v4990_v18 = vld [vmem:[#allocation13 + $0x54] sm:$0xf0]  ;;  %v5773_v19 = vld [vmem:[#allocation13 + $0x1fc] sm:$0xf] }
 0x396   :  { %v2062_v33 = vmax.f32 %v2057_v39, 0.0  ;;  %v4840_v39 = vld [vmem:[#allocation12 + $0x10] sm:$0xf]  ;;  %v5296_v29 = vld [vmem:[#allocation13 + $0x2a0] sm:$0xf]  ;;  %v5329_v30 = vor.u32 %v5801_v24, %v5326_v25 }
 0x397   :  { %2556 = vmatpush.bf16.msrb.mxu0 %v4853_v28  ;;  %2570 = vmatpush.bf16.msrb.mxu3 %v4917_v1  ;;  %v5741_v28 = vld [vmem:[#allocation13 + $0xf8] sm:$0xf0]  ;;  %v5214_v20 = vld [vmem:[#allocation13 + $0x214] sm:$0xf0] }
 0x398   :  { %v2064_v8 = vpack.c.bf16 %v2062_v33, %v2060_v32  ;;  %v5681_v32 = vld [vmem:[#allocation12 + $0x14] sm:$0xf0]  ;;  %v4904_v33 = vld [vmem:[#allocation12 + $0x90] sm:$0xf]  ;;  %v5797_v1 = vld [vmem:[#allocation13 + $0x2b8] sm:$0xf0] }
 0x399   :  { %v4905_v38 = vor.u32 %v5697_v34, %v4904_v33  ;;  %v5794_v34 = vld [vmem:[#allocation13 + $0x2a4] sm:$0xf] }
 0x39a   :  { %2285 = vmatmul.bf16.vlgmr.msrb.gmra.mxu2 %v2064_v8  ;;  %2313 = vmatmul.bf16.vlgmr.msra.gmra.mxu3 %v2064_v8  ;;  %v4841_v8 = vor.u32 %v5681_v32, %v4840_v39  ;;  %v5738_v39 = vld [vmem:[#allocation13 + $0xe4] sm:$0xf]  ;;  %v5074_v32 = vld [vmem:[#allocation13 + $0xfc] sm:$0xf0]  ;;  %v5301_v45 = vor.u32 %v5794_v34, %v5298_v35  ;;  %v5769_v34 = vld [vmem:[#allocation13 + $0x1d8] sm:$0xf0] }
 0x39b   :  { %2543 = vmatpush.bf16.msra.mxu2 %v4905_v38  ;;  %2557 = vmatpush.bf16.msrb.mxu0 %v4845_v40  ;;  %v5073_v38 = vor.u32 %v5741_v28, %v5072_v27  ;;  %v5297_v40 = vor.u32 %v5797_v1, %v5296_v29  ;;  %v5077_v42 = vor.u32 %v5738_v39, %v5074_v32  ;;  %v5713_v1 = vld [vmem:[#allocation13 + $0x18] sm:$0xf0]  ;;  %v5710_v35 = vld [vmem:[#allocation13 + $0x4] sm:$0xf] }
 0x39c   :  { %2529 = vmatpush.bf16.msra.mxu1 %v4841_v8  ;;  %2571 = vmatpush.bf16.msrb.mxu3 %v4909_v44  ;;  %v5734_v44 = vld [vmem:[#allocation13 + $0xc0] sm:$0xf0]  ;;  %v5213_v28 = vor.u32 %v5776_v15, %v5212_v13 }
 0x39d   :  { %v5045_v52 = vor.u32 %v5734_v44, %v5044_v43  ;;  %v5164_v44 = vld [vmem:[#allocation13 + $0x190] sm:$0xf]  ;;  %v5746_v13 = vld [vmem:[#allocation13 + $0x124] sm:$0xf] }
 0x39f   :  { %2544 = vmatpush.bf16.msra.mxu2 %v4897_v50  ;;  %2558 = vmatpush.bf16.msrb.mxu0 %v4837_v51  ;;  %v5787_v50 = vld [vmem:[#allocation13 + $0x26c] sm:$0xf]  ;;  %v5270_v51 = vld [vmem:[#allocation13 + $0x284] sm:$0xf0] }
 0x3a0   :  { %2530 = vmatpush.bf16.msra.mxu1 %v4833_v47  ;;  %2572 = vmatpush.bf16.msrb.mxu3 %v4901_v54  ;;  %v5731_v47 = vld [vmem:[#allocation13 + $0xac] sm:$0xf]  ;;  %v5273_v60 = vor.u32 %v5787_v50, %v5270_v51  ;;  %v5166_v51 = vld [vmem:[#allocation13 + $0x1ac] sm:$0xf0] }
 0x3a1   :  { %v5049_v23 = vor.u32 %v5731_v47, %v5046_v37  ;;  %v5760_v47 = vld [vmem:[#allocation13 + $0x194] sm:$0xf] }
 0x3a2   :  { %v5169_v59 = vor.u32 %v5760_v47, %v5166_v51  ;;  %v5248_v47 = vld [vmem:[#allocation13 + $0x238] sm:$0xf] }
 0x3a3   :  { %3319 = vmatpush.bf16.msrb.mxu2 %v5381_v36  ;;  %3333 = vmatpush.bf16.msra.mxu0 %v5161_v41  ;;  %v5724_v36 = vld [vmem:[#allocation13 + $0x74] sm:$0xf]  ;;  %v5018_v41 = vld [vmem:[#allocation13 + $0x8c] sm:$0xf0] }
 0x3a4   :  { %3305 = vmatpush.bf16.msrb.mxu1 %v5157_v57  ;;  %3347 = vmatpush.bf16.msra.mxu3 %v5385_v2  ;;  %v5727_v57 = vld [vmem:[#allocation13 + $0x88] sm:$0xf0]  ;;  %v5242_v2 = vld [vmem:[#allocation13 + $0x24c] sm:$0xf0]  ;;  %v5021_v10 = vor.u32 %v5724_v36, %v5018_v41  ;;  %v5360_v36 = vld [vmem:[#allocation13 + $0x318] sm:$0xf] }
 0x3a5   :  { %v5017_v3 = vor.u32 %v5727_v57, %v5016_v53  ;;  %v5245_v14 = vor.u32 %v5780_v0, %v5242_v2  ;;  %v5390_v53 = vld [vmem:[#allocation13 + $0x36c] sm:$0xf0]  ;;  %v5136_v57 = vld [vmem:[#allocation13 + $0x158] sm:$0xf]  ;;  %v5812_v41 = vld [vmem:[#allocation13 + $0x330] sm:$0xf0] }
 0x3a6   :  { %v5809_v0 = vld [vmem:[#allocation13 + $0x31c] sm:$0xf]  ;;  %v5362_v2 = vld [vmem:[#allocation13 + $0x334] sm:$0xf0] }
 0x3a7   :  { %3320 = vmatpush.bf16.msrb.mxu2 %v5353_v7  ;;  %3334 = vmatpush.bf16.msra.mxu0 %v5133_v12  ;;  %v5720_v12 = vld [vmem:[#allocation13 + $0x50] sm:$0xf0] }
 0x3a8   :  { %3306 = vmatpush.bf16.msrb.mxu1 %v5129_v6  ;;  %3348 = vmatpush.bf16.msra.mxu3 %v5357_v16  ;;  %v5717_v16 = vld [vmem:[#allocation13 + $0x3c] sm:$0xf]  ;;  %v4989_v24 = vor.u32 %v5720_v12, %v4988_v11 }
 0x3a9   :  { %v4993_v29 = vor.u32 %v5717_v16, %v4990_v18  ;;  %v5805_v12 = vld [vmem:[#allocation13 + $0x2f8] sm:$0xf0]  ;;  %v5802_v18 = vld [vmem:[#allocation13 + $0x2e4] sm:$0xf] }
 0x3ab   :  { %3321 = vmatpush.bf16.msrb.mxu2 %v5325_v26  ;;  %3335 = vmatpush.bf16.msra.mxu0 %v5105_v17 }
 0x3ac   :  { %3307 = vmatpush.bf16.msrb.mxu1 %v5101_v21  ;;  %3349 = vmatpush.bf16.msra.mxu3 %v5329_v30  ;;  %v4960_v30 = vld [vmem:[#allocation13] sm:$0xf] }
 0x3af   :  { %3322 = vmatpush.bf16.msrb.mxu2 %v5297_v40  ;;  %3336 = vmatpush.bf16.msra.mxu0 %v5077_v42  ;;  %v5186_v40 = vld [vmem:[#allocation13 + $0x1dc] sm:$0xf0] }
 0x3b0   :  { %3308 = vmatpush.bf16.msrb.mxu1 %v5073_v38  ;;  %3350 = vmatpush.bf16.msra.mxu3 %v5301_v45  ;;  %v5766_v38 = vld [vmem:[#allocation13 + $0x1c4] sm:$0xf]  ;;  %v5388_v45 = vld [vmem:[#allocation13 + $0x350] sm:$0xf] }
 0x3b3   :  { %3323 = vmatpush.bf16.msrb.mxu2 %v5269_v56  ;;  %3337 = vmatpush.bf16.msra.mxu0 %v5049_v23  ;;  %v5165_v56 = vor.u32 %v5763_v62, %v5164_v44  ;;  %v5389_v23 = vor.u32 %v5819_v46, %v5388_v45  ;;  %v5278_v44 = vld [vmem:[#allocation13 + $0x28c] sm:$0xf0]  ;;  %v5024_v45 = vld [vmem:[#allocation13 + $0x78] sm:$0xf]  ;;  %v5728_v46 = vld [vmem:[#allocation13 + $0x90] sm:$0xf0] }
 0x3b4   :  { %3309 = vmatpush.bf16.msrb.mxu1 %v5045_v52  ;;  %3351 = vmatpush.bf16.msra.mxu3 %v5273_v60  ;;  %v5816_v52 = vld [vmem:[#allocation13 + $0x354] sm:$0xf] }
 0x3b5   :  { %v5393_v60 = vor.u32 %v5816_v52, %v5390_v53  ;;  %v5781_v53 = vld [vmem:[#allocation13 + $0x23c] sm:$0xf] }
 0x3b7   :  { %3324 = vmatpush.bf16.msrb.mxu2 %v5241_v4  ;;  %3338 = vmatpush.bf16.msra.mxu0 %v5021_v10  ;;  %v5361_v4 = vor.u32 %v5812_v41, %v5360_v36  ;;  %v5332_v10 = vld [vmem:[#allocation13 + $0x2e0] sm:$0xf] }
 0x3b8   :  { %3310 = vmatpush.bf16.msrb.mxu1 %v5017_v3  ;;  %3352 = vmatpush.bf16.msra.mxu3 %v5245_v14  ;;  %v5137_v3 = vor.u32 %v5756_v58, %v5136_v57  ;;  %v5110_v14 = vld [vmem:[#allocation13 + $0x13c] sm:$0xf0]  ;;  %v5333_v15 = vor.u32 %v5805_v12, %v5332_v10  ;;  %v4970_v10 = vld [vmem:[#allocation13 + $0x24] sm:$0xf0] }
 0x3b9   :  { %v5113_v16 = vor.u32 %v5746_v13, %v5110_v14  ;;  %v5220_v57 = vld [vmem:[#allocation13 + $0x200] sm:$0xf]  ;;  %v5767_v13 = vld [vmem:[#allocation13 + $0x1cc] sm:$0xf]  ;;  %v5194_v14 = vld [vmem:[#allocation13 + $0x1e4] sm:$0xf0] }
 0x3ba   :  { %v4998_v36 = vld [vmem:[#allocation13 + $0x5c] sm:$0xf0] }
 0x3bb   :  { %3325 = vmatpush.bf16.msrb.mxu2 %v5213_v28  ;;  %3339 = vmatpush.bf16.msra.mxu0 %v4993_v29 }
 0x3bc   :  { %3311 = vmatpush.bf16.msrb.mxu1 %v4989_v24  ;;  %v5304_v24 = vld [vmem:[#allocation13 + $0x2a8] sm:$0xf] }
 0x411   :  { %v2272_v33 = vpop.f32.mrf.mxu1  ;;  %v2300_v8 = vpop.f32.mrf.mxu0 }
 0x412   :  { %v2273_v61 = vadd.f32 %v2272_v33, %v2099_v48  ;;  %v2301_v63 = vadd.f32 %v2300_v8, %v2100_v49  ;;  %v5217_v33 = vor.u32 %v5773_v19, %v5214_v20  ;;  %v5184_v8 = vld [vmem:[#allocation13 + $0x1c0] sm:$0xf] }
 0x413   :  { %v5185_v50 = vor.u32 %v5769_v34, %v5184_v8  ;;  %v5334_v19 = vld [vmem:[#allocation13 + $0x2fc] sm:$0xf0]  ;;  %v5276_v8 = vld [vmem:[#allocation13 + $0x270] sm:$0xf] }
 0x414   :  { %3353 = vmatpush.bf16.msra.mxu3 %v5217_v33  ;;  %v5337_v20 = vor.u32 %v5802_v18, %v5334_v19  ;;  %v5735_v33 = vld [vmem:[#allocation13 + $0xc8] sm:$0xf0]  ;;  %v2357_v19 = vld [vmem:[%s6823_s16] sm:$0x3] }
 0x415   :  { %3326 = vmatpush.bf16.msrb.mxu2 %v5185_v50  ;;  %v5026_v50 = vld [vmem:[#allocation13 + $0x94] sm:$0xf0] }
 0x419   :  { %v2274_v5 = vpop.f32.mrf.mxu1  ;;  %v2302_v6 = vpop.f32.mrf.mxu0 }
 0x41a   :  { %v2275_v21 = vadd.f32 %v2274_v5, %v2099_v48  ;;  %v2303_v22 = vadd.f32 %v2302_v6, %v2100_v49  ;;  %v4961_v49 = vor.u32 %v5713_v1, %v4960_v30  ;;  %v5365_v6 = vor.u32 %v5809_v0, %v5362_v2  ;;  %v5795_v30 = vld [vmem:[#allocation13 + $0x2ac] sm:$0xf]  ;;  %v5306_v1 = vld [vmem:[#allocation13 + $0x2c4] sm:$0xf0]  ;;  %v5222_v0 = vld [vmem:[#allocation13 + $0x21c] sm:$0xf0] }
 0x41c   :  { %3312 = vmatpush.bf16.msrb.mxu1 %v4961_v49  ;;  %v5725_v49 = vld [vmem:[#allocation13 + $0x7c] sm:$0xf] }
 0x41d   :  { %v2286_v54 = vpop.f32.mrf.mxu2  ;;  %v2314_v55 = vpop.f32.mrf.mxu3  ;;  %v5029_v52 = vor.u32 %v5725_v49, %v5026_v50  ;;  %v5144_v50 = vld [vmem:[#allocation13 + $0x160] sm:$0xf] }
 0x41e   :  { %v2287_v7 = vadd.f32 %v2286_v54, %v2273_v61  ;;  %v2315_v9 = vadd.f32 %v2314_v55, %v2301_v63  ;;  %v4965_v54 = vor.u32 %v5710_v35, %v4962_v31  ;;  %v5189_v55 = vor.u32 %v5766_v38, %v5186_v40  ;;  %v5753_v61 = vld [vmem:[#allocation13 + $0x15c] sm:$0xf]  ;;  %v5138_v63 = vld [vmem:[#allocation13 + $0x174] sm:$0xf0]  ;;  %v5791_v35 = vld [vmem:[#allocation13 + $0x288] sm:$0xf0] }
 0x41f   :  { %v5141_v5 = vor.u32 %v5753_v61, %v5138_v63  ;;  %v5732_v31 = vld [vmem:[#allocation13 + $0xb4] sm:$0xf]  ;;  %v5054_v38 = vld [vmem:[#allocation13 + $0xcc] sm:$0xf0]  ;;  %v5277_v40 = vor.u32 %v5791_v35, %v5276_v8  ;;  %v5774_v63 = vld [vmem:[#allocation13 + $0x204] sm:$0xf] }
 0x420   :  { %v2319_v25 = vmax.f32 %v2287_v7, 0.0  ;;  %v2320_v26 = vmax.f32 %v2315_v9, 0.0  ;;  %3340 = vmatpush.bf16.msra.mxu0 %v4965_v54  ;;  %3354 = vmatpush.bf16.msra.mxu3 %v5189_v55  ;;  %v5108_v7 = vld [vmem:[#allocation13 + $0x120] sm:$0xf]  ;;  %v5749_v9 = vld [vmem:[#allocation13 + $0x138] sm:$0xf0]  ;;  %v5225_v2 = vor.u32 %v5774_v63, %v5222_v0 }
 0x421   :  { %v5109_v11 = vor.u32 %v5749_v9, %v5108_v7  ;;  %v5250_v54 = vld [vmem:[#allocation13 + $0x254] sm:$0xf0]  ;;  %v5770_v7 = vld [vmem:[#allocation13 + $0x1e0] sm:$0xf0]  ;;  %v5711_v9 = vld [vmem:[#allocation13 + $0xc] sm:$0xf] }
 0x422   :  { %v5253_v55 = vor.u32 %v5781_v53, %v5250_v54  ;;  %v4973_v12 = vor.u32 %v5711_v9, %v4970_v10  ;;  %v5172_v8 = vld [vmem:[#allocation13 + $0x198] sm:$0xf] }
 0x423   :  { %v5396_v35 = vld [vmem:[#allocation13 + $0x358] sm:$0xf] }
 0x425   :  { %v2288_v17 = vpop.f32.mrf.mxu2  ;;  %v2316_v27 = vpop.f32.mrf.mxu3 }
 0x426   :  { %v2289_v39 = vadd.f32 %v2288_v17, %v2275_v21  ;;  %v2317_v32 = vadd.f32 %v2316_v27, %v2303_v22  ;;  %v5080_v21 = vld [vmem:[#allocation13 + $0xe8] sm:$0xf]  ;;  %v5742_v22 = vld [vmem:[#allocation13 + $0x100] sm:$0xf0]  ;;  %v5739_v17 = vld [vmem:[#allocation13 + $0xec] sm:$0xf] }
 0x427   :  { %v5082_v27 = vld [vmem:[#allocation13 + $0x104] sm:$0xf0] }
 0x428   :  { %v2321_v42 = vmax.f32 %v2289_v39, 0.0  ;;  %v2322_v43 = vmax.f32 %v2317_v32, 0.0  ;;  %v5085_v29 = vor.u32 %v5739_v17, %v5082_v27  ;;  %v5309_v39 = vor.u32 %v5795_v30, %v5306_v1  ;;  %v5052_v32 = vld [vmem:[#allocation13 + $0xb0] sm:$0xf] }
 0x429   :  { %v5053_v34 = vor.u32 %v5735_v33, %v5052_v32 }
 0x42a   :  { %v2323_v37 = vpack.c.bf16 %v2321_v42, %v2319_v25  ;;  %v2324_v48 = vpack.c.bf16 %v2322_v43, %v2320_v26  ;;  %v5081_v25 = vor.u32 %v5742_v22, %v5080_v21  ;;  %v5798_v26 = vld [vmem:[#allocation13 + $0x2c0] sm:$0xf0]  ;;  %v5057_v42 = vor.u32 %v5732_v31, %v5054_v38  ;;  %v5788_v43 = vld [vmem:[#allocation13 + $0x274] sm:$0xf] }
 0x42b   :  { %v5305_v28 = vor.u32 %v5798_v26, %v5304_v24  ;;  %v5281_v62 = vor.u32 %v5788_v43, %v5278_v44  ;;  %v2359_v21 = vperm.slane %v2357_v19, 0  ;;  %v2360_v24 = vperm.slane %v2357_v19, 1  ;;  %v5820_v38 = vld [vmem:[#allocation13 + $0x370] sm:$0xf0]  ;;  %v5090_v19 = vld [vmem:[#allocation13 + $0x10c] sm:$0xf0] }
 0x42c   :  { %2531 = vmatmul.bf16.vlgmr.msra.gmra.mxu1 %v2323_v37  ;;  %2545 = vmatmul.bf16.vlgmr.msra.gmra.mxu2 %v2324_v48  ;;  %v5397_v49 = vor.u32 %v5820_v38, %v5396_v35  ;;  %v5729_v35 = vld [vmem:[#allocation13 + $0x98] sm:$0xf0] }
 0x42d   :  { %2559 = vmatmul.bf16.vlgmr.msrb.gmra.mxu0 %v2323_v37  ;;  %2573 = vmatmul.bf16.vlgmr.msrb.gmra.mxu3 %v2324_v48  ;;  %v5025_v37 = vor.u32 %v5728_v46, %v5024_v45  ;;  %v5784_v48 = vld [vmem:[#allocation13 + $0x250] sm:$0xf0]  ;;  %v5398_v45 = vld [vmem:[#allocation13 + $0x374] sm:$0xf0] }
 0x42e   :  { %3361 = vmatpush.bf16.msra.mxu1 %v5165_v56  ;;  %3375 = vmatpush.bf16.msra.mxu2 %v5389_v23  ;;  %v5249_v51 = vor.u32 %v5784_v48, %v5248_v47  ;;  %v4996_v56 = vld [vmem:[#allocation13 + $0x40] sm:$0xf]  ;;  %v5721_v23 = vld [vmem:[#allocation13 + $0x58] sm:$0xf0] }
 0x42f   :  { %3389 = vmatpush.bf16.msrb.mxu0 %v5169_v59  ;;  %3403 = vmatpush.bf16.msrb.mxu3 %v5393_v60  ;;  %v4997_v58 = vor.u32 %v5721_v23, %v4996_v56  ;;  %v5777_v59 = vld [vmem:[#allocation13 + $0x218] sm:$0xf0]  ;;  %v5718_v60 = vld [vmem:[#allocation13 + $0x44] sm:$0xf] }
 0x430   :  { %v5221_v41 = vor.u32 %v5777_v59, %v5220_v57  ;;  %v5001_v61 = vor.u32 %v5718_v60, %v4998_v36  ;;  %v5813_v56 = vld [vmem:[#allocation13 + $0x338] sm:$0xf0]  ;;  %v5754_v23 = vld [vmem:[#allocation13 + $0x164] sm:$0xf]  ;;  %v5146_v57 = vld [vmem:[#allocation13 + $0x17c] sm:$0xf0] }
 0x431   :  { %v5370_v59 = vld [vmem:[#allocation13 + $0x33c] sm:$0xf0]  ;;  %v5149_v63 = vor.u32 %v5754_v23, %v5146_v57  ;;  %v5775_v23 = vld [vmem:[#allocation13 + $0x20c] sm:$0xf]  ;;  %v5230_v57 = vld [vmem:[#allocation13 + $0x224] sm:$0xf0] }
 0x432   :  { %3362 = vmatpush.bf16.msra.mxu1 %v5137_v3  ;;  %3376 = vmatpush.bf16.msra.mxu2 %v5361_v4  ;;  %v4968_v3 = vld [vmem:[#allocation13 + $0x8] sm:$0xf]  ;;  %v5714_v4 = vld [vmem:[#allocation13 + $0x20] sm:$0xf0] }
 0x433   :  { %3390 = vmatpush.bf16.msrb.mxu0 %v5141_v5  ;;  %3404 = vmatpush.bf16.msrb.mxu3 %v5365_v6  ;;  %v5192_v5 = vld [vmem:[#allocation13 + $0x1c8] sm:$0xf]  ;;  %v4969_v6 = vor.u32 %v5714_v4, %v4968_v3  ;;  %v5806_v3 = vld [vmem:[#allocation13 + $0x300] sm:$0xf0]  ;;  %v5747_v4 = vld [vmem:[#allocation13 + $0x12c] sm:$0xf] }
 0x436   :  { %3363 = vmatpush.bf16.msra.mxu1 %v5109_v11  ;;  %3377 = vmatpush.bf16.msra.mxu2 %v5333_v15  ;;  %v5193_v11 = vor.u32 %v5770_v7, %v5192_v5  ;;  %v5197_v15 = vor.u32 %v5767_v13, %v5194_v14  ;;  %v5118_v5 = vld [vmem:[#allocation13 + $0x144] sm:$0xf0] }
 0x437   :  { %3391 = vmatpush.bf16.msrb.mxu0 %v5113_v16  ;;  %3405 = vmatpush.bf16.msrb.mxu3 %v5337_v20  ;;  %v5342_v7 = vld [vmem:[#allocation13 + $0x304] sm:$0xf0]  ;;  %v5121_v13 = vor.u32 %v5747_v4, %v5118_v5  ;;  %v5768_v4 = vld [vmem:[#allocation13 + $0x1d4] sm:$0xf]  ;;  %v5202_v5 = vld [vmem:[#allocation13 + $0x1ec] sm:$0xf0] }
 0x43a   :  { %3364 = vmatpush.bf16.msra.mxu1 %v5081_v25  ;;  %3378 = vmatpush.bf16.msra.mxu2 %v5305_v28 }
 0x43b   :  { %3392 = vmatpush.bf16.msrb.mxu0 %v5085_v29  ;;  %3406 = vmatpush.bf16.msrb.mxu3 %v5309_v39 }
 0x43e   :  { %3365 = vmatpush.bf16.msra.mxu1 %v5053_v34  ;;  %3379 = vmatpush.bf16.msra.mxu2 %v5277_v40  ;;  %v5764_v34 = vld [vmem:[#allocation13 + $0x1b0] sm:$0xf0]  ;;  %v5761_v40 = vld [vmem:[#allocation13 + $0x19c] sm:$0xf] }
 0x43f   :  { %3393 = vmatpush.bf16.msrb.mxu0 %v5057_v42  ;;  %3407 = vmatpush.bf16.msrb.mxu3 %v5281_v62  ;;  %v5174_v42 = vld [vmem:[#allocation13 + $0x1b4] sm:$0xf0]  ;;  %v5817_v62 = vld [vmem:[#allocation13 + $0x35c] sm:$0xf]  ;;  %v5173_v48 = vor.u32 %v5764_v34, %v5172_v8  ;;  %v5032_v34 = vld [vmem:[#allocation13 + $0x80] sm:$0xf] }
 0x440   :  { %v5177_v53 = vor.u32 %v5761_v40, %v5174_v42  ;;  %v5401_v54 = vor.u32 %v5817_v62, %v5398_v45  ;;  %v5256_v40 = vld [vmem:[#allocation13 + $0x240] sm:$0xf]  ;;  %v5785_v42 = vld [vmem:[#allocation13 + $0x258] sm:$0xf0]  ;;  %v5782_v62 = vld [vmem:[#allocation13 + $0x244] sm:$0xf] }
 0x441   :  { %v5258_v45 = vld [vmem:[#allocation13 + $0x25c] sm:$0xf0] }
 0x442   :  { %3366 = vmatpush.bf16.msra.mxu1 %v5025_v37  ;;  %3380 = vmatpush.bf16.msra.mxu2 %v5249_v51  ;;  %v5757_v51 = vld [vmem:[#allocation13 + $0x178] sm:$0xf0] }
 0x443   :  { %3394 = vmatpush.bf16.msrb.mxu0 %v5029_v52  ;;  %3408 = vmatpush.bf16.msrb.mxu3 %v5253_v55  ;;  %v5368_v55 = vld [vmem:[#allocation13 + $0x320] sm:$0xf]  ;;  %v5145_v60 = vor.u32 %v5757_v51, %v5144_v50  ;;  %v5261_v51 = vor.u32 %v5782_v62, %v5258_v45  ;;  %v5264_v62 = vld [vmem:[#allocation13 + $0x248] sm:$0xf]  ;;  %v5786_v45 = vld [vmem:[#allocation13 + $0x260] sm:$0xf0] }
 0x444   :  { %v5369_v36 = vor.u32 %v5813_v56, %v5368_v55  ;;  %v5719_v55 = vld [vmem:[#allocation13 + $0x4c] sm:$0xf]  ;;  %v5006_v56 = vld [vmem:[#allocation13 + $0x64] sm:$0xf0] }
 0x446   :  { %3367 = vmatpush.bf16.msra.mxu1 %v4997_v58  ;;  %3381 = vmatpush.bf16.msra.mxu2 %v5221_v41  ;;  %v5810_v58 = vld [vmem:[#allocation13 + $0x324] sm:$0xf]  ;;  %v5116_v41 = vld [vmem:[#allocation13 + $0x128] sm:$0xf] }
 0x447   :  { %3395 = vmatpush.bf16.msrb.mxu0 %v5001_v61  ;;  %3409 = vmatpush.bf16.msrb.mxu3 %v5225_v2  ;;  %v5750_v61 = vld [vmem:[#allocation13 + $0x140] sm:$0xf0]  ;;  %v5373_v0 = vor.u32 %v5810_v58, %v5370_v59  ;;  %v5340_v2 = vld [vmem:[#allocation13 + $0x2e8] sm:$0xf] }
 0x448   :  { %v5117_v9 = vor.u32 %v5750_v61, %v5116_v41  ;;  %v5341_v10 = vor.u32 %v5806_v3, %v5340_v2  ;;  %v5200_v41 = vld [vmem:[#allocation13 + $0x1d0] sm:$0xf]  ;;  %v5009_v61 = vor.u32 %v5719_v55, %v5006_v56  ;;  %v5712_v2 = vld [vmem:[#allocation13 + $0x14] sm:$0xf]  ;;  %v4984_v55 = vld [vmem:[#allocation13 + $0x18] sm:$0xf] }
 0x449   :  { %v4978_v3 = vld [vmem:[#allocation13 + $0x2c] sm:$0xf0]  ;;  %v5716_v56 = vld [vmem:[#allocation13 + $0x30] sm:$0xf0] }
 0x44a   :  { %3368 = vmatpush.bf16.msra.mxu1 %v4969_v6  ;;  %3382 = vmatpush.bf16.msra.mxu2 %v5193_v11  ;;  %v5803_v6 = vld [vmem:[#allocation13 + $0x2ec] sm:$0xf]  ;;  %v5088_v11 = vld [vmem:[#allocation13 + $0xf0] sm:$0xf] }
 0x44b   :  { %3396 = vmatpush.bf16.msrb.mxu0 %v4973_v12  ;;  %3410 = vmatpush.bf16.msrb.mxu3 %v5197_v15  ;;  %v5743_v12 = vld [vmem:[#allocation13 + $0x108] sm:$0xf0]  ;;  %v5345_v14 = vor.u32 %v5803_v6, %v5342_v7  ;;  %v5312_v15 = vld [vmem:[#allocation13 + $0x2b0] sm:$0xf]  ;;  %v5180_v6 = vld [vmem:[#allocation13 + $0x1a0] sm:$0xf] }
 0x44c   :  { %v5765_v7 = vld [vmem:[#allocation13 + $0x1b8] sm:$0xf0] }
 0x4a9   :  { %v2532_v16 = vpop.f32.mrf.mxu1 }
 0x4aa   :  { %v2560_v18 = vpop.f32.mrf.mxu0  ;;  %v2533_v26 = vadd.f32 %v2532_v16, %v2359_v21  ;;  %v5799_v16 = vld [vmem:[#allocation13 + $0x2c8] sm:$0xf0] }
 0x4ab   :  { %v2561_v27 = vadd.f32 %v2560_v18, %v2360_v24  ;;  %v5740_v18 = vld [vmem:[#allocation13 + $0xf4] sm:$0xf] }
 0x4af   :  { %v2546_v20 = vpop.f32.mrf.mxu2 }
 0x4b0   :  { %v2574_v22 = vpop.f32.mrf.mxu3  ;;  %v2547_v28 = vadd.f32 %v2546_v20, %v2533_v26  ;;  %v5796_v20 = vld [vmem:[#allocation13 + $0x2b4] sm:$0xf] }
 0x4b1   :  { %v2534_v25 = vpop.f32.mrf.mxu1  ;;  %v2575_v30 = vadd.f32 %v2574_v22, %v2561_v27  ;;  %v5089_v22 = vor.u32 %v5743_v12, %v5088_v11  ;;  %v5736_v26 = vld [vmem:[#allocation13 + $0xd0] sm:$0xf0] }
 0x4b2   :  { %v2562_v17 = vpop.f32.mrf.mxu0  ;;  %v2535_v29 = vadd.f32 %v2534_v25, %v2359_v21  ;;  %v2579_v43 = vmax.f32 %v2547_v28, 0.0  ;;  %v5314_v21 = vld [vmem:[#allocation13 + $0x2cc] sm:$0xf0]  ;;  %v5060_v25 = vld [vmem:[#allocation13 + $0xb8] sm:$0xf] }
 0x4b3   :  { %v2563_v1 = vadd.f32 %v2562_v17, %v2360_v24  ;;  %v2580_v46 = vmax.f32 %v2575_v30, 0.0  ;;  %v5313_v24 = vor.u32 %v5799_v16, %v5312_v15  ;;  %v5093_v17 = vor.u32 %v5740_v18, %v5090_v19  ;;  %v5284_v28 = vld [vmem:[#allocation13 + $0x278] sm:$0xf]  ;;  %v5733_v30 = vld [vmem:[#allocation13 + $0xbc] sm:$0xf] }
 0x4b4   :  { %v5317_v27 = vor.u32 %v5796_v20, %v5314_v21  ;;  %v5181_v15 = vor.u32 %v5765_v7, %v5180_v6  ;;  %v5152_v18 = vld [vmem:[#allocation13 + $0x168] sm:$0xf]  ;;  %v5758_v19 = vld [vmem:[#allocation13 + $0x180] sm:$0xf0] }
 0x4b5   :  { %v5376_v20 = vld [vmem:[#allocation13 + $0x328] sm:$0xf]  ;;  %v5814_v21 = vld [vmem:[#allocation13 + $0x340] sm:$0xf0] }
 0x4b7   :  { %v2548_v39 = vpop.f32.mrf.mxu2 }
 0x4b8   :  { %v2549_v32 = vadd.f32 %v2548_v39, %v2535_v29  ;;  %v2576_v33 = vpop.f32.mrf.mxu3  ;;  %v5792_v29 = vld [vmem:[#allocation13 + $0x290] sm:$0xf0]  ;;  %v5789_v39 = vld [vmem:[#allocation13 + $0x27c] sm:$0xf] }
 0x4b9   :  { %v2577_v31 = vadd.f32 %v2576_v33, %v2563_v1  ;;  %v5062_v1 = vld [vmem:[#allocation13 + $0xd4] sm:$0xf0]  ;;  %v5061_v33 = vor.u32 %v5736_v26, %v5060_v25  ;;  %v5285_v8 = vor.u32 %v5792_v29, %v5284_v28  ;;  %v5124_v25 = vld [vmem:[#allocation13 + $0x130] sm:$0xf]  ;;  %v5751_v26 = vld [vmem:[#allocation13 + $0x148] sm:$0xf0] }
 0x4ba   :  { %v2581_v44 = vmax.f32 %v2549_v32, 0.0  ;;  %v5286_v32 = vld [vmem:[#allocation13 + $0x294] sm:$0xf0]  ;;  %v5125_v28 = vor.u32 %v5751_v26, %v5124_v25 }
 0x4bb   :  { %v2582_v47 = vmax.f32 %v2577_v31, 0.0  ;;  %v5065_v31 = vor.u32 %v5733_v30, %v5062_v1  ;;  %v5289_v38 = vor.u32 %v5789_v39, %v5286_v32  ;;  %v5096_v30 = vld [vmem:[#allocation13 + $0xf8] sm:$0xf]  ;;  %v5744_v1 = vld [vmem:[#allocation13 + $0x110] sm:$0xf0] }
 0x4bc   :  { %v6577_v37 = vpack.c.bf16 %v2581_v44, %v2579_v43  ;;  %v5726_v43 = vld [vmem:[#allocation13 + $0x84] sm:$0xf]  ;;  %v5034_v44 = vld [vmem:[#allocation13 + $0x9c] sm:$0xf0]  ;;  %v5320_v39 = vld [vmem:[#allocation13 + $0x2b8] sm:$0xf] }
 0x4bd   :  { %v6579_v52 = vpack.c.bf16 %v2582_v47, %v2580_v46  ;;  %v5033_v46 = vor.u32 %v5729_v35, %v5032_v34  ;;  %v5257_v47 = vor.u32 %v5785_v42, %v5256_v40  ;;  %v5037_v50 = vor.u32 %v5726_v43, %v5034_v44  ;;  %v5800_v32 = vld [vmem:[#allocation13 + $0x2d0] sm:$0xf0]  ;;  %v5068_v34 = vld [vmem:[#allocation13 + $0xc0] sm:$0xf]  ;;  %v5737_v35 = vld [vmem:[#allocation13 + $0xd8] sm:$0xf0] }
 0x4be   :  { %3313 = vmatmul.bf16.vlgmr.msrb.gmra.mxu1 %v6577_v37  ;;  %3341 = vmatmul.bf16.vlgmr.msra.gmra.mxu0 %v6577_v37  ;;  %v5069_v40 = vor.u32 %v5737_v35, %v5068_v34  ;;  %v5040_v43 = vld [vmem:[#allocation13 + $0x88] sm:$0xf]  ;;  %v5730_v44 = vld [vmem:[#allocation13 + $0xa0] sm:$0xf0] }
 0x4bf   :  { %3327 = vmatmul.bf16.vlgmr.msrb.gmra.mxu2 %v6579_v52  ;;  %3355 = vmatmul.bf16.vlgmr.msra.gmra.mxu3 %v6579_v52 }
 0x4c0   :  { %3417 = vmatpush.bf16.msrb.mxu1 %v5173_v48  ;;  %3431 = vmatpush.bf16.msrb.mxu2 %v5397_v49  ;;  %v5004_v48 = vld [vmem:[#allocation13 + $0x48] sm:$0xf]  ;;  %v5722_v49 = vld [vmem:[#allocation13 + $0x60] sm:$0xf0] }
 0x4c1   :  { %3445 = vmatpush.bf16.msra.mxu0 %v5177_v53  ;;  %3459 = vmatpush.bf16.msra.mxu3 %v5401_v54  ;;  %v5228_v53 = vld [vmem:[#allocation13 + $0x208] sm:$0xf]  ;;  %v5778_v54 = vld [vmem:[#allocation13 + $0x220] sm:$0xf0]  ;;  %v5005_v58 = vor.u32 %v5722_v49, %v5004_v48  ;;  %v5012_v48 = vld [vmem:[#allocation13 + $0x50] sm:$0xf] }
 0x4c2   :  { %v5229_v59 = vor.u32 %v5778_v54, %v5228_v53  ;;  %v5723_v49 = vld [vmem:[#allocation13 + $0x68] sm:$0xf0] }
 0x4c3   :  { %v5013_v53 = vor.u32 %v5723_v49, %v5012_v48 }
 0x4c4   :  { %3418 = vmatpush.bf16.msrb.mxu1 %v5145_v60  ;;  %3432 = vmatpush.bf16.msrb.mxu2 %v5369_v36  ;;  %v4976_v60 = vld [vmem:[#allocation13 + $0x10] sm:$0xf]  ;;  %v5715_v36 = vld [vmem:[#allocation13 + $0x28] sm:$0xf0] }
 0x4c5   :  { %3446 = vmatpush.bf16.msra.mxu0 %v5149_v63  ;;  %3460 = vmatpush.bf16.msra.mxu3 %v5373_v0  ;;  %v5233_v63 = vor.u32 %v5775_v23, %v5230_v57  ;;  %v5771_v0 = vld [vmem:[#allocation13 + $0x1e8] sm:$0xf0]  ;;  %v4977_v11 = vor.u32 %v5715_v36, %v4976_v60  ;;  %v5208_v23 = vld [vmem:[#allocation13 + $0x1d8] sm:$0xf]  ;;  %v5772_v57 = vld [vmem:[#allocation13 + $0x1f0] sm:$0xf0] }
 0x4c6   :  { %v5201_v12 = vor.u32 %v5771_v0, %v5200_v41  ;;  %v6598_v60 = vld [vmem:[%s6825_s18] sm:$0xff] }
 0x4c8   :  { %3419 = vmatpush.bf16.msrb.mxu1 %v5117_v9  ;;  %3433 = vmatpush.bf16.msrb.mxu2 %v5341_v10  ;;  %v5404_v9 = vld [vmem:[#allocation13 + $0x360] sm:$0xf]  ;;  %v5821_v10 = vld [vmem:[#allocation13 + $0x378] sm:$0xf0] }
 0x4c9   :  { %3447 = vmatpush.bf16.msra.mxu0 %v5121_v13  ;;  %3461 = vmatpush.bf16.msra.mxu3 %v5345_v14  ;;  %v4981_v13 = vor.u32 %v5712_v2, %v4978_v3  ;;  %v5205_v14 = vor.u32 %v5768_v4, %v5202_v5  ;;  %v5405_v16 = vor.u32 %v5821_v10, %v5404_v9 }
 0x4cc   :  { %3420 = vmatpush.bf16.msrb.mxu1 %v5089_v22  ;;  %3434 = vmatpush.bf16.msrb.mxu2 %v5313_v24  ;;  %v5153_v22 = vor.u32 %v5758_v19, %v5152_v18  ;;  %v5377_v24 = vor.u32 %v5814_v21, %v5376_v20  ;;  %v2717_v21 = vperm.slane %v6598_v60, 2 }
 0x4cd   :  { %3448 = vmatpush.bf16.msra.mxu0 %v5093_v17  ;;  %3462 = vmatpush.bf16.msra.mxu3 %v5317_v27  ;;  %v5348_v17 = vld [vmem:[#allocation13 + $0x2f0] sm:$0xf]  ;;  %v5807_v27 = vld [vmem:[#allocation13 + $0x308] sm:$0xf0] }
 0x4ce   :  { %3369 = vmatmul.bf16.vlgmr.msra.gmra.mxu1 %v6577_v37  ;;  %3397 = vmatmul.bf16.vlgmr.msrb.gmra.mxu0 %v6577_v37  ;;  %v5349_v29 = vor.u32 %v5807_v27, %v5348_v17 }
 0x4cf   :  { %3383 = vmatmul.bf16.vlgmr.msra.gmra.mxu2 %v6579_v52  ;;  %3411 = vmatmul.bf16.vlgmr.msrb.gmra.mxu3 %v6579_v52 }
 0x4d0   :  { %3421 = vmatpush.bf16.msrb.mxu1 %v5061_v33  ;;  %3435 = vmatpush.bf16.msrb.mxu2 %v5285_v8  ;;  %v5097_v33 = vor.u32 %v5744_v1, %v5096_v30  ;;  %v5321_v8 = vor.u32 %v5800_v32, %v5320_v39 }
 0x4d1   :  { %3449 = vmatpush.bf16.msra.mxu0 %v5065_v31  ;;  %3463 = vmatpush.bf16.msra.mxu3 %v5289_v38  ;;  %v5292_v31 = vld [vmem:[#allocation13 + $0x280] sm:$0xf]  ;;  %v5793_v38 = vld [vmem:[#allocation13 + $0x298] sm:$0xf0] }
 0x4d2   :  { %v5293_v42 = vor.u32 %v5793_v38, %v5292_v31 }
 0x4d4   :  { %3422 = vmatpush.bf16.msrb.mxu1 %v5033_v46  ;;  %3436 = vmatpush.bf16.msrb.mxu2 %v5257_v47  ;;  %v5041_v46 = vor.u32 %v5730_v44, %v5040_v43  ;;  %v5265_v47 = vor.u32 %v5786_v45, %v5264_v62  ;;  %v2719_v43 = vperm.slane %v6598_v60, 4 }
 0x4d5   :  { %3450 = vmatpush.bf16.msra.mxu0 %v5037_v50  ;;  %3464 = vmatpush.bf16.msra.mxu3 %v5261_v51  ;;  %v5236_v50 = vld [vmem:[#allocation13 + $0x210] sm:$0xf]  ;;  %v5779_v51 = vld [vmem:[#allocation13 + $0x228] sm:$0xf0] }
 0x4d6   :  { %v5237_v54 = vor.u32 %v5779_v51, %v5236_v50 }
 0x4d8   :  { %3423 = vmatpush.bf16.msrb.mxu1 %v5005_v58  ;;  %3437 = vmatpush.bf16.msrb.mxu2 %v5229_v59  ;;  %v4985_v58 = vor.u32 %v5716_v56, %v4984_v55  ;;  %v5209_v59 = vor.u32 %v5772_v57, %v5208_v23 }
 0x4d9   :  { %3451 = vmatpush.bf16.msra.mxu0 %v5009_v61  ;;  %3465 = vmatpush.bf16.msra.mxu3 %v5233_v63  ;;  %v2715_v61 = vperm.slane %v6598_v60, 0  ;;  %v2716_v63 = vperm.slane %v6598_v60, 1 }
 0x4dc   :  { %3424 = vmatpush.bf16.msrb.mxu1 %v4977_v11  ;;  %3438 = vmatpush.bf16.msrb.mxu2 %v5201_v12 }
 0x4dd   :  { %3452 = vmatpush.bf16.msra.mxu0 %v4981_v13  ;;  %3466 = vmatpush.bf16.msra.mxu3 %v5205_v14 }
 0x4df   :  { %3425 = vmatmul.bf16.vlgmr.msrb.gmra.mxu1 %v6577_v37  ;;  %3439 = vmatmul.bf16.vlgmr.msrb.gmra.mxu2 %v6579_v52 }
 0x4e0   :  { %3473 = vmatpush.bf16.msra.mxu1 %v5181_v15  ;;  %3487 = vmatpush.bf16.msra.mxu2 %v5405_v16 }
 0x4e1   :  { %3453 = vmatmul.bf16.vlgmr.msra.gmra.mxu0 %v6577_v37  ;;  %3467 = vmatmul.bf16.vlgmr.msra.gmra.mxu3 %v6579_v52 }
 0x4e4   :  { %3474 = vmatpush.bf16.msra.mxu1 %v5153_v22  ;;  %3488 = vmatpush.bf16.msra.mxu2 %v5377_v24  ;;  %v2718_v22 = vperm.slane %v6598_v60, 3 }
 0x4e8   :  { %3475 = vmatpush.bf16.msra.mxu1 %v5125_v28  ;;  %3489 = vmatpush.bf16.msra.mxu2 %v5349_v29 }
 0x4ec   :  { %3476 = vmatpush.bf16.msra.mxu1 %v5097_v33  ;;  %3490 = vmatpush.bf16.msra.mxu2 %v5321_v8 }
 0x4f0   :  { %3477 = vmatpush.bf16.msra.mxu1 %v5069_v40  ;;  %3491 = vmatpush.bf16.msra.mxu2 %v5293_v42 }
 0x4f4   :  { %3478 = vmatpush.bf16.msra.mxu1 %v5041_v46  ;;  %3492 = vmatpush.bf16.msra.mxu2 %v5265_v47  ;;  %v2720_v46 = vperm.slane %v6598_v60, 5 }
 0x4f8   :  { %3479 = vmatpush.bf16.msra.mxu1 %v5013_v53  ;;  %3493 = vmatpush.bf16.msra.mxu2 %v5237_v54 }
 0x4fc   :  { %3480 = vmatpush.bf16.msra.mxu1 %v4985_v58  ;;  %3494 = vmatpush.bf16.msra.mxu2 %v5209_v59 }
 0x4ff   :  { %3481 = vmatmul.bf16.vlgmr.msra.gmra.mxu1 %v6577_v37  ;;  %3495 = vmatmul.bf16.vlgmr.msra.gmra.mxu2 %v6579_v52 }
 0x53b   :  { %v3314_v36 = vpop.f32.mrf.mxu1  ;;  %v3342_v41 = vpop.f32.mrf.mxu0 }
 0x53c   :  { %v3315_v0 = vadd.f32 %v3314_v36, %v2715_v61  ;;  %v3343_v2 = vadd.f32 %v3342_v41, %v2716_v63 }
 0x542   :  { %v3328_v3 = vpop.f32.mrf.mxu2  ;;  %v3356_v4 = vpop.f32.mrf.mxu3 }
 0x543   :  { %v3329_v5 = vadd.f32 %v3328_v3, %v3315_v0  ;;  %v3357_v6 = vadd.f32 %v3356_v4, %v3343_v2  ;;  %v3316_v37 = vpop.f32.mrf.mxu1  ;;  %v3344_v7 = vpop.f32.mrf.mxu0 }
 0x544   :  { %v3317_v10 = vadd.f32 %v3316_v37, %v2715_v61  ;;  %v3345_v11 = vadd.f32 %v3344_v7, %v2716_v63 }
 0x545   :  { %v5406_v52 = vmul.f32 -1.442695, %v3329_v5  ;;  %v5407_v9 = vmul.f32 -1.442695, %v3357_v6 }
 0x547   :  { %5838 = vpow2.f32 %v5406_v52 }
 0x548   :  { %5840 = vpow2.f32 %v5407_v9 }
 0x54a   :  { %v3330_v12 = vpop.f32.mrf.mxu2  ;;  %v3358_v13 = vpop.f32.mrf.mxu3 }
 0x54b   :  { %v3331_v14 = vadd.f32 %v3330_v12, %v3317_v10  ;;  %v3359_v15 = vadd.f32 %v3358_v13, %v3345_v11  ;;  %v3370_v16 = vpop.f32.mrf.mxu1  ;;  %v3398_v18 = vpop.f32.mrf.mxu0 }
 0x54c   :  { %v3371_v27 = vadd.f32 %v3370_v16, %v2717_v21  ;;  %v3399_v28 = vadd.f32 %v3398_v18, %v2718_v22 }
 0x54d   :  { %v5839_v19 = vpop.eup %5838  ;;  %v5413_v20 = vmul.f32 -1.442695, %v3331_v14  ;;  %v5414_v26 = vmul.f32 -1.442695, %v3359_v15 }
 0x54e   :  { %v5841_v24 = vpop.eup %5840  ;;  %v3543_v25 = vadd.f32 1.0, %v5839_v19 }
 0x54f   :  { %v3544_v17 = vadd.f32 1.0, %v5841_v24  ;;  %5842 = vpow2.f32 %v5413_v20 }
 0x550   :  { %5844 = vrcp.f32 %v3543_v25  ;;  %v3566_v62 = vand.u32 2147483647, %v3543_v25  ;;  %v3568_v48 = vand.u32 2147483648, %v3543_v25  ;;  %vm3562_vm1 = vweird.f32 %v3543_v25 }
 0x551   :  { %5846 = vrcp.f32 %v3544_v17  ;;  %v3581_v49 = vand.u32 2147483647, %v3544_v17  ;;  %v3583_v53 = vand.u32 2147483648, %v3544_v17  ;;  %vm3577_vm4 = vweird.f32 %v3544_v17 }
 0x552   :  { %5848 = vpow2.f32 %v5414_v26  ;;  %v3384_v29 = vpop.f32.mrf.mxu2  ;;  %v3412_v30 = vpop.f32.mrf.mxu3  ;;  %vm6612_vm3 = vcmp.eq.f32.partialorder %v3566_v62, 8.507059e+37  ;;  %v3569_v41 = vor.u32 1.1754944e-38, %v3568_v48 }
 0x553   :  { %v3385_v1 = vadd.f32 %v3384_v29, %v3371_v27  ;;  %v3413_v39 = vadd.f32 %v3412_v30, %v3399_v28  ;;  %v3372_v8 = vpop.f32.mrf.mxu1  ;;  %v3400_v34 = vpop.f32.mrf.mxu0  ;;  %vm6616_vm6 = vcmp.eq.f32.partialorder %v3581_v49, 8.507059e+37  ;;  %v3584_v3 = vor.u32 1.1754944e-38, %v3583_v53 }
 0x554   :  { %v3373_v23 = vadd.f32 %v3372_v8, %v2717_v21  ;;  %v3401_v5 = vadd.f32 %v3400_v34, %v2718_v22 }
 0x555   :  { %v5843_v32 = vpop.eup %5842  ;;  %v5408_v33 = vmul.f32 -1.442695, %v3385_v1  ;;  %v5409_v38 = vmul.f32 -1.442695, %v3413_v39 }
 0x556   :  { %v5845_v35 = vpop.eup %5844  ;;  %v6604_v31 = vadd.f32 1.0, %v5843_v32 }
 0x557   :  { %v5847_v40 = vpop.eup %5846  ;;  %v3558_v42 = vmul.f32 %v5845_v35, %v3543_v25  ;;  %5850 = vpow2.f32 %v5408_v33  ;;  %vm3563_vm2 = vweird.f32 %v5845_v35 }
 0x558   :  { %v5849_v44 = vpop.eup %5848  ;;  %v3573_v45 = vmul.f32 %v5847_v40, %v3544_v17  ;;  %5852 = vrcp.f32 %v6604_v31  ;;  %vm3578_vm5 = vweird.f32 %v5847_v40  ;;  %vm3564_vm7 = vmor %vm3562_vm1, %vm3563_vm2  ;;  %vm3667_vm9 = vweird.f32 %v6604_v31 }
 0x559   :  { %v3559_v47 = vsub.f32 1.0, %v3558_v42  ;;  %v6609_v50 = vadd.f32 1.0, %v5849_v44  ;;  %5854 = vpow2.f32 %v5409_v38  ;;  %vm3579_vm8 = vmor %vm3577_vm4, %vm3578_vm5  ;;  %v3671_v13 = vand.u32 2147483647, %v6604_v31 }
 0x55a   :  { %v3574_v51 = vsub.f32 1.0, %v3573_v45  ;;  %v3386_v54 = vpop.f32.mrf.mxu2  ;;  %v3414_v55 = vpop.f32.mrf.mxu3  ;;  %v3673_v18 = vand.u32 2147483648, %v6604_v31 }
 0x55b   :  { %v3560_v56 = vmul.f32 %v5845_v35, %v3559_v47  ;;  %5856 = vrcp.f32 %v6609_v50  ;;  %v3387_v63 = vadd.f32 %v3386_v54, %v3373_v23  ;;  %v3415_v19 = vadd.f32 %v3414_v55, %v3401_v5 }
 0x55c   :  { %v3575_v58 = vmul.f32 %v5847_v40, %v3574_v51  ;;  %v3426_v52 = vpop.f32.mrf.mxu1  ;;  %v3686_v22 = vand.u32 2147483647, %v6609_v50  ;;  %v3688_v17 = vand.u32 2147483648, %v6609_v50  ;;  %vm6640_vm11 = vcmp.eq.f32.partialorder %v3671_v13, 8.507059e+37 }
 0x55d   :  { %v5851_v59 = vpop.eup %5850  ;;  %v3561_v36 = vadd.f32 %v5845_v35, %v3560_v56  ;;  %v5415_v7 = vmul.f32 -1.442695, %v3387_v63  ;;  %v3427_v30 = vadd.f32 %v3426_v52, %v2719_v43  ;;  %v3674_v39 = vor.u32 1.1754944e-38, %v3673_v18 }
 0x55e   :  { %v5853_v0 = vpop.eup %5852  ;;  %v3576_v2 = vadd.f32 %v5847_v40, %v3575_v58  ;;  %v6621_v4 = vadd.f32 1.0, %v5851_v59  ;;  %v3454_v9 = vpop.f32.mrf.mxu0  ;;  %vm3682_vm12 = vweird.f32 %v6609_v50  ;;  %v5416_v32 = vmul.f32 -1.442695, %v3415_v19 }
 0x55f   :  { %v3565_v6 = vsel %vm3564_vm7, %v5845_v35, %v3561_v36  ;;  %v3663_v37 = vmul.f32 %v5853_v0, %v6604_v31  ;;  %v5855_v10 = vpop.eup %5854  ;;  %vm3668_vm10 = vweird.f32 %v5853_v0  ;;  %vm6652_vm15 = vcmp.eq.f32.partialorder %v3686_v22, 8.507059e+37 }
 0x560   :  { %v3570_v11 = vsel %vm6612_vm3, %v3569_v41, %v3565_v6  ;;  %v3580_v12 = vsel %vm3579_vm8, %v5847_v40, %v3576_v2  ;;  %5858 = vrcp.f32 %v6621_v4  ;;  %v6634_v24 = vadd.f32 1.0, %v5855_v10  ;;  %vm3669_vm13 = vmor %vm3667_vm9, %vm3668_vm10 }
 0x561   :  { %v5857_v14 = vpop.eup %5856  ;;  %v3585_v15 = vsel %vm6616_vm6, %v3584_v3, %v3580_v12  ;;  %v3664_v16 = vsub.f32 1.0, %v3663_v37  ;;  %5860 = vpow2.f32 %v5415_v7  ;;  %v3689_v40 = vor.u32 1.1754944e-38, %v3688_v17 }
 0x562   :  { %v3767_v20 = vpack.c.bf16 %v3585_v15, %v3570_v11  ;;  %v3678_v21 = vmul.f32 %v5857_v14, %v6609_v50  ;;  %v3440_v25 = vpop.f32.mrf.mxu2  ;;  %5862 = vrcp.f32 %v6634_v24  ;;  %vm3683_vm14 = vweird.f32 %v5857_v14 }
 0x563   :  { %v3665_v26 = vmul.f32 %v5853_v0, %v3664_v16  ;;  %v3441_v35 = vadd.f32 %v3440_v25, %v3427_v30  ;;  %v3455_v44 = vadd.f32 %v3454_v9, %v2720_v46  ;;  %vm3592_vm0 = vweird.f32 %v6621_v4  ;;  %vm3684_vm1 = vmor %vm3682_vm12, %vm3683_vm14 }
 0x564   :  { %v3468_v27 = vpop.f32.mrf.mxu3  ;;  %3775 = vst [vmem:[%s6826_s19] sm:$0xff] %v3767_v20  ;;  %v3679_v29 = vsub.f32 1.0, %v3678_v21  ;;  %5864 = vpow2.f32 %v5416_v32  ;;  %v3596_v49 = vand.u32 2147483647, %v6621_v4  ;;  %v3428_v53 = vpop.f32.mrf.mxu1  ;;  %v3598_v23 = vand.u32 2147483648, %v6621_v4 }
 0x565   :  { %v3666_v1 = vadd.f32 %v5853_v0, %v3665_v26  ;;  %v5410_v31 = vmul.f32 -1.442695, %v3441_v35  ;;  %v3469_v51 = vadd.f32 %v3468_v27, %v3455_v44  ;;  %v3429_v63 = vadd.f32 %v3428_v53, %v2719_v43 }
 0x566   :  { %v6648_v33 = vpop.eup %5858  ;;  %v3680_v8 = vmul.f32 %v5857_v14, %v3679_v29  ;;  %v3456_v54 = vpop.f32.mrf.mxu0  ;;  %v3613_v5 = vand.u32 2147483648, %v6634_v24  ;;  %v3611_v43 = vand.u32 2147483647, %v6634_v24  ;;  %vm3597_vm5 = vcmp.eq.f32.partialorder %v3596_v49, 8.507059e+37 }
 0x567   :  { %v3670_v38 = vsel %vm3669_vm13, %v5853_v0, %v3666_v1  ;;  %v3588_v42 = vmul.f32 %v6648_v33, %v6621_v4  ;;  %v5861_v45 = vpop.eup %5860  ;;  %5866 = vpow2.f32 %v5410_v31  ;;  %vm3593_vm2 = vweird.f32 %v6648_v33 }
 0x568   :  { %v3681_v62 = vadd.f32 %v5857_v14, %v3680_v8  ;;  %v3675_v47 = vsel %vm6640_vm11, %v3674_v39, %v3670_v38  ;;  %v5863_v55 = vpop.eup %5862  ;;  %v6667_v57 = vadd.f32 1.0, %v5861_v45  ;;  %v3457_v0 = vadd.f32 %v3456_v54, %v2720_v46  ;;  %vm6686_vm3 = vmor %vm3592_vm0, %vm3593_vm2 }
 0x569   :  { %v3589_v48 = vsub.f32 1.0, %v3588_v42  ;;  %v3603_v50 = vmul.f32 %v5863_v55, %v6634_v24  ;;  %v5411_v6 = vmul.f32 -1.442695, %v3469_v51  ;;  %vm3608_vm4 = vweird.f32 %v5863_v55 }
 0x56a   :  { %v3685_v56 = vsel %vm3684_vm1, %v5857_v14, %v3681_v62  ;;  %v3442_v36 = vpop.f32.mrf.mxu2  ;;  %5868 = vrcp.f32 %v6667_v57  ;;  %v5865_v37 = vpop.eup %5864  ;;  %v3599_v13 = vor.u32 1.1754944e-38, %v3598_v23  ;;  %vm3607_vm6 = vweird.f32 %v6634_v24 }
 0x56b   :  { %v3690_v58 = vsel %vm6652_vm15, %v3689_v40, %v3685_v56  ;;  %v3590_v59 = vmul.f32 %v6648_v33, %v3589_v48  ;;  %v3604_v3 = vsub.f32 1.0, %v3603_v50  ;;  %v3443_v46 = vadd.f32 %v3442_v36, %v3429_v63  ;;  %vm3609_vm7 = vmor %vm3607_vm6, %vm3608_vm4 }
 0x56c   :  { %v3470_v41 = vpop.f32.mrf.mxu3  ;;  %v3771_v61 = vpack.c.bf16 %v3690_v58, %v3675_v47  ;;  %v6694_v11 = vadd.f32 1.0, %v5865_v37  ;;  %5870 = vpow2.f32 %v5411_v6  ;;  %v3614_v15 = vor.u32 1.1754944e-38, %v3613_v5 }
 0x56d   :  { %v3591_v2 = vadd.f32 %v6648_v33, %v3590_v59  ;;  %v3471_v52 = vadd.f32 %v3470_v41, %v3457_v0  ;;  %v3605_v10 = vmul.f32 %v5863_v55, %v3604_v3  ;;  %v5867_v12 = vpop.eup %5866  ;;  %v5417_v4 = vmul.f32 -1.442695, %v3443_v46 }
 0x56e   :  { %3779 = vst [vmem:[%s6826_s19 + $0x1c] sm:$0xff] %v3771_v61  ;;  %5872 = vrcp.f32 %v6694_v11  ;;  %v6698_v19 = vadd.f32 1.0, %v5867_v12  ;;  %vm3612_vm8 = vcmp.eq.f32.partialorder %v3611_v43, 8.507059e+37  ;;  %v3701_v29 = vand.u32 2147483647, %v6667_v57 }
 0x56f   :  { %v3595_v9 = vsel %vm6686_vm3, %v6648_v33, %v3591_v2  ;;  %v3606_v14 = vadd.f32 %v5863_v55, %v3605_v10  ;;  %5874 = vpow2.f32 %v5417_v4  ;;  %v5418_v20 = vmul.f32 -1.442695, %v3471_v52 }
 0x570   :  { %v5869_v16 = vpop.eup %5868  ;;  %v3600_v18 = vsel %vm3597_vm5, %v3599_v13, %v3595_v9  ;;  %5876 = vrcp.f32 %v6698_v19  ;;  %v3703_v33 = vand.u32 2147483648, %v6667_v57  ;;  %v3716_v8 = vand.u32 2147483647, %v6694_v11 }
 0x571   :  { %v3610_v21 = vsel %vm3609_vm7, %v5863_v55, %v3606_v14  ;;  %v3693_v22 = vmul.f32 %v5869_v16, %v6667_v57  ;;  %5878 = vpow2.f32 %v5418_v20  ;;  %vm3698_vm9 = vweird.f32 %v5869_v16 }
 0x572   :  { %v3615_v25 = vsel %vm3612_vm8, %v3614_v15, %v3610_v21  ;;  %v5871_v24 = vpop.eup %5870  ;;  %vm3697_vm10 = vweird.f32 %v6667_v57  ;;  %v3718_v38 = vand.u32 2147483648, %v6694_v11  ;;  %vm6722_vm12 = vcmp.eq.f32.partialorder %v3701_v29, 8.507059e+37 }
 0x573   :  { %v3768_v26 = vpack.c.bf16 %v3615_v25, %v3600_v18  ;;  %v3694_v17 = vsub.f32 1.0, %v3693_v22  ;;  %v6706_v30 = vadd.f32 1.0, %v5871_v24  ;;  %vm6718_vm11 = vmor %vm3697_vm10, %vm3698_vm9  ;;  %v2721_v45 = vperm.slane %v6598_v60, 6 }
 0x574   :  { %v5873_v27 = vpop.eup %5872  ;;  %v3704_v51 = vor.u32 1.1754944e-38, %v3703_v33  ;;  %vm3712_vm14 = vweird.f32 %v6694_v11  ;;  %vm6733_vm15 = vcmp.eq.f32.partialorder %v3716_v8, 8.507059e+37  ;;  %v3719_v56 = vor.u32 1.1754944e-38, %v3718_v38 }
 0x575   :  { %3776 = vst [vmem:[%s6826_s19 + $0x8] sm:$0xff] %v3768_v26  ;;  %v3695_v28 = vmul.f32 %v5869_v16, %v3694_v17  ;;  %v5875_v1 = vpop.eup %5874  ;;  %v3708_v39 = vmul.f32 %v5873_v27, %v6694_v11  ;;  %5880 = vrcp.f32 %v6706_v30  ;;  %vm3713_vm13 = vweird.f32 %v5873_v27 }
 0x576   :  { %v6712_v34 = vpop.eup %5876  ;;  %v6716_v40 = vadd.f32 1.0, %v5875_v1  ;;  %vm3622_vm0 = vweird.f32 %v6698_v19  ;;  %vm3714_vm1 = vmor %vm3712_vm14, %vm3713_vm13  ;;  %v3626_v59 = vand.u32 2147483647, %v6698_v19  ;;  %v3628_v2 = vand.u32 2147483648, %v6698_v19 }
 0x577   :  { %v3696_v32 = vadd.f32 %v5869_v16, %v3695_v28  ;;  %v3709_v35 = vsub.f32 1.0, %v3708_v39  ;;  %v3618_v31 = vmul.f32 %v6712_v34, %v6698_v19  ;;  %v5879_v47 = vpop.eup %5878  ;;  %vm3623_vm2 = vweird.f32 %v6712_v34 }
 0x578   :  { %5882 = vrcp.f32 %v6716_v40  ;;  %v6738_v60 = vadd.f32 1.0, %v5879_v47  ;;  %v3641_v3 = vand.u32 2147483647, %v6706_v30  ;;  %v3643_v7 = vand.u32 2147483648, %v6706_v30  ;;  %vm6757_vm3 = vmor %vm3622_vm0, %vm3623_vm2 }
 0x579   :  { %v3700_v48 = vsel %vm6718_vm11, %v5869_v16, %v3696_v32  ;;  %v3710_v49 = vmul.f32 %v5873_v27, %v3709_v35  ;;  %v3619_v54 = vsub.f32 1.0, %v3618_v31  ;;  %vm6761_vm4 = vcmp.eq.f32.partialorder %v3626_v59, 8.507059e+37 }
 0x57a   :  { %v3705_v57 = vsel %vm6722_vm12, %v3704_v51, %v3700_v48  ;;  %5884 = vrcp.f32 %v6738_v60  ;;  %v3629_v4 = vor.u32 1.1754944e-38, %v3628_v2  ;;  %vm3637_vm6 = vweird.f32 %v6706_v30 }
 0x57b   :  { %v3711_v55 = vadd.f32 %v5873_v27, %v3710_v49  ;;  %v5881_v23 = vpop.eup %5880  ;;  %v3620_v58 = vmul.f32 %v6712_v34, %v3619_v54  ;;  %vm6773_vm7 = vcmp.eq.f32.partialorder %v3641_v3, 8.507059e+37  ;;  %v3644_v19 = vor.u32 1.1754944e-38, %v3643_v7 }
 0x57c   :  { %v3482_v42 = vpop.f32.mrf.mxu1  ;;  %v3633_v36 = vmul.f32 %v5881_v23, %v6706_v30  ;;  %vm3638_vm5 = vweird.f32 %v5881_v23  ;;  %vm3727_vm10 = vweird.f32 %v6716_v40  ;;  %v3731_v17 = vand.u32 2147483647, %v6716_v40 }
 0x57d   :  { %v3715_v50 = vsel %vm3714_vm1, %v5873_v27, %v3711_v55  ;;  %v3483_v41 = vadd.f32 %v3482_v42, %v2721_v45  ;;  %v3621_v0 = vadd.f32 %v6712_v34, %v3620_v58  ;;  %vm3639_vm9 = vmor %vm3637_vm6, %vm3638_vm5  ;;  %v3733_v24 = vand.u32 2147483648, %v6716_v40 }
 0x57e   :  { %v3720_v63 = vsel %vm6733_vm15, %v3719_v56, %v3715_v50  ;;  %v5883_v5 = vpop.eup %5882  ;;  %v3634_v37 = vsub.f32 1.0, %v3633_v36  ;;  %v3746_v33 = vand.u32 2147483647, %v6738_v60  ;;  %v3748_v8 = vand.u32 2147483648, %v6738_v60 }
 0x57f   :  { %v3772_v6 = vpack.c.bf16 %v3720_v63, %v3705_v57  ;;  %v3723_v9 = vmul.f32 %v5883_v5, %v6716_v40  ;;  %v3625_v10 = vsel %vm6757_vm3, %v6712_v34, %v3621_v0  ;;  %vm3728_vm8 = vweird.f32 %v5883_v5 }
 0x580   :  { %v3635_v11 = vmul.f32 %v5881_v23, %v3634_v37  ;;  %v5885_v16 = vpop.eup %5884  ;;  %v3630_v20 = vsel %vm6761_vm4, %v3629_v4, %v3625_v10  ;;  %vm6786_vm11 = vmor %vm3727_vm10, %vm3728_vm8  ;;  %vm3732_vm13 = vcmp.eq.f32.partialorder %v3731_v17, 8.507059e+37  ;;  %v3734_v42 = vor.u32 1.1754944e-38, %v3733_v24 }
 0x581   :  { %3780 = vst [vmem:[%s6826_s19 + $0x24] sm:$0xff] %v3772_v6  ;;  %v3724_v15 = vsub.f32 1.0, %v3723_v9  ;;  %v3738_v22 = vmul.f32 %v5885_v16, %v6738_v60  ;;  %vm3743_vm12 = vweird.f32 %v5885_v16  ;;  %vm3742_vm14 = vweird.f32 %v6738_v60 }
 0x582   :  { %v3496_v61 = vpop.f32.mrf.mxu2  ;;  %v3636_v18 = vadd.f32 %v5881_v23, %v3635_v11  ;;  %vm3744_vm15 = vmor %vm3742_vm14, %vm3743_vm12  ;;  %vm3747_vm0 = vcmp.eq.f32.partialorder %v3746_v33, 8.507059e+37 }
 0x583   :  { %v3497_v43 = vadd.f32 %v3496_v61, %v3483_v41  ;;  %v3725_v21 = vmul.f32 %v5883_v5, %v3724_v15  ;;  %v3739_v30 = vsub.f32 1.0, %v3738_v22 }
 0x584   :  { %v3484_v13 = vpop.f32.mrf.mxu1  ;;  %v3640_v26 = vsel %vm3639_vm9, %v5881_v23, %v3636_v18 }
 0x585   :  { %v5412_v12 = vmul.f32 -1.442695, %v3497_v43  ;;  %v3485_v25 = vadd.f32 %v3484_v13, %v2721_v45  ;;  %v3645_v28 = vsel %vm6773_vm7, %v3644_v19, %v3640_v26  ;;  %v3726_v29 = vadd.f32 %v5883_v5, %v3725_v21 }
 0x586   :  { %v3769_v39 = vpack.c.bf16 %v3645_v28, %v3630_v20  ;;  %v3740_v35 = vmul.f32 %v5885_v16, %v3739_v30  ;;  %v3749_v45 = vor.u32 1.1754944e-38, %v3748_v8 }
 0x587   :  { %5886 = vpow2.f32 %v5412_v12  ;;  %v3730_v34 = vsel %vm6786_vm11, %v5883_v5, %v3726_v29 }
 0x588   :  { %3777 = vst [vmem:[%s6826_s19 + $0x10] sm:$0xff] %v3769_v39  ;;  %v3741_v44 = vadd.f32 %v5885_v16, %v3740_v35  ;;  %v3735_v31 = vsel %vm3732_vm13, %v3734_v42, %v3730_v34 }
 0x58a   :  { %v3498_v27 = vpop.f32.mrf.mxu2  ;;  %v3745_v47 = vsel %vm3744_vm15, %v5885_v16, %v3741_v44 }
 0x58b   :  { %v3499_v1 = vadd.f32 %v3498_v27, %v3485_v25  ;;  %v3750_v48 = vsel %vm3747_vm0, %v3749_v45, %v3745_v47 }
 0x58c   :  { %v3773_v49 = vpack.c.bf16 %v3750_v48, %v3735_v31 }
 0x58d   :  { %v5419_v38 = vmul.f32 -1.442695, %v3499_v1  ;;  %v5887_v40 = vpop.eup %5886 }
 0x58e   :  { %v3549_v62 = vadd.f32 1.0, %v5887_v40  ;;  %3781 = vst [vmem:[%s6826_s19 + $0x2c] sm:$0xff] %v3773_v49 }
 0x58f   :  { %5888 = vpow2.f32 %v5419_v38 }
 0x590   :  { %5890 = vrcp.f32 %v3549_v62  ;;  %v3658_v60 = vand.u32 2147483648, %v3549_v62  ;;  %v3656_v57 = vand.u32 2147483647, %v3549_v62  ;;  %vm3652_vm2 = vweird.f32 %v3549_v62 }
 0x592   :  { %v3659_v50 = vor.u32 1.1754944e-38, %v3658_v60  ;;  %vm3657_vm4 = vcmp.eq.f32.partialorder %v3656_v57, 8.507059e+37 }
 0x595   :  { %v5889_v51 = vpop.eup %5888 }
 0x596   :  { %v3556_v53 = vadd.f32 1.0, %v5889_v51  ;;  %v5891_v54 = vpop.eup %5890 }
 0x597   :  { %v3648_v55 = vmul.f32 %v5891_v54, %v3549_v62  ;;  %vm3653_vm1 = vweird.f32 %v5891_v54 }
 0x598   :  { %5892 = vrcp.f32 %v3556_v53  ;;  %vm3654_vm3 = vmor %vm3652_vm2, %vm3653_vm1  ;;  %v3763_v2 = vand.u32 2147483648, %v3556_v53  ;;  %v3761_v5 = vand.u32 2147483647, %v3556_v53  ;;  %vm3757_vm6 = vweird.f32 %v3556_v53 }
 0x599   :  { %v3649_v56 = vsub.f32 1.0, %v3648_v55 }
 0x59a   :  { %v3764_v37 = vor.u32 1.1754944e-38, %v3763_v2  ;;  %vm3762_vm8 = vcmp.eq.f32.partialorder %v3761_v5, 8.507059e+37 }
 0x59b   :  { %v3650_v23 = vmul.f32 %v5891_v54, %v3649_v56 }
 0x59d   :  { %v3651_v59 = vadd.f32 %v5891_v54, %v3650_v23 }
 0x59e   :  { %v5893_v58 = vpop.eup %5892 }
 0x59f   :  { %v3753_v36 = vmul.f32 %v5893_v58, %v3556_v53  ;;  %v3655_v41 = vsel %vm3654_vm3, %v5891_v54, %v3651_v59  ;;  %vm3758_vm5 = vweird.f32 %v5893_v58 }
 0x5a0   :  { %v3660_v61 = vsel %vm3657_vm4, %v3659_v50, %v3655_v41  ;;  %vm3759_vm7 = vmor %vm3757_vm6, %vm3758_vm5 }
 0x5a1   :  { %v3754_v63 = vsub.f32 1.0, %v3753_v36  ;;  %v3770_v0 = vpack.c.bf16 %v3660_v61, %v3660_v61 }
 0x5a3   :  { %v3755_v3 = vmul.f32 %v5893_v58, %v3754_v63  ;;  %3778 = vst [vmem:[%s6826_s19 + $0x18] sm:$0xf] %v3770_v0 }
 0x5a5   :  { %v3756_v6 = vadd.f32 %v5893_v58, %v3755_v3 }
 0x5a7   :  { %v3760_v7 = vsel %vm3759_vm7, %v5893_v58, %v3756_v6 }
 0x5a8   :  { %v3765_v43 = vsel %vm3762_vm8, %v3764_v37, %v3760_v7 }
 0x5a9   :  { %v3774_v46 = vpack.c.bf16 %v3765_v43, %v3765_v43 }
 0x5ab   :  { %3782 = vst [vmem:[%s6826_s19 + $0x34] sm:$0xf] %v3774_v46 }
 0x5ac   :  { %3791 = vsyncpa [#allocation3], 1 }
 0x5ad   :  { %3792 = vsyncpa [#allocation5], 1 }
 0x5ae   :  { %3793 = vsyncpa [#allocation8], 1 }
 0x5af   :  { %3794 = vsyncpa [#allocation11], 1 }
 0x5b0   :  { %3795 = vsyncpa [#allocation14], 1 }

</bundles_post_ra>
